<compile_context>
chip_gen: v5e
topology: v5e:2x2
jax: 0.10.0
libtpu: 0.0.40
codegen_flags: <defaults>
</compile_context>

<pallas_src>
import numpy as np
import jax
import jax.numpy as jnp
from jax.experimental import pallas as pl
from jax.experimental.pallas import tpu as pltpu

NEG_SLOPE = 0.2
GN_EPS = 1e-5
EMB = 64


def _leaky(v):
    return jnp.where(v > 0, v, NEG_SLOPE * v)


def _cond_disc_kernel(
    x_ref, cond_ref,
    wc1_ref, bc1_ref, wc2_ref, bc2_ref,
    w1_ref, b1_ref, g1g_ref, g1b_ref, mg1_ref, mg1t_ref,
    w2_ref, b2_ref, g2g_ref, g2b_ref, mg2_ref, mg2t_ref,
    w3_ref, b3_ref, g3g_ref, g3b_ref, mg3_ref, mg3t_ref,
    wf1_ref, bf1_ref, wf2_ref, bf2_ref,
    out_ref,
):
    f32 = jnp.float32
    bf16 = jnp.bfloat16
    _, bt, l4, _ = x_ref.shape                     # (4 phases, BT, L4, Cin)

    def prev(a):                                   # a[u-1], zero at u == 0
        z = jnp.zeros_like(a[:, :1, :])
        return jnp.concatenate([z, a[:, :-1, :]], axis=1)

    def nxt(a):                                    # a[u+1], zero at u == L4-1
        z = jnp.zeros_like(a[:, :1, :])
        return jnp.concatenate([a[:, 1:, :], z], axis=1)

    def conv_gn_leaky(cols, w_ref, b_ref, mg_ref, mgt_ref, gg_ref, gb_ref,
                      out_dtype):
        # cols: (BT, n, 3*Cin) bf16; one MXU matmul for all phases of a layer.
        n = cols.shape[1]
        k = cols.shape[2]
        cout = w_ref.shape[1]
        y = jnp.dot(cols.reshape(bt * n, k), w_ref[...],
                    preferred_element_type=f32) + b_ref[...]
        y = y.reshape(bt, n, cout)                          # f32
        # GroupNorm stats: true per-sample reductions over the position axis.
        s1 = jnp.sum(y, axis=1)                             # (BT, C)
        s2 = jnp.sum(y * y, axis=1)                         # (BT, C)  (f32)
        gs1 = jnp.dot(s1, mg_ref[...], preferred_element_type=f32)   # (BT, G)
        gs2 = jnp.dot(s2, mg_ref[...], preferred_element_type=f32)
        groups = mg_ref.shape[1]
        inv_cnt = 1.0 / (n * (cout // groups))
        mean = gs1 * inv_cnt
        var = gs2 * inv_cnt - mean * mean
        inv = jax.lax.rsqrt(var + GN_EPS)
        mean_c = jnp.dot(mean, mgt_ref[...], preferred_element_type=f32)  # (BT, C)
        inv_c = jnp.dot(inv, mgt_ref[...], preferred_element_type=f32)
        scale = inv_c * gg_ref[...]                          # (BT, C)
        shift = gb_ref[...] - mean_c * scale                 # (BT, C)
        h = _leaky(y * scale[:, None, :] + shift[:, None, :])
        return h.astype(out_dtype)

    # ---- conditioning MLPs (block-diagonal packed, one path) -----------------
    cond = cond_ref[...][:, 0, :]                            # (BT, 128) bf16
    c1 = _leaky(jnp.dot(cond, wc1_ref[...], preferred_element_type=f32)
                + bc1_ref[...])
    emb = _leaky(jnp.dot(c1.astype(bf16), wc2_ref[...],
                         preferred_element_type=f32) + bc2_ref[...])  # (BT, 128)

    # ---- conv block 1: stride 1, Cin -> 32, GroupNorm(8) ---------------------
    # input phase q holds X[4u+q]; output phase p holds Y1[4u+p].
    x0, x1, x2, x3 = x_ref[0], x_ref[1], x_ref[2], x_ref[3]  # (BT, L4, Cin) bf16
    c0 = jnp.concatenate([prev(x3), x0, x1], axis=2)
    c1p = jnp.concatenate([x0, x1, x2], axis=2)
    c2p = jnp.concatenate([x1, x2, x3], axis=2)
    c3p = jnp.concatenate([x2, x3, nxt(x0)], axis=2)
    cols1 = jnp.concatenate([c0, c1p, c2p, c3p], axis=1)     # (BT, 4*L4, 6)
    h1 = conv_gn_leaky(cols1, w1_ref, b1_ref, mg1_ref, mg1t_ref,
                       g1g_ref, g1b_ref, bf16)               # (BT, 4*L4, 32)
    h1_0 = h1[:, 0 * l4:1 * l4, :]
    h1_1 = h1[:, 1 * l4:2 * l4, :]
    h1_2 = h1[:, 2 * l4:3 * l4, :]
    h1_3 = h1[:, 3 * l4:4 * l4, :]

    # ---- conv block 2: stride 2, 32 -> 64, GroupNorm(16) ---------------------
    # even outputs Y2[4u]   read Y1[4u-1], Y1[4u],   Y1[4u+1]
    # odd  outputs Y2[4u+2] read Y1[4u+1], Y1[4u+2], Y1[4u+3]
    ce = jnp.concatenate([prev(h1_3), h1_0, h1_1], axis=2)   # (BT, L4, 96)
    co = jnp.concatenate([h1_1, h1_2, h1_3], axis=2)
    cols2 = jnp.concatenate([ce, co], axis=1)                # (BT, 2*L4, 96)
    h2 = conv_gn_leaky(cols2, w2_ref, b2_ref, mg2_ref, mg2t_ref,
                       g2g_ref, g2b_ref, bf16)               # (BT, 2*L4, 64)
    h2e = h2[:, :l4, :]
    h2o = h2[:, l4:, :]

    # ---- conv block 3: stride 2, 64 -> 128, GroupNorm(32) --------------------
    # Y3[t] reads Y2[2t-1], Y2[2t], Y2[2t+1]
    cols3 = jnp.concatenate([prev(h2o), h2e, h2o], axis=2)   # (BT, L4, 192)
    h3 = conv_gn_leaky(cols3, w3_ref, b3_ref, mg3_ref, mg3t_ref,
                       g3g_ref, g3b_ref, f32)                # (BT, L4, 128) f32

    # ---- AdaptiveAvgPool1d(4): per-sample segment means over positions -------
    slots = []
    for t in range(4):
        s = (t * l4) // 4
        e = ((t + 1) * l4 + 3) // 4
        slots.append(jnp.sum(h3[:, s:e, :], axis=1) * (1.0 / (e - s)))
    pooled = jnp.concatenate(slots, axis=1)                  # (BT, 512) f32

    # ---- fc head: one matmul over [pooled | mod_emb | sig_emb] ---------------
    feats = jnp.concatenate([pooled.astype(bf16), emb.astype(bf16)], axis=1)
    z = _leaky(jnp.dot(feats, wf1_ref[...], preferred_element_type=f32)
               + bf1_ref[...])                               # (BT, 256)
    logit = jnp.dot(z.astype(bf16), wf2_ref[...],
                    preferred_element_type=f32) + bf2_ref[...]   # (BT, 1)
    prob = 1.0 / (1.0 + jnp.exp(-logit))
    out_ref[...] = prob[:, :, None]                          # (BT, 1, 1)


# ---------------- glue: deterministic parameter construction ------------------
def init_params(key, num_channels=2, num_mod_types=6, num_sig_types=8):
    keys = iter(jax.random.split(key, 32))

    def nrm(shape, scale):
        return (scale * jax.random.normal(next(keys), shape)).astype(jnp.float32)

    p = {}
    p["mod_table"] = nrm((num_mod_types, EMB), 1.0)
    p["sig_table"] = nrm((num_sig_types, EMB), 1.0)
    for pre in ("mod", "sig"):                      # Linear weights as (in, out)
        p[f"{pre}_w1"] = nrm((EMB, EMB), 0.12)
        p[f"{pre}_b1"] = nrm((EMB,), 0.1)
        p[f"{pre}_w2"] = nrm((EMB, EMB), 0.12)
        p[f"{pre}_b2"] = nrm((EMB,), 0.1)

    def conv(cin, cout):
        w = nrm((cout, cin, 3), 0.3)
        sigma = jnp.linalg.svd(w.reshape(cout, cin * 3), compute_uv=False)[0]
        return w / sigma, nrm((cout,), 0.1)          # spectral norm (exact sigma)

    p["conv1_w"], p["conv1_b"] = conv(num_channels, 32)
    p["conv2_w"], p["conv2_b"] = conv(32, 64)
    p["conv3_w"], p["conv3_b"] = conv(64, 128)
    for i, c in ((1, 32), (2, 64), (3, 128)):
        p[f"gn{i}_g"] = (1.0 + nrm((c,), 0.1)).astype(jnp.float32)
        p[f"gn{i}_b"] = nrm((c,), 0.1)

    # fc1_w rows follow the torch flatten order: row = c*4 + t for the pooled
    # features, then 64 mod-embedding rows, then 64 sig-embedding rows.
    p["fc1_w"] = nrm((4 * 128 + 2 * EMB, 256), 0.05)
    p["fc1_b"] = nrm((256,), 0.05)
    p["fc2_w"] = nrm((256, 1), 0.05)
    p["fc2_b"] = nrm((1,), 0.05)
    return p


def _pick_batch_tile(B):
    # Largest divisor of B that is <= 64 and (when B >= 2) <= B//2 so the grid
    # has >= 2 steps (both v7x TensorCores get work; also overlaps input DMA).
    target = min(64, B)
    if B >= 2:
        target = min(target, max(1, B // 2))
    bt = 1
    for d in range(1, target + 1):
        if B % d == 0:
            bt = d
    return bt


def conditional_discriminator(img, mod_type, sig_type, params, *, batch_tile=None):
    B, Cin, L = img.shape
    assert L % 32 == 0, "requires L % 32 == 0 (per-phase length multiple of 8)"
    L4 = L // 4
    BT = _pick_batch_tile(B) if batch_tile is None else batch_tile
    assert B % BT == 0
    bf16 = jnp.bfloat16

    # ---- polyphase decomposition of the raw input (no im2col inflation) ------
    x = img.astype(bf16)
    xph = jnp.stack([x[:, :, p::4] for p in range(4)], axis=0)   # (4, B, Cin, L4)
    xph = jnp.transpose(xph, (0, 1, 3, 2))                        # (4, B, L4, Cin)

    mod_e = params["mod_table"][mod_type]                         # (B, 64)
    sig_e = params["sig_table"][sig_type]
    cond = jnp.concatenate([mod_e, sig_e], axis=1)[:, None, :].astype(bf16)

    # ---- parameter packing ----------------------------------------------------
    def blkdiag(a, b):
        za = jnp.zeros((a.shape[0], b.shape[1]), jnp.float32)
        zb = jnp.zeros((b.shape[0], a.shape[1]), jnp.float32)
        return jnp.concatenate(
            [jnp.concatenate([a, za], 1), jnp.concatenate([zb, b], 1)], 0)

    wc1 = blkdiag(params["mod_w1"], params["sig_w1"]).astype(bf16)
    bc1 = jnp.concatenate([params["mod_b1"], params["sig_b1"]])[None, :]
    wc2 = blkdiag(params["mod_w2"], params["sig_w2"]).astype(bf16)
    bc2 = jnp.concatenate([params["mod_b2"], params["sig_b2"]])[None, :]

    def pack_conv(w):                               # (Cout,Cin,3) -> (3*Cin,Cout)
        co, ci, _ = w.shape
        return jnp.transpose(w, (2, 1, 0)).reshape(3 * ci, co).astype(bf16)

    def group_mat(groups, c):                       # tiny one-hot (C, G)
        m = np.zeros((c, groups), np.float32)
        m[np.arange(c), np.arange(c) // (c // groups)] = 1.0
        return m

    conv_args = []
    for i, g in ((1, 8), (2, 16), (3, 32)):
        c = params[f"conv{i}_w"].shape[0]
        mg = group_mat(g, c)
        conv_args += [pack_conv(params[f"conv{i}_w"]),
                      params[f"conv{i}_b"][None, :],
                      params[f"gn{i}_g"][None, :],
                      params[f"gn{i}_b"][None, :],
                      jnp.asarray(mg), jnp.asarray(mg.T.copy())]

    co3 = 128
    fc1 = params["fc1_w"]                            # (640, 256), torch row order
    w1_feat = (fc1[:4 * co3].reshape(co3, 4, -1).transpose(1, 0, 2)
               .reshape(4 * co3, -1))                # row t*128+c  (pool-slot major)
    wf1 = jnp.concatenate([w1_feat, fc1[4 * co3:]], axis=0).astype(bf16)
    bf1 = params["fc1_b"][None, :]
    wf2 = params["fc2_w"].astype(bf16)               # (256, 1)
    bf2 = params["fc2_b"][None, :]

    args = (xph, cond, wc1, bc1, wc2, bc2, *conv_args, wf1, bf1, wf2, bf2)

    def const_spec(a):
        nd = a.ndim
        return pl.BlockSpec(a.shape, lambda i, _n=nd: (0,) * _n)

    in_specs = ([pl.BlockSpec((4, BT, L4, Cin), lambda i: (0, i, 0, 0)),
                 pl.BlockSpec((BT, 1, 2 * EMB), lambda i: (i, 0, 0))]
                + [const_spec(a) for a in args[2:]])

    out = pl.pallas_call(
        _cond_disc_kernel,
        out_shape=jax.ShapeDtypeStruct((B, 1, 1), jnp.float32),
        grid=(B // BT,),
        in_specs=in_specs,
        out_specs=pl.BlockSpec((BT, 1, 1), lambda i: (i, 0, 0)),
        compiler_params=pltpu.CompilerParams(
            dimension_semantics=("parallel",),
            vmem_limit_bytes=48 * 1024 * 1024),
    )(*args)
    return out.reshape(B, 1)


if __name__ == "__main__":
    key = jax.random.PRNGKey(0)
    k_param, k_img, k_mod, k_sig = jax.random.split(key, 4)

    B, C, L = 4, 2, 64   # small shapes; Conv1d(num_channels=2, ...), L % 32 == 0
    params = init_params(k_param, num_channels=C)
    img = jax.random.normal(k_img, (B, C, L), dtype=jnp.float32)
    mod_type = jax.random.randint(k_mod, (B,), 0, 6)
    sig_type = jax.random.randint(k_sig, (B,), 0, 8)

    validity = conditional_discriminator(img, mod_type, sig_type, params)
    validity = jax.block_until_ready(validity)

    assert validity.shape == (B, 1)
    assert bool(jnp.all(jnp.isfinite(validity)))
    assert bool(jnp.all((validity > 0.0) & (validity < 1.0)))  # sigmoid output
    print("KERNEL_OK")
</pallas_src>

<mosaic_0001>
module attributes {stable_mosaic.version = 11 : i64} {
  func.func @_cond_disc_kernel(%arg0: i32, %arg1: memref<4x2x16x2xbf16, #tpu.memory_space<vmem>>, %arg2: memref<2x1x128xbf16, #tpu.memory_space<vmem>>, %arg3: memref<128x128xbf16, #tpu.memory_space<vmem>>, %arg4: memref<1x128xf32, #tpu.memory_space<vmem>>, %arg5: memref<128x128xbf16, #tpu.memory_space<vmem>>, %arg6: memref<1x128xf32, #tpu.memory_space<vmem>>, %arg7: memref<6x32xbf16, #tpu.memory_space<vmem>>, %arg8: memref<1x32xf32, #tpu.memory_space<vmem>>, %arg9: memref<1x32xf32, #tpu.memory_space<vmem>>, %arg10: memref<1x32xf32, #tpu.memory_space<vmem>>, %arg11: memref<32x8xf32, #tpu.memory_space<vmem>>, %arg12: memref<8x32xf32, #tpu.memory_space<vmem>>, %arg13: memref<96x64xbf16, #tpu.memory_space<vmem>>, %arg14: memref<1x64xf32, #tpu.memory_space<vmem>>, %arg15: memref<1x64xf32, #tpu.memory_space<vmem>>, %arg16: memref<1x64xf32, #tpu.memory_space<vmem>>, %arg17: memref<64x16xf32, #tpu.memory_space<vmem>>, %arg18: memref<16x64xf32, #tpu.memory_space<vmem>>, %arg19: memref<192x128xbf16, #tpu.memory_space<vmem>>, %arg20: memref<1x128xf32, #tpu.memory_space<vmem>>, %arg21: memref<1x128xf32, #tpu.memory_space<vmem>>, %arg22: memref<1x128xf32, #tpu.memory_space<vmem>>, %arg23: memref<128x32xf32, #tpu.memory_space<vmem>>, %arg24: memref<32x128xf32, #tpu.memory_space<vmem>>, %arg25: memref<640x256xbf16, #tpu.memory_space<vmem>>, %arg26: memref<1x256xf32, #tpu.memory_space<vmem>>, %arg27: memref<256x1xbf16, #tpu.memory_space<vmem>>, %arg28: memref<1x1xf32, #tpu.memory_space<vmem>>, %arg29: memref<2x1x1xf32, #tpu.memory_space<vmem>>) attributes {dimension_semantics = [#tpu.dimension_semantics<parallel>], iteration_bounds = array<i64: 2>, scalar_prefetch = 0 : i64, scratch_operands = 0 : i64, tpu.core_type = #tpu.core_type<tc>, window_params = [{transform_indices = @transform_0, window_bounds = array<i64: 4, 2, 16, 2>}, {transform_indices = @transform_1, window_bounds = array<i64: 2, 1, 128>}, {pipeline_mode = #tpu.pipeline_mode<synchronous>, transform_indices = @transform_2, window_bounds = array<i64: 128, 128>}, {pipeline_mode = #tpu.pipeline_mode<synchronous>, transform_indices = @transform_3, window_bounds = array<i64: 1, 128>}, {pipeline_mode = #tpu.pipeline_mode<synchronous>, transform_indices = @transform_4, window_bounds = array<i64: 128, 128>}, {pipeline_mode = #tpu.pipeline_mode<synchronous>, transform_indices = @transform_5, window_bounds = array<i64: 1, 128>}, {pipeline_mode = #tpu.pipeline_mode<synchronous>, transform_indices = @transform_6, window_bounds = array<i64: 6, 32>}, {pipeline_mode = #tpu.pipeline_mode<synchronous>, transform_indices = @transform_7, window_bounds = array<i64: 1, 32>}, {pipeline_mode = #tpu.pipeline_mode<synchronous>, transform_indices = @transform_8, window_bounds = array<i64: 1, 32>}, {pipeline_mode = #tpu.pipeline_mode<synchronous>, transform_indices = @transform_9, window_bounds = array<i64: 1, 32>}, {pipeline_mode = #tpu.pipeline_mode<synchronous>, transform_indices = @transform_10, window_bounds = array<i64: 32, 8>}, {pipeline_mode = #tpu.pipeline_mode<synchronous>, transform_indices = @transform_11, window_bounds = array<i64: 8, 32>}, {pipeline_mode = #tpu.pipeline_mode<synchronous>, transform_indices = @transform_12, window_bounds = array<i64: 96, 64>}, {pipeline_mode = #tpu.pipeline_mode<synchronous>, transform_indices = @transform_13, window_bounds = array<i64: 1, 64>}, {pipeline_mode = #tpu.pipeline_mode<synchronous>, transform_indices = @transform_14, window_bounds = array<i64: 1, 64>}, {pipeline_mode = #tpu.pipeline_mode<synchronous>, transform_indices = @transform_15, window_bounds = array<i64: 1, 64>}, {pipeline_mode = #tpu.pipeline_mode<synchronous>, transform_indices = @transform_16, window_bounds = array<i64: 64, 16>}, {pipeline_mode = #tpu.pipeline_mode<synchronous>, transform_indices = @transform_17, window_bounds = array<i64: 16, 64>}, {pipeline_mode = #tpu.pipeline_mode<synchronous>, transform_indices = @transform_18, window_bounds = array<i64: 192, 128>}, {pipeline_mode = #tpu.pipeline_mode<synchronous>, transform_indices = @transform_19, window_bounds = array<i64: 1, 128>}, {pipeline_mode = #tpu.pipeline_mode<synchronous>, transform_indices = @transform_20, window_bounds = array<i64: 1, 128>}, {pipeline_mode = #tpu.pipeline_mode<synchronous>, transform_indices = @transform_21, window_bounds = array<i64: 1, 128>}, {pipeline_mode = #tpu.pipeline_mode<synchronous>, transform_indices = @transform_22, window_bounds = array<i64: 128, 32>}, {pipeline_mode = #tpu.pipeline_mode<synchronous>, transform_indices = @transform_23, window_bounds = array<i64: 32, 128>}, {pipeline_mode = #tpu.pipeline_mode<synchronous>, transform_indices = @transform_24, window_bounds = array<i64: 640, 256>}, {pipeline_mode = #tpu.pipeline_mode<synchronous>, transform_indices = @transform_25, window_bounds = array<i64: 1, 256>}, {pipeline_mode = #tpu.pipeline_mode<synchronous>, transform_indices = @transform_26, window_bounds = array<i64: 256, 1>}, {pipeline_mode = #tpu.pipeline_mode<synchronous>, transform_indices = @transform_27, window_bounds = array<i64: 1, 1>}, {transform_indices = @transform_28, window_bounds = array<i64: 2, 1, 1>}]} {
    %c0 = arith.constant 0 : index
    %c0_0 = arith.constant 0 : index
    %c0_1 = arith.constant 0 : index
    %0 = vector.load %arg2[%c0, %c0_0, %c0_1] : memref<2x1x128xbf16, #tpu.memory_space<vmem>>, vector<2x1x128xbf16>
    %1 = vector.shape_cast %0 : vector<2x1x128xbf16> to vector<2x128xbf16>
    %c0_2 = arith.constant 0 : index
    %c0_3 = arith.constant 0 : index
    %2 = vector.load %arg3[%c0_2, %c0_3] : memref<128x128xbf16, #tpu.memory_space<vmem>>, vector<128x128xbf16>
    %cst = arith.constant dense<0.000000e+00> : vector<2x128xf32>
    %3 = tpu.matmul %1, %2, %cst {dimension_numbers = #tpu.dot_dimension_numbers<[1], [0], [0], [1], [0, 0, 1, 1], [], []>} : vector<2x128xbf16>, vector<128x128xbf16>, vector<2x128xf32> -> vector<2x128xf32>
    %c0_4 = arith.constant 0 : index
    %c0_5 = arith.constant 0 : index
    %4 = vector.load %arg4[%c0_4, %c0_5] : memref<1x128xf32, #tpu.memory_space<vmem>>, vector<1x128xf32>
    %5 = vector.broadcast %4 : vector<1x128xf32> to vector<2x128xf32>
    %6 = arith.addf %3, %5 : vector<2x128xf32>
    %cst_6 = arith.constant 0.000000e+00 : f32
    %7 = vector.broadcast %cst_6 : f32 to vector<2x128xf32>
    %8 = arith.cmpf ogt, %6, %7 : vector<2x128xf32>
    %cst_7 = arith.constant 2.000000e-01 : f32
    %9 = vector.broadcast %cst_7 : f32 to vector<2x128xf32>
    %10 = arith.mulf %9, %6 : vector<2x128xf32>
    %11 = arith.select %8, %6, %10 : vector<2x128xi1>, vector<2x128xf32>
    %12 = arith.truncf %11 : vector<2x128xf32> to vector<2x128xbf16>
    %c0_8 = arith.constant 0 : index
    %c0_9 = arith.constant 0 : index
    %13 = vector.load %arg5[%c0_8, %c0_9] : memref<128x128xbf16, #tpu.memory_space<vmem>>, vector<128x128xbf16>
    %cst_10 = arith.constant dense<0.000000e+00> : vector<2x128xf32>
    %14 = tpu.matmul %12, %13, %cst_10 {dimension_numbers = #tpu.dot_dimension_numbers<[1], [0], [0], [1], [0, 0, 1, 1], [], []>} : vector<2x128xbf16>, vector<128x128xbf16>, vector<2x128xf32> -> vector<2x128xf32>
    %c0_11 = arith.constant 0 : index
    %c0_12 = arith.constant 0 : index
    %15 = vector.load %arg6[%c0_11, %c0_12] : memref<1x128xf32, #tpu.memory_space<vmem>>, vector<1x128xf32>
    %16 = vector.broadcast %15 : vector<1x128xf32> to vector<2x128xf32>
    %17 = arith.addf %14, %16 : vector<2x128xf32>
    %cst_13 = arith.constant 0.000000e+00 : f32
    %18 = vector.broadcast %cst_13 : f32 to vector<2x128xf32>
    %19 = arith.cmpf ogt, %17, %18 : vector<2x128xf32>
    %cst_14 = arith.constant 2.000000e-01 : f32
    %20 = vector.broadcast %cst_14 : f32 to vector<2x128xf32>
    %21 = arith.mulf %20, %17 : vector<2x128xf32>
    %22 = arith.select %19, %17, %21 : vector<2x128xi1>, vector<2x128xf32>
    %c0_15 = arith.constant 0 : index
    %c0_16 = arith.constant 0 : index
    %c0_17 = arith.constant 0 : index
    %c0_18 = arith.constant 0 : index
    %23 = vector.load %arg1[%c0_15, %c0_16, %c0_17, %c0_18] : memref<4x2x16x2xbf16, #tpu.memory_space<vmem>>, vector<1x2x16x2xbf16>
    %24 = vector.shape_cast %23 : vector<1x2x16x2xbf16> to vector<2x16x2xbf16>
    %c1 = arith.constant 1 : index
    %c0_19 = arith.constant 0 : index
    %c0_20 = arith.constant 0 : index
    %c0_21 = arith.constant 0 : index
    %25 = vector.load %arg1[%c1, %c0_19, %c0_20, %c0_21] : memref<4x2x16x2xbf16, #tpu.memory_space<vmem>>, vector<1x2x16x2xbf16>
    %26 = vector.shape_cast %25 : vector<1x2x16x2xbf16> to vector<2x16x2xbf16>
    %c2 = arith.constant 2 : index
    %c0_22 = arith.constant 0 : index
    %c0_23 = arith.constant 0 : index
    %c0_24 = arith.constant 0 : index
    %27 = vector.load %arg1[%c2, %c0_22, %c0_23, %c0_24] : memref<4x2x16x2xbf16, #tpu.memory_space<vmem>>, vector<1x2x16x2xbf16>
    %28 = vector.shape_cast %27 : vector<1x2x16x2xbf16> to vector<2x16x2xbf16>
    %c3 = arith.constant 3 : index
    %c0_25 = arith.constant 0 : index
    %c0_26 = arith.constant 0 : index
    %c0_27 = arith.constant 0 : index
    %29 = vector.load %arg1[%c3, %c0_25, %c0_26, %c0_27] : memref<4x2x16x2xbf16, #tpu.memory_space<vmem>>, vector<1x2x16x2xbf16>
    %30 = vector.shape_cast %29 : vector<1x2x16x2xbf16> to vector<2x16x2xbf16>
    %cst_28 = arith.constant 0.000000e+00 : bf16
    %31 = vector.broadcast %cst_28 : bf16 to vector<2x1x2xbf16>
    %32 = vector.extract_strided_slice %30 {offsets = [0, 0, 0], sizes = [2, 15, 2], strides = [1, 1, 1]} : vector<2x16x2xbf16> to vector<2x15x2xbf16>
    %33 = tpu.concatenate %31, %32 in 1 : vector<2x1x2xbf16>, vector<2x15x2xbf16> -> vector<2x16x2xbf16>
    %34 = tpu.concatenate %33, %24, %26 in 2 : vector<2x16x2xbf16>, vector<2x16x2xbf16>, vector<2x16x2xbf16> -> vector<2x16x6xbf16>
    %35 = tpu.concatenate %24, %26, %28 in 2 : vector<2x16x2xbf16>, vector<2x16x2xbf16>, vector<2x16x2xbf16> -> vector<2x16x6xbf16>
    %36 = tpu.concatenate %26, %28, %30 in 2 : vector<2x16x2xbf16>, vector<2x16x2xbf16>, vector<2x16x2xbf16> -> vector<2x16x6xbf16>
    %cst_29 = arith.constant 0.000000e+00 : bf16
    %37 = vector.broadcast %cst_29 : bf16 to vector<2x1x2xbf16>
    %38 = vector.extract_strided_slice %24 {offsets = [0, 1, 0], sizes = [2, 15, 2], strides = [1, 1, 1]} : vector<2x16x2xbf16> to vector<2x15x2xbf16>
    %39 = tpu.concatenate %38, %37 in 1 : vector<2x15x2xbf16>, vector<2x1x2xbf16> -> vector<2x16x2xbf16>
    %40 = tpu.concatenate %28, %30, %39 in 2 : vector<2x16x2xbf16>, vector<2x16x2xbf16>, vector<2x16x2xbf16> -> vector<2x16x6xbf16>
    %41 = tpu.concatenate %34, %35, %36, %40 in 1 : vector<2x16x6xbf16>, vector<2x16x6xbf16>, vector<2x16x6xbf16>, vector<2x16x6xbf16> -> vector<2x64x6xbf16>
    %42 = vector.shape_cast %41 : vector<2x64x6xbf16> to vector<128x6xbf16>
    %c0_30 = arith.constant 0 : index
    %c0_31 = arith.constant 0 : index
    %43 = vector.load %arg7[%c0_30, %c0_31] : memref<6x32xbf16, #tpu.memory_space<vmem>>, vector<6x32xbf16>
    %cst_32 = arith.constant dense<0.000000e+00> : vector<128x32xf32>
    %44 = tpu.matmul %42, %43, %cst_32 {dimension_numbers = #tpu.dot_dimension_numbers<[1], [0], [0], [1], [0, 0, 1, 1], [], []>} : vector<128x6xbf16>, vector<6x32xbf16>, vector<128x32xf32> -> vector<128x32xf32>
    %c0_33 = arith.constant 0 : index
    %c0_34 = arith.constant 0 : index
    %45 = vector.load %arg8[%c0_33, %c0_34] : memref<1x32xf32, #tpu.memory_space<vmem>>, vector<1x32xf32>
    %46 = vector.broadcast %45 : vector<1x32xf32> to vector<128x32xf32>
    %47 = arith.addf %44, %46 : vector<128x32xf32>
    %48 = vector.shape_cast %47 : vector<128x32xf32> to vector<2x64x32xf32>
    %cst_35 = arith.constant dense<0.000000e+00> : vector<2x32xf32>
    %49 = vector.multi_reduction <add>, %48, %cst_35 [1] : vector<2x64x32xf32> to vector<2x32xf32>
    %50 = arith.mulf %48, %48 : vector<2x64x32xf32>
    %cst_36 = arith.constant dense<0.000000e+00> : vector<2x32xf32>
    %51 = vector.multi_reduction <add>, %50, %cst_36 [1] : vector<2x64x32xf32> to vector<2x32xf32>
    %c0_37 = arith.constant 0 : index
    %c0_38 = arith.constant 0 : index
    %52 = vector.load %arg11[%c0_37, %c0_38] : memref<32x8xf32, #tpu.memory_space<vmem>>, vector<32x8xf32>
    %cst_39 = arith.constant dense<0.000000e+00> : vector<2x8xf32>
    %53 = tpu.matmul %49, %52, %cst_39 {dimension_numbers = #tpu.dot_dimension_numbers<[1], [0], [0], [1], [0, 0, 1, 1], [], []>} : vector<2x32xf32>, vector<32x8xf32>, vector<2x8xf32> -> vector<2x8xf32>
    %c0_40 = arith.constant 0 : index
    %c0_41 = arith.constant 0 : index
    %54 = vector.load %arg11[%c0_40, %c0_41] : memref<32x8xf32, #tpu.memory_space<vmem>>, vector<32x8xf32>
    %cst_42 = arith.constant dense<0.000000e+00> : vector<2x8xf32>
    %55 = tpu.matmul %51, %54, %cst_42 {dimension_numbers = #tpu.dot_dimension_numbers<[1], [0], [0], [1], [0, 0, 1, 1], [], []>} : vector<2x32xf32>, vector<32x8xf32>, vector<2x8xf32> -> vector<2x8xf32>
    %cst_43 = arith.constant 3.906250e-03 : f32
    %56 = vector.broadcast %cst_43 : f32 to vector<2x8xf32>
    %57 = arith.mulf %53, %56 : vector<2x8xf32>
    %cst_44 = arith.constant 3.906250e-03 : f32
    %58 = vector.broadcast %cst_44 : f32 to vector<2x8xf32>
    %59 = arith.mulf %55, %58 : vector<2x8xf32>
    %60 = arith.mulf %57, %57 : vector<2x8xf32>
    %61 = arith.subf %59, %60 : vector<2x8xf32>
    %cst_45 = arith.constant 9.99999974E-6 : f32
    %62 = vector.broadcast %cst_45 : f32 to vector<2x8xf32>
    %63 = arith.addf %61, %62 : vector<2x8xf32>
    %64 = math.rsqrt %63 : vector<2x8xf32>
    %c0_46 = arith.constant 0 : index
    %c0_47 = arith.constant 0 : index
    %65 = vector.load %arg12[%c0_46, %c0_47] : memref<8x32xf32, #tpu.memory_space<vmem>>, vector<8x32xf32>
    %cst_48 = arith.constant dense<0.000000e+00> : vector<2x32xf32>
    %66 = tpu.matmul %57, %65, %cst_48 {dimension_numbers = #tpu.dot_dimension_numbers<[1], [0], [0], [1], [0, 0, 1, 1], [], []>} : vector<2x8xf32>, vector<8x32xf32>, vector<2x32xf32> -> vector<2x32xf32>
    %c0_49 = arith.constant 0 : index
    %c0_50 = arith.constant 0 : index
    %67 = vector.load %arg12[%c0_49, %c0_50] : memref<8x32xf32, #tpu.memory_space<vmem>>, vector<8x32xf32>
    %cst_51 = arith.constant dense<0.000000e+00> : vector<2x32xf32>
    %68 = tpu.matmul %64, %67, %cst_51 {dimension_numbers = #tpu.dot_dimension_numbers<[1], [0], [0], [1], [0, 0, 1, 1], [], []>} : vector<2x8xf32>, vector<8x32xf32>, vector<2x32xf32> -> vector<2x32xf32>
    %c0_52 = arith.constant 0 : index
    %c0_53 = arith.constant 0 : index
    %69 = vector.load %arg9[%c0_52, %c0_53] : memref<1x32xf32, #tpu.memory_space<vmem>>, vector<1x32xf32>
    %70 = vector.broadcast %69 : vector<1x32xf32> to vector<2x32xf32>
    %71 = arith.mulf %68, %70 : vector<2x32xf32>
    %c0_54 = arith.constant 0 : index
    %c0_55 = arith.constant 0 : index
    %72 = vector.load %arg10[%c0_54, %c0_55] : memref<1x32xf32, #tpu.memory_space<vmem>>, vector<1x32xf32>
    %73 = arith.mulf %66, %71 : vector<2x32xf32>
    %74 = vector.broadcast %72 : vector<1x32xf32> to vector<2x32xf32>
    %75 = arith.subf %74, %73 : vector<2x32xf32>
    %76 = vector.shape_cast %71 : vector<2x32xf32> to vector<2x1x32xf32>
    %77 = vector.broadcast %76 : vector<2x1x32xf32> to vector<2x64x32xf32>
    %78 = arith.mulf %48, %77 : vector<2x64x32xf32>
    %79 = vector.shape_cast %75 : vector<2x32xf32> to vector<2x1x32xf32>
    %80 = vector.broadcast %79 : vector<2x1x32xf32> to vector<2x64x32xf32>
    %81 = arith.addf %78, %80 : vector<2x64x32xf32>
    %cst_56 = arith.constant 0.000000e+00 : f32
    %82 = vector.broadcast %cst_56 : f32 to vector<2x64x32xf32>
    %83 = arith.cmpf ogt, %81, %82 : vector<2x64x32xf32>
    %cst_57 = arith.constant 2.000000e-01 : f32
    %84 = vector.broadcast %cst_57 : f32 to vector<2x64x32xf32>
    %85 = arith.mulf %84, %81 : vector<2x64x32xf32>
    %86 = arith.select %83, %81, %85 : vector<2x64x32xi1>, vector<2x64x32xf32>
    %87 = arith.truncf %86 : vector<2x64x32xf32> to vector<2x64x32xbf16>
    %88 = vector.extract_strided_slice %87 {offsets = [0, 0, 0], sizes = [2, 16, 32], strides = [1, 1, 1]} : vector<2x64x32xbf16> to vector<2x16x32xbf16>
    %89 = vector.extract_strided_slice %87 {offsets = [0, 16, 0], sizes = [2, 16, 32], strides = [1, 1, 1]} : vector<2x64x32xbf16> to vector<2x16x32xbf16>
    %90 = vector.extract_strided_slice %87 {offsets = [0, 32, 0], sizes = [2, 16, 32], strides = [1, 1, 1]} : vector<2x64x32xbf16> to vector<2x16x32xbf16>
    %91 = vector.extract_strided_slice %87 {offsets = [0, 48, 0], sizes = [2, 16, 32], strides = [1, 1, 1]} : vector<2x64x32xbf16> to vector<2x16x32xbf16>
    %cst_58 = arith.constant 0.000000e+00 : bf16
    %92 = vector.broadcast %cst_58 : bf16 to vector<2x1x32xbf16>
    %93 = vector.extract_strided_slice %91 {offsets = [0, 0, 0], sizes = [2, 15, 32], strides = [1, 1, 1]} : vector<2x16x32xbf16> to vector<2x15x32xbf16>
    %94 = tpu.concatenate %92, %93 in 1 : vector<2x1x32xbf16>, vector<2x15x32xbf16> -> vector<2x16x32xbf16>
    %95 = tpu.concatenate %94, %88, %89 in 2 : vector<2x16x32xbf16>, vector<2x16x32xbf16>, vector<2x16x32xbf16> -> vector<2x16x96xbf16>
    %96 = tpu.concatenate %89, %90, %91 in 2 : vector<2x16x32xbf16>, vector<2x16x32xbf16>, vector<2x16x32xbf16> -> vector<2x16x96xbf16>
    %97 = tpu.concatenate %95, %96 in 1 : vector<2x16x96xbf16>, vector<2x16x96xbf16> -> vector<2x32x96xbf16>
    %98 = vector.shape_cast %97 : vector<2x32x96xbf16> to vector<64x96xbf16>
    %c0_59 = arith.constant 0 : index
    %c0_60 = arith.constant 0 : index
    %99 = vector.load %arg13[%c0_59, %c0_60] : memref<96x64xbf16, #tpu.memory_space<vmem>>, vector<96x64xbf16>
    %cst_61 = arith.constant dense<0.000000e+00> : vector<64x64xf32>
    %100 = tpu.matmul %98, %99, %cst_61 {dimension_numbers = #tpu.dot_dimension_numbers<[1], [0], [0], [1], [0, 0, 1, 1], [], []>} : vector<64x96xbf16>, vector<96x64xbf16>, vector<64x64xf32> -> vector<64x64xf32>
    %c0_62 = arith.constant 0 : index
    %c0_63 = arith.constant 0 : index
    %101 = vector.load %arg14[%c0_62, %c0_63] : memref<1x64xf32, #tpu.memory_space<vmem>>, vector<1x64xf32>
    %102 = vector.broadcast %101 : vector<1x64xf32> to vector<64x64xf32>
    %103 = arith.addf %100, %102 : vector<64x64xf32>
    %104 = vector.shape_cast %103 : vector<64x64xf32> to vector<2x32x64xf32>
    %cst_64 = arith.constant dense<0.000000e+00> : vector<2x64xf32>
    %105 = vector.multi_reduction <add>, %104, %cst_64 [1] : vector<2x32x64xf32> to vector<2x64xf32>
    %106 = arith.mulf %104, %104 : vector<2x32x64xf32>
    %cst_65 = arith.constant dense<0.000000e+00> : vector<2x64xf32>
    %107 = vector.multi_reduction <add>, %106, %cst_65 [1] : vector<2x32x64xf32> to vector<2x64xf32>
    %c0_66 = arith.constant 0 : index
    %c0_67 = arith.constant 0 : index
    %108 = vector.load %arg17[%c0_66, %c0_67] : memref<64x16xf32, #tpu.memory_space<vmem>>, vector<64x16xf32>
    %cst_68 = arith.constant dense<0.000000e+00> : vector<2x16xf32>
    %109 = tpu.matmul %105, %108, %cst_68 {dimension_numbers = #tpu.dot_dimension_numbers<[1], [0], [0], [1], [0, 0, 1, 1], [], []>} : vector<2x64xf32>, vector<64x16xf32>, vector<2x16xf32> -> vector<2x16xf32>
    %c0_69 = arith.constant 0 : index
    %c0_70 = arith.constant 0 : index
    %110 = vector.load %arg17[%c0_69, %c0_70] : memref<64x16xf32, #tpu.memory_space<vmem>>, vector<64x16xf32>
    %cst_71 = arith.constant dense<0.000000e+00> : vector<2x16xf32>
    %111 = tpu.matmul %107, %110, %cst_71 {dimension_numbers = #tpu.dot_dimension_numbers<[1], [0], [0], [1], [0, 0, 1, 1], [], []>} : vector<2x64xf32>, vector<64x16xf32>, vector<2x16xf32> -> vector<2x16xf32>
    %cst_72 = arith.constant 7.812500e-03 : f32
    %112 = vector.broadcast %cst_72 : f32 to vector<2x16xf32>
    %113 = arith.mulf %109, %112 : vector<2x16xf32>
    %cst_73 = arith.constant 7.812500e-03 : f32
    %114 = vector.broadcast %cst_73 : f32 to vector<2x16xf32>
    %115 = arith.mulf %111, %114 : vector<2x16xf32>
    %116 = arith.mulf %113, %113 : vector<2x16xf32>
    %117 = arith.subf %115, %116 : vector<2x16xf32>
    %cst_74 = arith.constant 9.99999974E-6 : f32
    %118 = vector.broadcast %cst_74 : f32 to vector<2x16xf32>
    %119 = arith.addf %117, %118 : vector<2x16xf32>
    %120 = math.rsqrt %119 : vector<2x16xf32>
    %c0_75 = arith.constant 0 : index
    %c0_76 = arith.constant 0 : index
    %121 = vector.load %arg18[%c0_75, %c0_76] : memref<16x64xf32, #tpu.memory_space<vmem>>, vector<16x64xf32>
    %cst_77 = arith.constant dense<0.000000e+00> : vector<2x64xf32>
    %122 = tpu.matmul %113, %121, %cst_77 {dimension_numbers = #tpu.dot_dimension_numbers<[1], [0], [0], [1], [0, 0, 1, 1], [], []>} : vector<2x16xf32>, vector<16x64xf32>, vector<2x64xf32> -> vector<2x64xf32>
    %c0_78 = arith.constant 0 : index
    %c0_79 = arith.constant 0 : index
    %123 = vector.load %arg18[%c0_78, %c0_79] : memref<16x64xf32, #tpu.memory_space<vmem>>, vector<16x64xf32>
    %cst_80 = arith.constant dense<0.000000e+00> : vector<2x64xf32>
    %124 = tpu.matmul %120, %123, %cst_80 {dimension_numbers = #tpu.dot_dimension_numbers<[1], [0], [0], [1], [0, 0, 1, 1], [], []>} : vector<2x16xf32>, vector<16x64xf32>, vector<2x64xf32> -> vector<2x64xf32>
    %c0_81 = arith.constant 0 : index
    %c0_82 = arith.constant 0 : index
    %125 = vector.load %arg15[%c0_81, %c0_82] : memref<1x64xf32, #tpu.memory_space<vmem>>, vector<1x64xf32>
    %126 = vector.broadcast %125 : vector<1x64xf32> to vector<2x64xf32>
    %127 = arith.mulf %124, %126 : vector<2x64xf32>
    %c0_83 = arith.constant 0 : index
    %c0_84 = arith.constant 0 : index
    %128 = vector.load %arg16[%c0_83, %c0_84] : memref<1x64xf32, #tpu.memory_space<vmem>>, vector<1x64xf32>
    %129 = arith.mulf %122, %127 : vector<2x64xf32>
    %130 = vector.broadcast %128 : vector<1x64xf32> to vector<2x64xf32>
    %131 = arith.subf %130, %129 : vector<2x64xf32>
    %132 = vector.shape_cast %127 : vector<2x64xf32> to vector<2x1x64xf32>
    %133 = vector.broadcast %132 : vector<2x1x64xf32> to vector<2x32x64xf32>
    %134 = arith.mulf %104, %133 : vector<2x32x64xf32>
    %135 = vector.shape_cast %131 : vector<2x64xf32> to vector<2x1x64xf32>
    %136 = vector.broadcast %135 : vector<2x1x64xf32> to vector<2x32x64xf32>
    %137 = arith.addf %134, %136 : vector<2x32x64xf32>
    %cst_85 = arith.constant 0.000000e+00 : f32
    %138 = vector.broadcast %cst_85 : f32 to vector<2x32x64xf32>
    %139 = arith.cmpf ogt, %137, %138 : vector<2x32x64xf32>
    %cst_86 = arith.constant 2.000000e-01 : f32
    %140 = vector.broadcast %cst_86 : f32 to vector<2x32x64xf32>
    %141 = arith.mulf %140, %137 : vector<2x32x64xf32>
    %142 = arith.select %139, %137, %141 : vector<2x32x64xi1>, vector<2x32x64xf32>
    %143 = arith.truncf %142 : vector<2x32x64xf32> to vector<2x32x64xbf16>
    %144 = vector.extract_strided_slice %143 {offsets = [0, 0, 0], sizes = [2, 16, 64], strides = [1, 1, 1]} : vector<2x32x64xbf16> to vector<2x16x64xbf16>
    %145 = vector.extract_strided_slice %143 {offsets = [0, 16, 0], sizes = [2, 16, 64], strides = [1, 1, 1]} : vector<2x32x64xbf16> to vector<2x16x64xbf16>
    %cst_87 = arith.constant 0.000000e+00 : bf16
    %146 = vector.broadcast %cst_87 : bf16 to vector<2x1x64xbf16>
    %147 = vector.extract_strided_slice %145 {offsets = [0, 0, 0], sizes = [2, 15, 64], strides = [1, 1, 1]} : vector<2x16x64xbf16> to vector<2x15x64xbf16>
    %148 = tpu.concatenate %146, %147 in 1 : vector<2x1x64xbf16>, vector<2x15x64xbf16> -> vector<2x16x64xbf16>
    %149 = tpu.concatenate %148, %144, %145 in 2 : vector<2x16x64xbf16>, vector<2x16x64xbf16>, vector<2x16x64xbf16> -> vector<2x16x192xbf16>
    %150 = vector.shape_cast %149 : vector<2x16x192xbf16> to vector<32x192xbf16>
    %c0_88 = arith.constant 0 : index
    %c0_89 = arith.constant 0 : index
    %151 = vector.load %arg19[%c0_88, %c0_89] : memref<192x128xbf16, #tpu.memory_space<vmem>>, vector<192x128xbf16>
    %cst_90 = arith.constant dense<0.000000e+00> : vector<32x128xf32>
    %152 = tpu.matmul %150, %151, %cst_90 {dimension_numbers = #tpu.dot_dimension_numbers<[1], [0], [0], [1], [0, 0, 1, 1], [], []>} : vector<32x192xbf16>, vector<192x128xbf16>, vector<32x128xf32> -> vector<32x128xf32>
    %c0_91 = arith.constant 0 : index
    %c0_92 = arith.constant 0 : index
    %153 = vector.load %arg20[%c0_91, %c0_92] : memref<1x128xf32, #tpu.memory_space<vmem>>, vector<1x128xf32>
    %154 = vector.broadcast %153 : vector<1x128xf32> to vector<32x128xf32>
    %155 = arith.addf %152, %154 : vector<32x128xf32>
    %156 = vector.shape_cast %155 : vector<32x128xf32> to vector<2x16x128xf32>
    %cst_93 = arith.constant dense<0.000000e+00> : vector<2x128xf32>
    %157 = vector.multi_reduction <add>, %156, %cst_93 [1] : vector<2x16x128xf32> to vector<2x128xf32>
    %158 = arith.mulf %156, %156 : vector<2x16x128xf32>
    %cst_94 = arith.constant dense<0.000000e+00> : vector<2x128xf32>
    %159 = vector.multi_reduction <add>, %158, %cst_94 [1] : vector<2x16x128xf32> to vector<2x128xf32>
    %c0_95 = arith.constant 0 : index
    %c0_96 = arith.constant 0 : index
    %160 = vector.load %arg23[%c0_95, %c0_96] : memref<128x32xf32, #tpu.memory_space<vmem>>, vector<128x32xf32>
    %cst_97 = arith.constant dense<0.000000e+00> : vector<2x32xf32>
    %161 = tpu.matmul %157, %160, %cst_97 {dimension_numbers = #tpu.dot_dimension_numbers<[1], [0], [0], [1], [0, 0, 1, 1], [], []>} : vector<2x128xf32>, vector<128x32xf32>, vector<2x32xf32> -> vector<2x32xf32>
    %c0_98 = arith.constant 0 : index
    %c0_99 = arith.constant 0 : index
    %162 = vector.load %arg23[%c0_98, %c0_99] : memref<128x32xf32, #tpu.memory_space<vmem>>, vector<128x32xf32>
    %cst_100 = arith.constant dense<0.000000e+00> : vector<2x32xf32>
    %163 = tpu.matmul %159, %162, %cst_100 {dimension_numbers = #tpu.dot_dimension_numbers<[1], [0], [0], [1], [0, 0, 1, 1], [], []>} : vector<2x128xf32>, vector<128x32xf32>, vector<2x32xf32> -> vector<2x32xf32>
    %cst_101 = arith.constant 1.562500e-02 : f32
    %164 = vector.broadcast %cst_101 : f32 to vector<2x32xf32>
    %165 = arith.mulf %161, %164 : vector<2x32xf32>
    %cst_102 = arith.constant 1.562500e-02 : f32
    %166 = vector.broadcast %cst_102 : f32 to vector<2x32xf32>
    %167 = arith.mulf %163, %166 : vector<2x32xf32>
    %168 = arith.mulf %165, %165 : vector<2x32xf32>
    %169 = arith.subf %167, %168 : vector<2x32xf32>
    %cst_103 = arith.constant 9.99999974E-6 : f32
    %170 = vector.broadcast %cst_103 : f32 to vector<2x32xf32>
    %171 = arith.addf %169, %170 : vector<2x32xf32>
    %172 = math.rsqrt %171 : vector<2x32xf32>
    %c0_104 = arith.constant 0 : index
    %c0_105 = arith.constant 0 : index
    %173 = vector.load %arg24[%c0_104, %c0_105] : memref<32x128xf32, #tpu.memory_space<vmem>>, vector<32x128xf32>
    %cst_106 = arith.constant dense<0.000000e+00> : vector<2x128xf32>
    %174 = tpu.matmul %165, %173, %cst_106 {dimension_numbers = #tpu.dot_dimension_numbers<[1], [0], [0], [1], [0, 0, 1, 1], [], []>} : vector<2x32xf32>, vector<32x128xf32>, vector<2x128xf32> -> vector<2x128xf32>
    %c0_107 = arith.constant 0 : index
    %c0_108 = arith.constant 0 : index
    %175 = vector.load %arg24[%c0_107, %c0_108] : memref<32x128xf32, #tpu.memory_space<vmem>>, vector<32x128xf32>
    %cst_109 = arith.constant dense<0.000000e+00> : vector<2x128xf32>
    %176 = tpu.matmul %172, %175, %cst_109 {dimension_numbers = #tpu.dot_dimension_numbers<[1], [0], [0], [1], [0, 0, 1, 1], [], []>} : vector<2x32xf32>, vector<32x128xf32>, vector<2x128xf32> -> vector<2x128xf32>
    %c0_110 = arith.constant 0 : index
    %c0_111 = arith.constant 0 : index
    %177 = vector.load %arg21[%c0_110, %c0_111] : memref<1x128xf32, #tpu.memory_space<vmem>>, vector<1x128xf32>
    %178 = vector.broadcast %177 : vector<1x128xf32> to vector<2x128xf32>
    %179 = arith.mulf %176, %178 : vector<2x128xf32>
    %c0_112 = arith.constant 0 : index
    %c0_113 = arith.constant 0 : index
    %180 = vector.load %arg22[%c0_112, %c0_113] : memref<1x128xf32, #tpu.memory_space<vmem>>, vector<1x128xf32>
    %181 = arith.mulf %174, %179 : vector<2x128xf32>
    %182 = vector.broadcast %180 : vector<1x128xf32> to vector<2x128xf32>
    %183 = arith.subf %182, %181 : vector<2x128xf32>
    %184 = vector.shape_cast %179 : vector<2x128xf32> to vector<2x1x128xf32>
    %185 = vector.broadcast %184 : vector<2x1x128xf32> to vector<2x16x128xf32>
    %186 = arith.mulf %156, %185 : vector<2x16x128xf32>
    %187 = vector.shape_cast %183 : vector<2x128xf32> to vector<2x1x128xf32>
    %188 = vector.broadcast %187 : vector<2x1x128xf32> to vector<2x16x128xf32>
    %189 = arith.addf %186, %188 : vector<2x16x128xf32>
    %cst_114 = arith.constant 0.000000e+00 : f32
    %190 = vector.broadcast %cst_114 : f32 to vector<2x16x128xf32>
    %191 = arith.cmpf ogt, %189, %190 : vector<2x16x128xf32>
    %cst_115 = arith.constant 2.000000e-01 : f32
    %192 = vector.broadcast %cst_115 : f32 to vector<2x16x128xf32>
    %193 = arith.mulf %192, %189 : vector<2x16x128xf32>
    %194 = arith.select %191, %189, %193 : vector<2x16x128xi1>, vector<2x16x128xf32>
    %195 = vector.extract_strided_slice %194 {offsets = [0, 0, 0], sizes = [2, 4, 128], strides = [1, 1, 1]} : vector<2x16x128xf32> to vector<2x4x128xf32>
    %cst_116 = arith.constant dense<0.000000e+00> : vector<2x128xf32>
    %196 = vector.multi_reduction <add>, %195, %cst_116 [1] : vector<2x4x128xf32> to vector<2x128xf32>
    %cst_117 = arith.constant 2.500000e-01 : f32
    %197 = vector.broadcast %cst_117 : f32 to vector<2x128xf32>
    %198 = arith.mulf %196, %197 : vector<2x128xf32>
    %199 = vector.extract_strided_slice %194 {offsets = [0, 4, 0], sizes = [2, 4, 128], strides = [1, 1, 1]} : vector<2x16x128xf32> to vector<2x4x128xf32>
    %cst_118 = arith.constant dense<0.000000e+00> : vector<2x128xf32>
    %200 = vector.multi_reduction <add>, %199, %cst_118 [1] : vector<2x4x128xf32> to vector<2x128xf32>
    %cst_119 = arith.constant 2.500000e-01 : f32
    %201 = vector.broadcast %cst_119 : f32 to vector<2x128xf32>
    %202 = arith.mulf %200, %201 : vector<2x128xf32>
    %203 = vector.extract_strided_slice %194 {offsets = [0, 8, 0], sizes = [2, 4, 128], strides = [1, 1, 1]} : vector<2x16x128xf32> to vector<2x4x128xf32>
    %cst_120 = arith.constant dense<0.000000e+00> : vector<2x128xf32>
    %204 = vector.multi_reduction <add>, %203, %cst_120 [1] : vector<2x4x128xf32> to vector<2x128xf32>
    %cst_121 = arith.constant 2.500000e-01 : f32
    %205 = vector.broadcast %cst_121 : f32 to vector<2x128xf32>
    %206 = arith.mulf %204, %205 : vector<2x128xf32>
    %207 = vector.extract_strided_slice %194 {offsets = [0, 12, 0], sizes = [2, 4, 128], strides = [1, 1, 1]} : vector<2x16x128xf32> to vector<2x4x128xf32>
    %cst_122 = arith.constant dense<0.000000e+00> : vector<2x128xf32>
    %208 = vector.multi_reduction <add>, %207, %cst_122 [1] : vector<2x4x128xf32> to vector<2x128xf32>
    %cst_123 = arith.constant 2.500000e-01 : f32
    %209 = vector.broadcast %cst_123 : f32 to vector<2x128xf32>
    %210 = arith.mulf %208, %209 : vector<2x128xf32>
    %211 = tpu.concatenate %198, %202, %206, %210 in 1 : vector<2x128xf32>, vector<2x128xf32>, vector<2x128xf32>, vector<2x128xf32> -> vector<2x512xf32>
    %212 = arith.truncf %211 : vector<2x512xf32> to vector<2x512xbf16>
    %213 = arith.truncf %22 : vector<2x128xf32> to vector<2x128xbf16>
    %214 = tpu.concatenate %212, %213 in 1 : vector<2x512xbf16>, vector<2x128xbf16> -> vector<2x640xbf16>
    %c0_124 = arith.constant 0 : index
    %c0_125 = arith.constant 0 : index
    %215 = vector.load %arg25[%c0_124, %c0_125] : memref<640x256xbf16, #tpu.memory_space<vmem>>, vector<640x256xbf16>
    %cst_126 = arith.constant dense<0.000000e+00> : vector<2x256xf32>
    %216 = tpu.matmul %214, %215, %cst_126 {dimension_numbers = #tpu.dot_dimension_numbers<[1], [0], [0], [1], [0, 0, 1, 1], [], []>} : vector<2x640xbf16>, vector<640x256xbf16>, vector<2x256xf32> -> vector<2x256xf32>
    %c0_127 = arith.constant 0 : index
    %c0_128 = arith.constant 0 : index
    %217 = vector.load %arg26[%c0_127, %c0_128] : memref<1x256xf32, #tpu.memory_space<vmem>>, vector<1x256xf32>
    %218 = vector.broadcast %217 : vector<1x256xf32> to vector<2x256xf32>
    %219 = arith.addf %216, %218 : vector<2x256xf32>
    %cst_129 = arith.constant 0.000000e+00 : f32
    %220 = vector.broadcast %cst_129 : f32 to vector<2x256xf32>
    %221 = arith.cmpf ogt, %219, %220 : vector<2x256xf32>
    %cst_130 = arith.constant 2.000000e-01 : f32
    %222 = vector.broadcast %cst_130 : f32 to vector<2x256xf32>
    %223 = arith.mulf %222, %219 : vector<2x256xf32>
    %224 = arith.select %221, %219, %223 : vector<2x256xi1>, vector<2x256xf32>
    %225 = arith.truncf %224 : vector<2x256xf32> to vector<2x256xbf16>
    %c0_131 = arith.constant 0 : index
    %c0_132 = arith.constant 0 : index
    %226 = vector.load %arg27[%c0_131, %c0_132] : memref<256x1xbf16, #tpu.memory_space<vmem>>, vector<256x1xbf16>
    %cst_133 = arith.constant dense<0.000000e+00> : vector<2x1xf32>
    %227 = tpu.matmul %225, %226, %cst_133 {dimension_numbers = #tpu.dot_dimension_numbers<[1], [0], [0], [1], [0, 0, 1, 1], [], []>} : vector<2x256xbf16>, vector<256x1xbf16>, vector<2x1xf32> -> vector<2x1xf32>
    %c0_134 = arith.constant 0 : index
    %c0_135 = arith.constant 0 : index
    %228 = vector.load %arg28[%c0_134, %c0_135] : memref<1x1xf32, #tpu.memory_space<vmem>>, vector<1x1xf32>
    %229 = vector.broadcast %228 : vector<1x1xf32> to vector<2x1xf32>
    %230 = arith.addf %227, %229 : vector<2x1xf32>
    %cst_136 = arith.constant 0.000000e+00 : f32
    %231 = vector.broadcast %cst_136 : f32 to vector<2x1xf32>
    %232 = arith.subf %231, %230 : vector<2x1xf32>
    %233 = math.exp %232 : vector<2x1xf32>
    %cst_137 = arith.constant 1.000000e+00 : f32
    %234 = vector.broadcast %cst_137 : f32 to vector<2x1xf32>
    %235 = arith.addf %234, %233 : vector<2x1xf32>
    %cst_138 = arith.constant 1.000000e+00 : f32
    %236 = vector.broadcast %cst_138 : f32 to vector<2x1xf32>
    %237 = arith.divf %236, %235 : vector<2x1xf32>
    %238 = vector.shape_cast %237 : vector<2x1xf32> to vector<2x1x1xf32>
    %c0_139 = arith.constant 0 : index
    %c0_140 = arith.constant 0 : index
    %c0_141 = arith.constant 0 : index
    %239 = vector.load %arg29[%c0_139, %c0_140, %c0_141] : memref<2x1x1xf32, #tpu.memory_space<vmem>>, vector<2x1x1xf32>
    tpu.vector_store %arg29[%c0_139, %c0_140, %c0_141], %238 {strides = array<i32>} : memref<2x1x1xf32, #tpu.memory_space<vmem>>, vector<2x1x1xf32>,
    return
  }
  func.func @transform_0(%arg0: i32) -> (i32, i32, i32, i32) {
    %c0_i32 = arith.constant 0 : i32
    %c0_i32_0 = arith.constant 0 : i32
    %c0_i32_1 = arith.constant 0 : i32
    %c0_i32_2 = arith.constant 0 : i32
    return %c0_i32, %arg0, %c0_i32_0, %c0_i32_1 : i32, i32, i32, i32
  }
  func.func @transform_1(%arg0: i32) -> (i32, i32, i32) {
    %c0_i32 = arith.constant 0 : i32
    %c0_i32_0 = arith.constant 0 : i32
    %c0_i32_1 = arith.constant 0 : i32
    return %arg0, %c0_i32, %c0_i32_0 : i32, i32, i32
  }
  func.func @transform_2(%arg0: i32) -> (i32, i32) {
    %c0_i32 = arith.constant 0 : i32
    %c0_i32_0 = arith.constant 0 : i32
    %c0_i32_1 = arith.constant 0 : i32
    return %c0_i32, %c0_i32_0 : i32, i32
  }
  func.func @transform_3(%arg0: i32) -> (i32, i32) {
    %c0_i32 = arith.constant 0 : i32
    %c0_i32_0 = arith.constant 0 : i32
    %c0_i32_1 = arith.constant 0 : i32
    return %c0_i32, %c0_i32_0 : i32, i32
  }
  func.func @transform_4(%arg0: i32) -> (i32, i32) {
    %c0_i32 = arith.constant 0 : i32
    %c0_i32_0 = arith.constant 0 : i32
    %c0_i32_1 = arith.constant 0 : i32
    return %c0_i32, %c0_i32_0 : i32, i32
  }
  func.func @transform_5(%arg0: i32) -> (i32, i32) {
    %c0_i32 = arith.constant 0 : i32
    %c0_i32_0 = arith.constant 0 : i32
    %c0_i32_1 = arith.constant 0 : i32
    return %c0_i32, %c0_i32_0 : i32, i32
  }
  func.func @transform_6(%arg0: i32) -> (i32, i32) {
    %c0_i32 = arith.constant 0 : i32
    %c0_i32_0 = arith.constant 0 : i32
    %c0_i32_1 = arith.constant 0 : i32
    return %c0_i32, %c0_i32_0 : i32, i32
  }
  func.func @transform_7(%arg0: i32) -> (i32, i32) {
    %c0_i32 = arith.constant 0 : i32
    %c0_i32_0 = arith.constant 0 : i32
    %c0_i32_1 = arith.constant 0 : i32
    return %c0_i32, %c0_i32_0 : i32, i32
  }
  func.func @transform_8(%arg0: i32) -> (i32, i32) {
    %c0_i32 = arith.constant 0 : i32
    %c0_i32_0 = arith.constant 0 : i32
    %c0_i32_1 = arith.constant 0 : i32
    return %c0_i32, %c0_i32_0 : i32, i32
  }
  func.func @transform_9(%arg0: i32) -> (i32, i32) {
    %c0_i32 = arith.constant 0 : i32
    %c0_i32_0 = arith.constant 0 : i32
    %c0_i32_1 = arith.constant 0 : i32
    return %c0_i32, %c0_i32_0 : i32, i32
  }
  func.func @transform_10(%arg0: i32) -> (i32, i32) {
    %c0_i32 = arith.constant 0 : i32
    %c0_i32_0 = arith.constant 0 : i32
    %c0_i32_1 = arith.constant 0 : i32
    return %c0_i32, %c0_i32_0 : i32, i32
  }
  func.func @transform_11(%arg0: i32) -> (i32, i32) {
    %c0_i32 = arith.constant 0 : i32
    %c0_i32_0 = arith.constant 0 : i32
    %c0_i32_1 = arith.constant 0 : i32
    return %c0_i32, %c0_i32_0 : i32, i32
  }
  func.func @transform_12(%arg0: i32) -> (i32, i32) {
    %c0_i32 = arith.constant 0 : i32
    %c0_i32_0 = arith.constant 0 : i32
    %c0_i32_1 = arith.constant 0 : i32
    return %c0_i32, %c0_i32_0 : i32, i32
  }
  func.func @transform_13(%arg0: i32) -> (i32, i32) {
    %c0_i32 = arith.constant 0 : i32
    %c0_i32_0 = arith.constant 0 : i32
    %c0_i32_1 = arith.constant 0 : i32
    return %c0_i32, %c0_i32_0 : i32, i32
  }
  func.func @transform_14(%arg0: i32) -> (i32, i32) {
    %c0_i32 = arith.constant 0 : i32
    %c0_i32_0 = arith.constant 0 : i32
    %c0_i32_1 = arith.constant 0 : i32
    return %c0_i32, %c0_i32_0 : i32, i32
  }
  func.func @transform_15(%arg0: i32) -> (i32, i32) {
    %c0_i32 = arith.constant 0 : i32
    %c0_i32_0 = arith.constant 0 : i32
    %c0_i32_1 = arith.constant 0 : i32
    return %c0_i32, %c0_i32_0 : i32, i32
  }
  func.func @transform_16(%arg0: i32) -> (i32, i32) {
    %c0_i32 = arith.constant 0 : i32
    %c0_i32_0 = arith.constant 0 : i32
    %c0_i32_1 = arith.constant 0 : i32
    return %c0_i32, %c0_i32_0 : i32, i32
  }
  func.func @transform_17(%arg0: i32) -> (i32, i32) {
    %c0_i32 = arith.constant 0 : i32
    %c0_i32_0 = arith.constant 0 : i32
    %c0_i32_1 = arith.constant 0 : i32
    return %c0_i32, %c0_i32_0 : i32, i32
  }
  func.func @transform_18(%arg0: i32) -> (i32, i32) {
    %c0_i32 = arith.constant 0 : i32
    %c0_i32_0 = arith.constant 0 : i32
    %c0_i32_1 = arith.constant 0 : i32
    return %c0_i32, %c0_i32_0 : i32, i32
  }
  func.func @transform_19(%arg0: i32) -> (i32, i32) {
    %c0_i32 = arith.constant 0 : i32
    %c0_i32_0 = arith.constant 0 : i32
    %c0_i32_1 = arith.constant 0 : i32
    return %c0_i32, %c0_i32_0 : i32, i32
  }
  func.func @transform_20(%arg0: i32) -> (i32, i32) {
    %c0_i32 = arith.constant 0 : i32
    %c0_i32_0 = arith.constant 0 : i32
    %c0_i32_1 = arith.constant 0 : i32
    return %c0_i32, %c0_i32_0 : i32, i32
  }
  func.func @transform_21(%arg0: i32) -> (i32, i32) {
    %c0_i32 = arith.constant 0 : i32
    %c0_i32_0 = arith.constant 0 : i32
    %c0_i32_1 = arith.constant 0 : i32
    return %c0_i32, %c0_i32_0 : i32, i32
  }
  func.func @transform_22(%arg0: i32) -> (i32, i32) {
    %c0_i32 = arith.constant 0 : i32
    %c0_i32_0 = arith.constant 0 : i32
    %c0_i32_1 = arith.constant 0 : i32
    return %c0_i32, %c0_i32_0 : i32, i32
  }
  func.func @transform_23(%arg0: i32) -> (i32, i32) {
    %c0_i32 = arith.constant 0 : i32
    %c0_i32_0 = arith.constant 0 : i32
    %c0_i32_1 = arith.constant 0 : i32
    return %c0_i32, %c0_i32_0 : i32, i32
  }
  func.func @transform_24(%arg0: i32) -> (i32, i32) {
    %c0_i32 = arith.constant 0 : i32
    %c0_i32_0 = arith.constant 0 : i32
    %c0_i32_1 = arith.constant 0 : i32
    return %c0_i32, %c0_i32_0 : i32, i32
  }
  func.func @transform_25(%arg0: i32) -> (i32, i32) {
    %c0_i32 = arith.constant 0 : i32
    %c0_i32_0 = arith.constant 0 : i32
    %c0_i32_1 = arith.constant 0 : i32
    return %c0_i32, %c0_i32_0 : i32, i32
  }
  func.func @transform_26(%arg0: i32) -> (i32, i32) {
    %c0_i32 = arith.constant 0 : i32
    %c0_i32_0 = arith.constant 0 : i32
    %c0_i32_1 = arith.constant 0 : i32
    return %c0_i32, %c0_i32_0 : i32, i32
  }
  func.func @transform_27(%arg0: i32) -> (i32, i32) {
    %c0_i32 = arith.constant 0 : i32
    %c0_i32_0 = arith.constant 0 : i32
    %c0_i32_1 = arith.constant 0 : i32
    return %c0_i32, %c0_i32_0 : i32, i32
  }
  func.func @transform_28(%arg0: i32) -> (i32, i32, i32) {
    %c0_i32 = arith.constant 0 : i32
    %c0_i32_0 = arith.constant 0 : i32
    %c0_i32_1 = arith.constant 0 : i32
    return %arg0, %c0_i32, %c0_i32_0 : i32, i32, i32
  }
}

</mosaic_0001>

<bundles_post_ra>
// kernel: tpu_custom_call.1
= control target key start
LH: loop header
LB: loop body
LE: loop exit
PB: predicated region body
PF: predicated region fallthrough
CT: control target
= control target key end

     0   :  { %s5431_s0 = inlined_call_operand.vmem [shape: bf16[4,4,16,2], index: 0, kind: input, shape index: {}]   ;;  %s5432_s1 = inlined_call_operand.vmem [shape: bf16[4,1,128], index: 1, kind: input, shape index: {}]   ;;  %s5433_s2 = inlined_call_operand.vmem [shape: bf16[128,128], index: 2, kind: input, shape index: {}]   ;;  %s5434_s3 = inlined_call_operand.vmem [shape: f32[1,128], index: 3, kind: input, shape index: {}]   ;;  %s5435_s4 = inlined_call_operand.vmem [shape: bf16[128,128], index: 4, kind: input, shape index: {}]   ;;  %s5436_s5 = inlined_call_operand.vmem [shape: f32[1,128], index: 5, kind: input, shape index: {}]   ;;  %s5437_s6 = inlined_call_operand.vmem [shape: bf16[6,32], index: 6, kind: input, shape index: {}]   ;;  %s5438_s7 = inlined_call_operand.vmem [shape: f32[1,32], index: 7, kind: input, shape index: {}]   ;;  %s5439_s8 = inlined_call_operand.vmem [shape: f32[1,32], index: 8, kind: input, shape index: {}]   ;;  %s5440_s9 = inlined_call_operand.vmem [shape: f32[1,32], index: 9, kind: input, shape index: {}]   ;;  %s5441_s10 = inlined_call_operand.vmem [shape: f32[32,8], index: 10, kind: input, shape index: {}]   ;;  %s5442_s11 = inlined_call_operand.vmem [shape: f32[8,32], index: 11, kind: input, shape index: {}]   ;;  %s5443_s12 = inlined_call_operand.vmem [shape: bf16[96,64], index: 12, kind: input, shape index: {}]   ;;  %s5444_s13 = inlined_call_operand.vmem [shape: f32[1,64], index: 13, kind: input, shape index: {}]   ;;  %s5445_s14 = inlined_call_operand.vmem [shape: f32[1,64], index: 14, kind: input, shape index: {}]   ;;  %s5446_s15 = inlined_call_operand.vmem [shape: f32[1,64], index: 15, kind: input, shape index: {}]   ;;  %s5447_s16 = inlined_call_operand.vmem [shape: f32[64,16], index: 16, kind: input, shape index: {}]   ;;  %s5448_s17 = inlined_call_operand.vmem [shape: f32[16,64], index: 17, kind: input, shape index: {}]   ;;  %s5449_s18 = inlined_call_operand.vmem [shape: bf16[192,128], index: 18, kind: input, shape index: {}]   ;;  %s5450_s19 = inlined_call_operand.vmem [shape: f32[1,128], index: 19, kind: input, shape index: {}]   ;;  %s5451_s20 = inlined_call_operand.vmem [shape: f32[1,128], index: 20, kind: input, shape index: {}]   ;;  %s5452_s21 = inlined_call_operand.vmem [shape: f32[1,128], index: 21, kind: input, shape index: {}]   ;;  %s5453_s22 = inlined_call_operand.vmem [shape: f32[128,32], index: 22, kind: input, shape index: {}]   ;;  %s5454_s23 = inlined_call_operand.vmem [shape: f32[32,128], index: 23, kind: input, shape index: {}]   ;;  %s5455_s24 = inlined_call_operand.hbm [shape: bf16[640,256], index: 24, kind: input, shape index: {}]   ;;  %s5456_s25 = inlined_call_operand.vmem [shape: f32[1,256], index: 25, kind: input, shape index: {}]   ;;  %s5457_s26 = inlined_call_operand.vmem [shape: bf16[256,1], index: 26, kind: input, shape index: {}]   ;;  %s5458_s27 = inlined_call_operand.<no memory space> [shape: f32[1,1], index: 27, kind: input, shape index: {}]   ;;  %s5459_s28 = inlined_call_operand.vmem [shape: f32[4,1,1], index: 28, kind: output, shape index: {}]  }
   0x1   :  { %5467 = sst [smem:[#allocation9_spill]] %s5431_s0  ;;  %v33_v0 = vstv %s5458_s27 }
   0x2   :  { %5468 = sst [smem:[#allocation10_spill]] %s5432_s1  ;;  %34 = vst [vmem:[#allocation2] sm:$0x1] %v33_v0 }
   0x3   :  { %5469 = sst [smem:[#allocation11_spill]] %s5433_s2 }
   0x4   :  { %5470 = sst [smem:[#allocation12_spill]] %s5434_s3 }
   0x5   :  { %5471 = sst [smem:[#allocation13_spill]] %s5435_s4 }
   0x6   :  { %5472 = sst [smem:[#allocation14_spill]] %s5436_s5 }
   0x7   :  { %5473 = sst [smem:[#allocation15_spill]] %s5437_s6 }
   0x8   :  { %5474 = sst [smem:[#allocation16_spill]] %s5438_s7 }
   0x9   :  { %5475 = sst [smem:[#allocation17_spill]] %s5439_s8 }
   0xa   :  { %5476 = sst [smem:[#allocation18_spill]] %s5440_s9 }
   0xb   :  { %5477 = sst [smem:[#allocation19_spill]] %s5441_s10 }
   0xc   :  { %5478 = sst [smem:[#allocation20_spill]] %s5442_s11 }
   0xd   :  { %5479 = sst [smem:[#allocation21_spill]] %s5443_s12 }
   0xe   :  { %5480 = sst [smem:[#allocation22_spill]] %s5455_s24 }
   0xf   :  { %5481 = sst [smem:[#allocation23_spill]] %s5459_s28 }
  0x10   :  { %35 = vsyncpa [#allocation5], 0  ;;  %s4611_s9 = smov 0   ;;  %s4613_s30 = smov 0  }
  0x11   :  { %s4615_s3 = smov 0  }
  0x12 LB: > { %s5464_s27 = sadd.s32 4294967295, %s4454_s3   ;;  %s4628_s6 = sadd.s32 1, %s4454_s3   ;;  %s4454_s3 = sphi %s4615_s3, %s5508_s3   ;;  %s4450_s30 = sphi %s4613_s30, %s5511_s30   ;;  %s4446_s9 = sphi %s4611_s9, %s5510_s9  }
  0x13   : > { %5482 = sst [smem:[#allocation7_spill]] %s4628_s6  ;;  %s45_s10 = ssub.s32 %s4454_s3, %s4628_s6 }
  0x14   : > { %s48_s0 = sadd.s32 1, %s4450_s30  ;;  %p46_p0 = scmp.eq.s32.totalorder %s45_s10, 0 }
  0x15   : > { %p55_p1 = scmp.ne.s32.totalorder %s4450_s30, %s4446_s9  ;;  %p56_p2 = scmp.eq.s32.totalorder %s4454_s3, 0 }
  0x16   : > { %p3593_p3 = scmp.ge.s32.totalorder %s4454_s3, 1  ;;  %p670_p5 = scmp.lt.s32.totalorder %s4454_s3, 3 }
  0x17   : > { %s4638_s11 = scalar_select %p46_p0, %s4450_s30, %s48_s0  }
  0x18   : > { %p4640_p4 = por %p56_p2, %p55_p1  ;;  %p4647_p6 = scmp.eq.s32.totalorder %s5464_s27, 0 }
  0x19   : > { %5483 = sst [smem:[#allocation8_spill]] %s4638_s11  ;;  %p4651_p7 = pnand %p3593_p3, %p670_p5 }
  0x1a   : > { %s5487_s24 = sld [smem:[#allocation22_spill]]  ;;  %s4456_s8 = smov [#allocation4]  }
  0x1b   : > { %p4339_p8 = pneg %p4651_p7  ;;  %s749_s5 = sshll.u32 %s4456_s8, 4  ;;  %s750_s5 = int_to_ptr.vmem [resolvable:$true] %s749_s5 }
  0x1c   : > { %s4457_s10 = smov 128   ;;  %s4458_s0 = smov 8  }
  0x1d   : > { %p4340_p9 = pnand %p4647_p6, %p4339_p8  ;;  %p3595_p10 = scmp.ge.s32.totalorder %s4454_s3, 2 }
  0x1f   : > { %768 = sbr.rel (%p3595_p10) target bundleno = 54 (0x36), region = 120 }
  0x20   : > { %s747_s4 = sshll.u32 %s5487_s24, 4  ;;  %s748_s4 = int_to_ptr.hbm [resolvable:$true] %s747_s4 }
  0x21   : > { %4342 = dma.hbm_to_vmem [thread:$0]  (!%p4340_p9), %s748_s4, 10240, %s750_s5, [#allocation5], %s4457_s10, %s4457_s10, %s4458_s0  }
  0x24   : > { %771 = sbr.rel (!%p4640_p4) target bundleno = 54 (0x36), region = 124  ;;  %s773_s12 = sand.u32 (%p4640_p4), 1, %s4450_s30  }
  0x25   : > { %s4196_s1 = sshll.u32 (%p4640_p4), %s4454_s3, 4  ;;  %s3596_s27 = sshll.u32 (%p4640_p4), %s773_s12, 6 }
  0x26   : > { %s5488_s8 = sld [smem:[#allocation9_spill]] (%p4640_p4)  ;;  %s775_s28 = scalar_lea.vmem (%p4640_p4), [#allocation3], %s3596_s27 }
  0x2c   : > { %s779_s6 = scalar_lea.vmem %s5488_s8, %s4196_s1 }
  0x2d   : > { %v796_v1 = vld [vmem:[%s779_s6] sm:$0xff]   ;;  %v800_v2 = vld [vmem:[%s779_s6 + $0x8] sm:$0xff]  }
  0x2e   : > { %v804_v3 = vld [vmem:[%s779_s6 + $0x20] sm:$0xff]   ;;  %797 = vst [vmem:[%s775_s28] sm:$0xff] %v796_v1   ;;  %v808_v4 = vld [vmem:[%s779_s6 + $0x28] sm:$0xff]  }
  0x2f   : > { %801 = vst [vmem:[%s775_s28 + $0x8] sm:$0xff] %v800_v2   ;;  %v812_v5 = vld [vmem:[%s779_s6 + $0x40] sm:$0xff]   ;;  %v816_v6 = vld [vmem:[%s779_s6 + $0x48] sm:$0xff]  }
  0x30   : > { %805 = vst [vmem:[%s775_s28 + $0x10] sm:$0xff] %v804_v3   ;;  %v820_v7 = vld [vmem:[%s779_s6 + $0x60] sm:$0xff]   ;;  %v824_v8 = vld [vmem:[%s779_s6 + $0x68] sm:$0xff]  }
  0x31   : > { %809 = vst [vmem:[%s775_s28 + $0x18] sm:$0xff] %v808_v4  }
  0x32   : > { %813 = vst [vmem:[%s775_s28 + $0x20] sm:$0xff] %v812_v5  }
  0x33   : > { %817 = vst [vmem:[%s775_s28 + $0x28] sm:$0xff] %v816_v6  }
  0x34   : > { %821 = vst [vmem:[%s775_s28 + $0x30] sm:$0xff] %v820_v7  }
  0x35   : > { %825 = vst [vmem:[%s775_s28 + $0x38] sm:$0xff] %v824_v8  }
  0x36 PF: > { %894 = sbr.rel (%p4651_p7) target bundleno = 2344 (0x928), region = 169  ;;  %s897_s24 = sand.u32 (!%p4651_p7), 1, %s4446_s9  }
  0x37   : > { %s3601_s27 = sshll.u32 (!%p4651_p7), %s897_s24, 6 }
  0x38   : > { %s4673_s11 = scalar_lea.vmem (!%p4651_p7), [#allocation3], %s3601_s27 }
  0x3b   : > { %4441 = dma.done.wait (%p4647_p6), [#allocation5], 10240  }
  0x3c   : > { %4443 = vsyncadd (%p4647_p6), [#allocation5], 4294957056  ;;  %v4213_v9 = vld [vmem:[%s4673_s11] sm:$0xff]  ;;  %v4681_v10 = vld [vmem:[%s4673_s11 + $0x10] sm:$0xff]  ;;  %s4459_s28 = smov 2   ;;  %vm1326_vm0 = vcmask 1047552  }
  0x3d   : > { %v4684_v11 = vld [vmem:[%s4673_s11 + $0x20] sm:$0xff]  ;;  %1236 = vrot.lane.b32.xlu0 %v4213_v9, %s4459_s28  ;;  %1266 = vrot.lane.b32.xlu1 %v4681_v10, %s4459_s28  ;;  %v1314_v12 = vshll.u32 %v4213_v9, 16  ;;  %v1312_v13 = vshrl.u32 %v4213_v9, 16  ;;  %v4219_v15 = vld [vmem:[%s4673_s11 + $0x30] sm:$0xff]  ;;  %vm1327_vm1 = vsmask.f32 7424 }
  0x3e   : > { %1294 = vrot.lane.b32.xlu2 %v4684_v11, %s4459_s28  ;;  %s4460_s9 = smov 4   ;;  %vm4691_vm2 = vmand %vm1326_vm0, %vm1327_vm1  ;;  %v4698_v19 = vld [vmem:[%s4673_s11 + $0x8] sm:$0xff]  ;;  %v4702_v20 = vld [vmem:[%s4673_s11 + $0x18] sm:$0xff]  ;;  %s5491_s2 = sld [smem:[#allocation15_spill]]  ;;  %vm1373_vm3 = vcmask 1042432   ;;  %v1206_v30 = vshrl.u32 %v4219_v15, 16 }
  0x3f   : > { %v1316_v14 = vrot.slane %v1314_v12, 1  ;;  %v4705_v21 = vld [vmem:[%s4673_s11 + $0x28] sm:$0xff]  ;;  %v4220_v22 = vld [vmem:[%s4673_s11 + $0x38] sm:$0xff]  ;;  %v1320_v23 = vshll.u32 %v4698_v19, 16  ;;  %v1318_v24 = vshrl.u32 %v4698_v19, 16  ;;  %v1209_v32 = vshll.u32 %v4219_v15, 16 }
  0x40   : > { %v1208_v31 = vrot.slane %v1206_v30, 7  ;;  %vm1221_vm4 = vcmask 1040384   ;;  %vm1222_vm5 = vsmask.f32 256  ;;  %vm1254_vm7 = vcmask 15360   ;;  %s5494_s5 = sld [smem:[#allocation16_spill]] }
  0x41   : > { %v1317_v16 = vor.u32 %v1316_v14, %v1312_v13  ;;  %v1322_v25 = vrot.slane %v1320_v23, 1  ;;  %vm4719_vm6 = vmand %vm1221_vm4, %vm1222_vm5  ;;  %vm1261_vm8 = vcmask 31744   ;;  %vm1356_vm9 = vcmask 48128   ;;  %s5495_s12 = sld [smem:[#allocation19_spill]]  ;;  %s4461_s6 = smov 32   ;;  %v2435_v35 = vld [vmem:[%s5453_s22 + $0x50] sm:$0xff] }
  0x42   : > { %v1211_v34 = vor.u32 %v1209_v32, %v1208_v31  ;;  %v1213_v51 = vshrl.u32 %v4220_v22, 16  ;;  %v1216_v54 = vshll.u32 %v4220_v22, 16  ;;  %vm1426_vm10 = vcmask 261120   ;;  %s5496_s29 = sld [smem:[#allocation20_spill]]  ;;  %s4462_s7 = smov 64  }
  0x43   : > { %v1329_v18 = vsel %vm4691_vm2, %v1317_v16, 0  ;;  %v1323_v28 = vor.u32 %v1322_v25, %v1318_v24  ;;  %vm1023_vm11 = vcmask 1041409   ;;  %vm1597_vm12 = vcmask 64512   ;;  %s5497_s4 = sld [smem:[#allocation17_spill]] }
  0x44   : > { %v1351_v26 = vld [vmem:[%s5491_s2] sm:$0x7]  ;;  %v1224_v36 = vsel %vm4719_vm6, 0, %v1211_v34  ;;  %v1215_v53 = vrot.slane %v1213_v51, 7  ;;  %s5498_s0 = sld [smem:[#allocation18_spill]] }
  0x45   : > { %1250 = vrot.lane.b32.xlu0 %v4681_v10, %s4460_s9  ;;  %1280 = vrot.lane.b32.xlu1 %v4684_v11, %s4460_s9  ;;  %v1375_v27 = vsel %vm1373_vm3, %v1351_v26, 0  ;;  %v1330_v29 = vsel %vm4691_vm2, %v1323_v28, 0  ;;  %s5499_s24 = sld [smem:[#allocation11_spill]] }
  0x46   : > { %1298 = vrot.lane.b32.xlu2 %v4219_v15, %s4460_s9  ;;  %1384 = vmatpush.bf16.msra.mxu2 %v1375_v27  ;;  %v1218_v55 = vor.u32 %v1216_v54, %v1215_v53  ;;  %s5502_s1 = sld [smem:[#allocation21_spill]] }
  0x47   : > { %v1530_v30 = vld [vmem:[%s5495_s12 + $0x18] sm:$0xff]  ;;  %v1529_v31 = vld [vmem:[%s5495_s12 + $0x10] sm:$0xff]  ;;  %s5505_s2 = sld [smem:[#allocation12_spill]] }
  0x48   : > { %v1225_v56 = vsel %vm4719_vm6, 0, %v1218_v55  ;;  %1548 = vmatpush.msra.mxu3 %v1530_v30  ;;  %s5507_s27 = sld [smem:[#allocation23_spill]] }
  0x4a   : > { %1549 = vmatpush.msra.mxu3 %v1529_v31 }
  0x4d   : > { %1331 = vrot.lane.b32.xlu0 %v4219_v15, %s4459_s28  ;;  %1337 = vrot.lane.b32.xlu1 %v1329_v18, %s4460_s9 }
  0x4e   : > { %1238 = vrot.lane.b32.xlu2 %v4698_v19, %s4459_s28 }
  0x55   : > { %1252 = vrot.lane.b32.xlu0 %v4702_v20, %s4460_s9  ;;  %1268 = vrot.lane.b32.xlu1 %v4702_v20, %s4459_s28 }
  0x56   : > { %1282 = vrot.lane.b32.xlu2 %v4705_v21, %s4460_s9 }
  0x5d   : > { %1296 = vrot.lane.b32.xlu0 %v4705_v21, %s4459_s28  ;;  %1300 = vrot.lane.b32.xlu1 %v4220_v22, %s4460_s9 }
  0x5e   : > { %1333 = vrot.lane.b32.xlu2 %v4220_v22, %s4459_s28  ;;  %s5500_s28 = sadd.s32 4294967295, %s4454_s3   ;;  %s5503_s3 = sld [smem:[#allocation13_spill]] }
  0x65   : > { %1339 = vrot.lane.b32.xlu0 %v1330_v29, %s4460_s9  ;;  %s3603_s9 = sshll.u32 %s5500_s28, 1 }
  0x66   : > { %p980_p11 = scmp.lt.s32.totalorder %s3603_s9, 3 }
  0x68   : > { %s5513_s9 = smov (!%p980_p11, %s3603_s9), 3 }
  0x69   : > { %s987_s11 = scalar_lea.vmem %s5507_s27, %s5513_s9 }
  0x98   : > { %v1295_v44 = vpop.permute.xlu2 %1294 }
  0x99   : > { %v1304_v45 = vsel %vm1254_vm7, %v4681_v10, %v1295_v44 }
  0xa0   : > { %v1299_v46 = vpop.permute.xlu2 %1298 }
  0xa1   : > { %v1309_v47 = vsel %vm1261_vm8, %v1304_v45, %v1299_v46  ;;  %v1527_v45 = vld [vmem:[%s5495_s12] sm:$0xff] }
  0xa8   : > { %v1239_v57 = vpop.permute.xlu2 %1238 }
  0xa9   : > { %v1260_v58 = vsel %vm1254_vm7, %v1225_v56, %v1239_v57 }
  0xaf   : > { %v1237_v33 = vpop.permute.xlu0 %1236  ;;  %v1267_v40 = vpop.permute.xlu1 %1266 }
  0xb0   : > { %v1257_v37 = vsel %vm1254_vm7, %v1224_v36, %v1237_v33  ;;  %v1286_v41 = vsel %vm1254_vm7, %v4213_v9, %v1267_v40  ;;  %v1283_v63 = vpop.permute.xlu2 %1282 }
  0xb7   : > { %v1251_v38 = vpop.permute.xlu0 %1250  ;;  %v1281_v42 = vpop.permute.xlu1 %1280 }
  0xb8   : > { %v1263_v39 = vsel %vm1261_vm8, %v1257_v37, %v1251_v38  ;;  %v1291_v43 = vsel %vm1261_vm8, %v1286_v41, %v1281_v42  ;;  %v1334_v5 = vpop.permute.xlu2 %1333  ;;  %v1528_v38 = vld [vmem:[%s5495_s12 + $0x8] sm:$0xff] }
  0xb9   : > { %3713 = vmatmul.msk.bf16.vlgmr.msra.gmra.mxu2 %vm1356_vm9, %v1263_v39  ;;  %v1346_v6 = vsel %vm1254_vm7, %v4705_v21, %v1334_v5  ;;  %v4759_v21 = vld [vmem:[%s5494_s5] ss:$0 sm:$0xff]  ;;  %1550 = vmatpush.msra.mxu3 %v1528_v38 }
  0xbb   : > { %1551 = vmatpush.msra.mxu3 %v1527_v45 }
  0xbd   : > { %1573 = vmatpush.msrb.mxu3 %v1530_v30 }
  0xbf   : > { %v1332_v48 = vpop.permute.xlu0 %1331  ;;  %v1338_v50 = vpop.permute.xlu1 %1337  ;;  %1574 = vmatpush.msrb.mxu3 %v1529_v31 }
  0xc0   : > { %v1343_v49 = vsel %vm1254_vm7, %v4684_v11, %v1332_v48 }
  0xc1   : > { %v1348_v52 = vsel %vm1261_vm8, %v1343_v49, %v1338_v50  ;;  %1575 = vmatpush.msrb.mxu3 %v1528_v38 }
  0xc3   : > { %1576 = vmatpush.msrb.mxu3 %v1527_v45 }
  0xc7   : > { %v1253_v59 = vpop.permute.xlu0 %1252  ;;  %v1269_v61 = vpop.permute.xlu1 %1268 }
  0xc8   : > { %v1265_v60 = vsel %vm1261_vm8, %v1260_v58, %v1253_v59  ;;  %v1289_v62 = vsel %vm1254_vm7, %v4698_v19, %v1269_v61 }
  0xc9   : > { %3714 = vmatmul.msk.bf16.gmra.mxu2 %vm1356_vm9, %v1291_v43  ;;  %v1293_v0 = vsel %vm1261_vm8, %v1289_v62, %v1283_v63 }
  0xcf   : > { %v1297_v1 = vpop.permute.xlu0 %1296  ;;  %v1301_v3 = vpop.permute.xlu1 %1300 }
  0xd0   : > { %v1307_v2 = vsel %vm1254_vm7, %v4702_v20, %v1297_v1 }
  0xd1   : > { %v1311_v4 = vsel %vm1261_vm8, %v1307_v2, %v1301_v3 }
  0xd7   : > { %v1340_v7 = vpop.permute.xlu0 %1339 }
  0xd8   : > { %v1350_v8 = vsel %vm1261_vm8, %v1346_v6, %v1340_v7 }
  0xd9   : > { %3715 = vmatmul.msk.bf16.gmra.mxu2 %vm1356_vm9, %v1309_v47 }
  0xe9   : > { %3716 = vmatmul.msk.bf16.gmra.mxu2 %vm1356_vm9, %v1348_v52 }
  0xf9   : > { %3717 = vmatmul.msk.bf16.gmra.mxu2 %vm1356_vm9, %v1265_v60 }
 0x109   : > { %3718 = vmatmul.msk.bf16.gmra.mxu2 %vm1356_vm9, %v1293_v0 }
 0x119   : > { %3719 = vmatmul.msk.bf16.gmra.mxu2 %vm1356_vm9, %v1311_v4 }
 0x129   : > { %3720 = vmatmul.msk.bf16.gmra.mxu2 %vm1356_vm9, %v1350_v8 }
 0x13c   : > { %v1386_v9 = vpop.f32.mrf.mxu2 }
 0x13d   : > { %v4765_v23 = vadd.f32 %v4759_v21, %v1386_v9 }
 0x13f   : > { %v1469_v29 = vmul.f32 %v4765_v23, %v4765_v23  ;;  %v1427_v32 = vsel %vm1426_vm10, %v4765_v23, 0.0 }
 0x141   : > { %v1485_v43 = vsel %vm1426_vm10, %v1469_v29, 0.0 }
 0x144   : > { %v1388_v10 = vpop.f32.mrf.mxu2 }
 0x145   : > { %v4762_v22 = vadd.f32 %v4759_v21, %v1388_v10 }
 0x147   : > { %v1428_v26 = vsel %vm1426_vm10, %v4762_v22, 0.0  ;;  %v1470_v27 = vmul.f32 %v4762_v22, %v4762_v22 }
 0x148   : > { %v1429_v37 = vadd.f32 %v1428_v26, %v1427_v32 }
 0x149   : > { %v1486_v39 = vsel %vm1426_vm10, %v1470_v27, 0.0 }
 0x14a   : > { %v1487_v50 = vadd.f32 %v1486_v39, %v1485_v43 }
 0x14c   : > { %v1391_v11 = vpop.f32.mrf.mxu2 }
 0x14d   : > { %v4768_v24 = vadd.f32 %v4759_v21, %v1391_v11 }
 0x14f   : > { %v1430_v33 = vsel %vm1426_vm10, %v4768_v24, 0.0  ;;  %v1471_v34 = vmul.f32 %v4768_v24, %v4768_v24 }
 0x150   : > { %v1431_v44 = vadd.f32 %v1430_v33, %v1429_v37 }
 0x151   : > { %v1488_v46 = vsel %vm1426_vm10, %v1471_v34, 0.0 }
 0x152   : > { %v1489_v59 = vadd.f32 %v1488_v46, %v1487_v50 }
 0x154   : > { %v1393_v12 = vpop.f32.mrf.mxu2 }
 0x155   : > { %v4775_v28 = vadd.f32 %v4759_v21, %v1393_v12 }
 0x157   : > { %v1432_v40 = vsel %vm1426_vm10, %v4775_v28, 0.0  ;;  %v1472_v41 = vmul.f32 %v4775_v28, %v4775_v28 }
 0x158   : > { %v1433_v51 = vadd.f32 %v1432_v40, %v1431_v44 }
 0x159   : > { %v1490_v55 = vsel %vm1426_vm10, %v1472_v41, 0.0 }
 0x15a   : > { %v1491_v1 = vadd.f32 %v1490_v55, %v1489_v59 }
 0x15c   : > { %v1396_v13 = vpop.f32.mrf.mxu2 }
 0x15d   : > { %v4792_v36 = vadd.f32 %v4759_v21, %v1396_v13 }
 0x15f   : > { %v1434_v47 = vsel %vm1426_vm10, %v4792_v36, 0.0  ;;  %v1473_v52 = vmul.f32 %v4792_v36, %v4792_v36 }
 0x160   : > { %v1435_v60 = vadd.f32 %v1434_v47, %v1433_v51 }
 0x161   : > { %v1492_v2 = vsel %vm1426_vm10, %v1473_v52, 0.0 }
 0x162   : > { %v1493_v31 = vadd.f32 %v1492_v2, %v1491_v1 }
 0x164   : > { %v1398_v14 = vpop.f32.mrf.mxu2 }
 0x165   : > { %v4803_v42 = vadd.f32 %v4759_v21, %v1398_v14 }
 0x167   : > { %v1436_v56 = vsel %vm1426_vm10, %v4803_v42, 0.0  ;;  %v1474_v61 = vmul.f32 %v4803_v42, %v4803_v42 }
 0x168   : > { %v1437_v3 = vadd.f32 %v1436_v56, %v1435_v60 }
 0x169   : > { %v1494_v9 = vsel %vm1426_vm10, %v1474_v61, 0.0 }
 0x16a   : > { %v1495_v40 = vadd.f32 %v1494_v9, %v1493_v31 }
 0x16c   : > { %v1401_v15 = vpop.f32.mrf.mxu2 }
 0x16d   : > { %v4813_v48 = vadd.f32 %v4759_v21, %v1401_v15 }
 0x16f   : > { %v1438_v62 = vsel %vm1426_vm10, %v4813_v48, 0.0  ;;  %v1475_v11 = vmul.f32 %v4813_v48, %v4813_v48 }
 0x170   : > { %v1439_v10 = vadd.f32 %v1438_v62, %v1437_v3 }
 0x171   : > { %v1496_v34 = vsel %vm1426_vm10, %v1475_v11, 0.0 }
 0x172   : > { %v1497_v51 = vadd.f32 %v1496_v34, %v1495_v40 }
 0x174   : > { %v1403_v16 = vpop.f32.mrf.mxu2 }
 0x175   : > { %v4827_v57 = vadd.f32 %v4759_v21, %v1403_v16 }
 0x177   : > { %v1440_v5 = vsel %vm1426_vm10, %v4827_v57, 0.0 }
 0x17c   : > { %v1406_v17 = vpop.f32.mrf.mxu2 }
 0x17d   : > { %v4821_v53 = vadd.f32 %v4759_v21, %v1406_v17  ;;  %v1441_v17 = vadd.f32 %v1440_v5, %v1439_v10 }
 0x17f   : > { %v1477_v4 = vmul.f32 %v4821_v53, %v4821_v53  ;;  %v1448_v12 = vsel %vm1426_vm10, %v4821_v53, 0.0  ;;  %v1442_v41 = vrot.slane %v1441_v17, 4 }
 0x181   : > { %v1443_v59 = vadd.f32 %v1442_v41, %v1441_v17 }
 0x184   : > { %v1408_v18 = vpop.f32.mrf.mxu2 }
 0x185   : > { %v4816_v49 = vadd.f32 %v4759_v21, %v1408_v18  ;;  %v1476_v18 = vmul.f32 %v4827_v57, %v4827_v57 }
 0x187   : > { %v1478_v63 = vmul.f32 %v4816_v49, %v4816_v49  ;;  %v1449_v6 = vsel %vm1426_vm10, %v4816_v49, 0.0  ;;  %v1498_v45 = vsel %vm1426_vm10, %v1476_v18, 0.0 }
 0x188   : > { %v1499_v60 = vadd.f32 %v1498_v45, %v1497_v51  ;;  %v1596_v45 = vld [vmem:[%s5496_s29] sm:$0xff] }
 0x189   : > { %v1507_v13 = vsel %vm1426_vm10, %v1478_v63, 0.0 }
 0x18a   : > { %v1500_v9 = vrot.slane %v1499_v60, 4 }
 0x18c   : > { %v1411_v19 = vpop.f32.mrf.mxu2 }
 0x18d   : > { %v4830_v58 = vadd.f32 %v4759_v21, %v1411_v19  ;;  %v1506_v19 = vsel %vm1426_vm10, %v1477_v4, 0.0 }
 0x18e   : > { %v1508_v32 = vadd.f32 %v1507_v13, %v1506_v19 }
 0x18f   : > { %v1479_v7 = vmul.f32 %v4830_v58, %v4830_v58  ;;  %v1451_v14 = vsel %vm1426_vm10, %v4830_v58, 0.0 }
 0x191   : > { %v1509_v26 = vsel %vm1426_vm10, %v1479_v7, 0.0  ;;  %v1444_v7 = vrot.slane %v1443_v59, 2 }
 0x192   : > { %v1510_v43 = vadd.f32 %v1509_v26, %v1508_v32 }
 0x193   : > { %v1445_v18 = vadd.f32 %v1444_v7, %v1443_v59  ;;  %v4378_v7 = vld [vmem:[%s5498_s0] ss:$0 sm:$0xff] }
 0x194   : > { %v1413_v20 = vpop.f32.mrf.mxu2 }
 0x195   : > { %v4839_v0 = vadd.f32 %v4759_v21, %v1413_v20  ;;  %v1450_v20 = vadd.f32 %v1449_v6, %v1448_v12 }
 0x197   : > { %v1480_v15 = vmul.f32 %v4839_v0, %v4839_v0  ;;  %v1453_v27 = vsel %vm1426_vm10, %v4839_v0, 0.0  ;;  %v1452_v33 = vadd.f32 %v1451_v14, %v1450_v20 }
 0x199   : > { %v1511_v37 = vsel %vm1426_vm10, %v1480_v15, 0.0  ;;  %v1454_v44 = vadd.f32 %v1453_v27, %v1452_v33  ;;  %v1501_v15 = vadd.f32 %v1500_v9, %v1499_v60 }
 0x19a   : > { %v1512_v52 = vadd.f32 %v1511_v37, %v1510_v43 }
 0x19b   : > { %v1502_v27 = vrot.slane %v1501_v15, 2 }
 0x19c   : > { %v1416_v25 = vpop.f32.mrf.mxu2 }
 0x19d   : > { %v4851_v8 = vadd.f32 %v4759_v21, %v1416_v25  ;;  %v1503_v37 = vadd.f32 %v1502_v27, %v1501_v15 }
 0x19f   : > { %v1481_v29 = vmul.f32 %v4851_v8, %v4851_v8  ;;  %v1455_v38 = vsel %vm1426_vm10, %v4851_v8, 0.0  ;;  %v1504_v40 = vrot.slane %v1503_v37, 1 }
 0x1a1   : > { %v1513_v46 = vsel %vm1426_vm10, %v1481_v29, 0.0  ;;  %v1505_v43 = vadd.f32 %v1504_v40, %v1503_v37 }
 0x1a2   : > { %v1514_v61 = vadd.f32 %v1513_v46, %v1512_v52 }
 0x1a4   : > { %v1418_v54 = vpop.f32.mrf.mxu2 }
 0x1a5   : > { %v4864_v16 = vadd.f32 %v4759_v21, %v1418_v54  ;;  %v1456_v54 = vadd.f32 %v1455_v38, %v1454_v44 }
 0x1a7   : > { %v1482_v39 = vmul.f32 %v4864_v16, %v4864_v16  ;;  %v1457_v47 = vsel %vm1426_vm10, %v4864_v16, 0.0 }
 0x1a8   : > { %v1458_v62 = vadd.f32 %v1457_v47, %v1456_v54 }
 0x1a9   : > { %v1515_v55 = vsel %vm1426_vm10, %v1482_v39, 0.0 }
 0x1aa   : > { %v1516_v3 = vadd.f32 %v1515_v55, %v1514_v61 }
 0x1ac   : > { %v1421_v25 = vpop.f32.mrf.mxu2 }
 0x1ad   : > { %v4875_v30 = vadd.f32 %v4759_v21, %v1421_v25  ;;  %v1446_v25 = vrot.slane %v1445_v18, 1 }
 0x1af   : > { %v1483_v50 = vmul.f32 %v4875_v30, %v4875_v30  ;;  %v1459_v56 = vsel %vm1426_vm10, %v4875_v30, 0.0  ;;  %v1447_v33 = vadd.f32 %v1446_v25, %v1445_v18 }
 0x1b0   : > { %v1460_v4 = vadd.f32 %v1459_v56, %v1458_v62 }
 0x1b1   : > { %v1517_v1 = vsel %vm1426_vm10, %v1483_v50, 0.0 }
 0x1b2   : > { %v1518_v10 = vadd.f32 %v1517_v1, %v1516_v3 }
 0x1b4   : > { %v1423_v63 = vpop.f32.mrf.mxu2 }
 0x1b5   : > { %v4894_v2 = vadd.f32 %v4759_v21, %v1423_v63 }
 0x1b7   : > { %v1461_v5 = vsel %vm1426_vm10, %v4894_v2, 0.0  ;;  %v1484_v6 = vmul.f32 %v4894_v2, %v4894_v2 }
 0x1b8   : > { %v1462_v11 = vadd.f32 %v1461_v5, %v1460_v4  ;;  %v4377_v4 = vld [vmem:[%s5497_s4] ss:$0 sm:$0xff]  ;;  %s5501_s4 = sld [smem:[#allocation10_spill]] }
 0x1b9   : > { %v1519_v12 = vsel %vm1426_vm10, %v1484_v6, 0.0 }
 0x1ba   : > { %v1463_v13 = vrot.slane %v1462_v11, 4  ;;  %v1520_v14 = vadd.f32 %v1519_v12, %v1518_v10 }
 0x1bc   : > { %v1464_v17 = vadd.f32 %v1463_v13, %v1462_v11  ;;  %v1521_v21 = vrot.slane %v1520_v14, 4 }
 0x1be   : > { %v1465_v19 = vrot.slane %v1464_v17, 2  ;;  %v1522_v20 = vadd.f32 %v1521_v21, %v1520_v14  ;;  %s982_s5 = scalar_lea.vmem %s5501_s4, %s5513_s9 }
 0x1c0   : > { %v1466_v26 = vadd.f32 %v1465_v19, %v1464_v17  ;;  %v1523_v29 = vrot.slane %v1522_v20, 2 }
 0x1c2   : > { %v1467_v31 = vrot.slane %v1466_v26, 1  ;;  %v1524_v32 = vadd.f32 %v1523_v29, %v1522_v20 }
 0x1c4   : > { %v1468_v34 = vadd.f32 %v1467_v31, %v1466_v26  ;;  %v1525_v39 = vrot.slane %v1524_v32, 1 }
 0x1c6   : > { %v1533_v38 = vsel %vm1023_vm11, %v1468_v34, %v1447_v33  ;;  %v1526_v41 = vadd.f32 %v1525_v39, %v1524_v32 }
 0x1c7   : > { %3721 = vmatmul.msk.f32.vlgmr.msra.gmra.mxu3 %vm1426_vm10, %v1533_v38 }
 0x1c8   : > { %v1558_v44 = vsel %vm1023_vm11, %v1526_v41, %v1505_v43  ;;  %1616 = vmatpush.msra.mxu3 %v1596_v45 }
 0x1cf   : > { %3722 = vmatmul.msk.f32.vlgmr.msrb.gmra.mxu3 %vm1426_vm10, %v1558_v44 }
 0x1d0   : > { %1639 = vmatpush.msrb.mxu3 %v1596_v45 }
 0x24a   : > { %v1553_v46 = vpop.f32.mrf.mxu3 }
 0x24b   : > { %v1581_v47 = vmul.f32 0.00390625, %v1553_v46 }
 0x24d   : > { %3723 = vmatmul.msk.f32.vlgmr.msra.gmra.mxu3 %vm1597_vm12, %v1581_v47  ;;  %v1583_v51 = vmul.f32 %v1581_v47, %v1581_v47 }
 0x252   : > { %v1578_v50 = vpop.f32.mrf.mxu3 }
 0x253   : > { %v1582_v52 = vmul.f32 0.00390625, %v1578_v50 }
 0x255   : > { %v1584_v54 = vsub.f32 %v1582_v52, %v1583_v51 }
 0x257   : > { %v1585_v55 = vadd.f32 1e-05, %v1584_v54 }
 0x259   : > { %4388 = vrsqrt.f32 %v1585_v55  ;;  %vm1592_vm14 = vweird.f32 %v1585_v55 }
 0x25f   : > { %v4389_v56 = vpop.eup %4388 }
 0x260   : > { %v1587_v59 = vmul.f32 %v4389_v56, %v1585_v55  ;;  %vm1593_vm13 = vweird.f32 %v4389_v56  ;;  %v4202_v55 = vld [vmem:[%s5499_s24 + $0x28] sm:$0xff] }
 0x261   : > { %vm1594_vm15 = vmor %vm1592_vm14, %vm1593_vm13 }
 0x262   : > { %v1588_v60 = vmul.f32 %v4389_v56, %v1587_v59 }
 0x264   : > { %v1589_v61 = vmul.f32 0.5, %v1588_v60 }
 0x266   : > { %v1590_v62 = vsub.f32 1.5, %v1589_v61 }
 0x268   : > { %v1591_v63 = vmul.f32 %v4389_v56, %v1590_v62 }
 0x26a   : > { %v1595_v1 = vsel %vm1594_vm15, %v4389_v56, %v1591_v63 }
 0x26b   : > { %3724 = vmatmul.msk.f32.vlgmr.msrb.gmra.mxu3 %vm1597_vm12, %v1595_v1 }
 0x2d0   : > { %v1618_v3 = vpop.f32.mrf.mxu3 }
 0x2ee   : > { %v1641_v5 = vpop.f32.mrf.mxu3 }
 0x2ef   : > { %v1648_v6 = vmul.f32 %v4377_v4, %v1641_v5 }
 0x2f1   : > { %v1650_v9 = vmul.f32 %v1648_v6, %v1618_v3  ;;  %v1656_v10 = vrot.slane %v1648_v6, 1  ;;  %v1657_v11 = vperm.slane %v1648_v6, 0 }
 0x2f3   : > { %v1654_v12 = vsub.f32 %v4378_v7, %v1650_v9  ;;  %v4916_v13 = vperm.slane %v1656_v10, 0  ;;  %v1665_v14 = vmul.f32 %v1657_v11, %v4792_v36  ;;  %v1666_v15 = vmul.f32 %v1657_v11, %v4803_v42 }
 0x2f4   : > { %v1663_v17 = vmul.f32 %v1657_v11, %v4768_v24  ;;  %v1664_v21 = vmul.f32 %v1657_v11, %v4775_v28  ;;  %v1661_v18 = vmul.f32 %v1657_v11, %v4765_v23  ;;  %v1662_v19 = vmul.f32 %v1657_v11, %v4762_v22 }
 0x2f5   : > { %v1678_v20 = vrot.slane %v1654_v12, 1  ;;  %v1679_v25 = vperm.slane %v1654_v12, 0  ;;  %v1667_v26 = vmul.f32 %v1657_v11, %v4813_v48  ;;  %v1668_v27 = vmul.f32 %v1657_v11, %v4827_v57  ;;  %v4201_v12 = vld [vmem:[%s5499_s24 + $0x20] sm:$0xff] }
 0x2f6   : > { %v1671_v29 = vmul.f32 %v4916_v13, %v4830_v58  ;;  %v1672_v36 = vmul.f32 %v4916_v13, %v4839_v0  ;;  %v1669_v24 = vmul.f32 %v4916_v13, %v4821_v53  ;;  %v4934_v23 = vmul.f32 %v4916_v13, %v4816_v49  ;;  %v4204_v58 = vld [vmem:[%s5499_s24 + $0x38] sm:$0xff]  ;;  %v4203_v53 = vld [vmem:[%s5499_s24 + $0x30] sm:$0xff] }
 0x2f7   : > { %v4936_v22 = vperm.slane %v1678_v20, 0  ;;  %v1687_v28 = vadd.f32 %v1679_v25, %v1665_v14  ;;  %v1688_v42 = vadd.f32 %v1679_v25, %v1666_v15  ;;  %v1685_v48 = vadd.f32 %v1679_v25, %v1663_v17  ;;  %1075 = vmatpush.bf16.msra.mxu0 %v4204_v58 }
 0x2f8   : > { %v1686_v31 = vadd.f32 %v1679_v25, %v1664_v21  ;;  %v1683_v57 = vadd.f32 %v1679_v25, %v1661_v18  ;;  %v1684_v32 = vadd.f32 %v1679_v25, %v1662_v19  ;;  %v1689_v33 = vadd.f32 %v1679_v25, %v1667_v26 }
 0x2f9   : > { %vm1703_vm0 = vcmp.gt.f32.partialorder %v1687_v28, 0.0  ;;  %vm1704_vm1 = vcmp.gt.f32.partialorder %v1688_v42, 0.0  ;;  %v1719_v49 = vmul.f32 0.2, %v1687_v28  ;;  %v1720_v0 = vmul.f32 0.2, %v1688_v42 }
 0x2fa   : > { %vm1701_vm2 = vcmp.gt.f32.partialorder %v1685_v48, 0.0  ;;  %vm1702_vm3 = vcmp.gt.f32.partialorder %v1686_v31, 0.0  ;;  %v1717_v34 = vmul.f32 0.2, %v1685_v48  ;;  %v1718_v37 = vmul.f32 0.2, %v1686_v31 }
 0x2fb   : > { %v1735_v38 = vsel %vm1703_vm0, %v1687_v28, %v1719_v49  ;;  %v1736_v39 = vsel %vm1704_vm1, %v1688_v42, %v1720_v0  ;;  %vm1699_vm4 = vcmp.gt.f32.partialorder %v1683_v57, 0.0  ;;  %vm1700_vm5 = vcmp.gt.f32.partialorder %v1684_v32, 0.0  ;;  %1076 = vmatpush.bf16.msra.mxu0 %v4203_v53  ;;  %v4200_v28 = vld [vmem:[%s5499_s24 + $0x18] sm:$0xff] }
 0x2fc   : > { %v1751_v40 = vpack.c.bf16 %v1735_v38, %v1735_v38  ;;  %v1752_v41 = vpack.c.bf16 %v1736_v39, %v1736_v39  ;;  %v1733_v43 = vsel %vm1701_vm2, %v1685_v48, %v1717_v34  ;;  %v1734_v44 = vsel %vm1702_vm3, %v1686_v31, %v1718_v37 }
 0x2fd   : > { %v1749_v45 = vpack.c.bf16 %v1733_v43, %v1733_v43  ;;  %v1750_v46 = vpack.c.bf16 %v1734_v44, %v1734_v44  ;;  %v1715_v47 = vmul.f32 0.2, %v1683_v57  ;;  %v1716_v50 = vmul.f32 0.2, %v1684_v32 }
 0x2fe   : > { %v1834_v51 = vunpack.c.l.b16 %v1751_v40  ;;  %v1835_v52 = vunpack.c.l.b16 %v1752_v41  ;;  %v1690_v54 = vadd.f32 %v1679_v25, %v1668_v27  ;;  %vm1705_vm7 = vcmp.gt.f32.partialorder %v1689_v33, 0.0 }
 0x2ff   : > { %v1809_v56 = vunpack.c.l.b16 %v1749_v45  ;;  %v1810_v59 = vunpack.c.l.b16 %v1750_v46  ;;  %v1731_v60 = vsel %vm1699_vm4, %v1683_v57, %v1715_v47  ;;  %v1732_v61 = vsel %vm1700_vm5, %v1684_v32, %v1716_v50  ;;  %1077 = vmatpush.bf16.msra.mxu0 %v4202_v55 }
 0x300   : > { %v1838_v62 = vpack.c.b16 %v1835_v52, %v1834_v51  ;;  %v1747_v63 = vpack.c.bf16 %v1731_v60, %v1731_v60  ;;  %v1748_v1 = vpack.c.bf16 %v1732_v61, %v1732_v61  ;;  %vm1706_vm8 = vcmp.gt.f32.partialorder %v1690_v54, 0.0 }
 0x301   : > { %v4949_v3 = vpack.c.b16 %v1810_v59, %v1809_v56  ;;  %v1721_v4 = vmul.f32 0.2, %v1689_v33  ;;  %v1722_v5 = vmul.f32 0.2, %v1690_v54  ;;  %v1693_v6 = vadd.f32 %v4936_v22, %v1671_v29 }
 0x302   : > { %1840 = vrot.lane.b32.xlu0 %v1838_v62, %s4461_s6  ;;  %v1795_v7 = vunpack.c.l.b16 %v1747_v63  ;;  %v1796_v9 = vunpack.c.l.b16 %v1748_v1  ;;  %v1694_v10 = vadd.f32 %v4936_v22, %v1672_v36  ;;  %v1691_v11 = vadd.f32 %v4936_v22, %v1669_v24  ;;  %v4197_v63 = vld [vmem:[%s5499_s24] sm:$0xff] }
 0x303   : > { %1815 = vrot.lane.b32.xlu2 %v4949_v3, %s4462_s7  ;;  %v1737_v14 = vsel %vm1705_vm7, %v1689_v33, %v1721_v4  ;;  %v1738_v15 = vsel %vm1706_vm8, %v1690_v54, %v1722_v5  ;;  %vm1709_vm9 = vcmp.gt.f32.partialorder %v1693_v6, 0.0  ;;  %v1725_v17 = vmul.f32 0.2, %v1693_v6  ;;  %1078 = vmatpush.bf16.msra.mxu0 %v4201_v12 }
 0x304   : > { %v1799_v21 = vpack.c.b16 %v1796_v9, %v1795_v7  ;;  %v1753_v18 = vpack.c.bf16 %v1737_v14, %v1737_v14  ;;  %v1754_v19 = vpack.c.bf16 %v1738_v15, %v1738_v15  ;;  %vm1710_vm12 = vcmp.gt.f32.partialorder %v1694_v10, 0.0  ;;  %v990_v7 = vld [vmem:[%s982_s5] sm:$0x1]  ;;  %v4226_v9 = vld [vmem:[%s5502_s1 + $0x28] sm:$0xff] }
 0x305   : > { %v1726_v20 = vmul.f32 0.2, %v1694_v10  ;;  %v1741_v25 = vsel %vm1709_vm9, %v1693_v6, %v1725_v17  ;;  %v1692_v26 = vadd.f32 %v4936_v22, %v4934_v23  ;;  %vm1707_vm13 = vcmp.gt.f32.partialorder %v1691_v11, 0.0  ;;  %1013 = vst [vmem:[#allocation1] ss:$9 sm:$0xff] %v990_v7  ;;  %v4225_v17 = vld [vmem:[%s5502_s1 + $0x20] sm:$0xff] }
 0x306   : > { %1801 = vrot.lane.b32.xlu1 %v1799_v21, %s4461_s6  ;;  %v1767_v27 = vunpack.c.l.b16 %v1753_v18  ;;  %v1768_v29 = vunpack.c.l.b16 %v1754_v19  ;;  %v1757_v36 = vpack.c.bf16 %v1741_v25, %v1741_v25  ;;  %v1723_v24 = vmul.f32 0.2, %v1691_v11  ;;  %v4224_v18 = vld [vmem:[%s5502_s1 + $0x18] sm:$0xff]  ;;  %v4223_v25 = vld [vmem:[%s5502_s1 + $0x10] sm:$0xff] }
 0x307   : > { %v1742_v42 = vsel %vm1710_vm12, %v1694_v10, %v1726_v20  ;;  %vm1708_vm14 = vcmp.gt.f32.partialorder %v1692_v26, 0.0  ;;  %v1724_v48 = vmul.f32 0.2, %v1692_v26  ;;  %v1673_v31 = vmul.f32 %v4916_v13, %v4851_v8  ;;  %1079 = vmatpush.bf16.msra.mxu0 %v4200_v28  ;;  %v991_v10 = vld [vmem:[%s982_s5 + $0x1] sm:$0x1] }
 0x308   : > { %v4970_v57 = vpack.c.b16 %v1768_v29, %v1767_v27  ;;  %v1758_v23 = vpack.c.bf16 %v1742_v42, %v1742_v42  ;;  %v1811_v32 = vunpack.c.l.b16 %v1757_v36  ;;  %v1739_v33 = vsel %vm1707_vm13, %v1691_v11, %v1723_v24  ;;  %v4221_v27 = vld [vmem:[%s5502_s1] sm:$0xff] }
 0x309   : > { %v1740_v58 = vsel %vm1708_vm14, %v1692_v26, %v1724_v48  ;;  %v1755_v53 = vpack.c.bf16 %v1739_v33, %v1739_v33  ;;  %v1674_v49 = vmul.f32 %v4916_v13, %v4864_v16  ;;  %v1695_v0 = vadd.f32 %v4936_v22, %v1673_v31  ;;  %v4199_v16 = vld [vmem:[%s5499_s24 + $0x10] sm:$0xff]  ;;  %v4222_v26 = vld [vmem:[%s5502_s1 + $0x8] sm:$0xff] }
 0x30a   : > { %v1812_v34 = vunpack.c.l.b16 %v1758_v23  ;;  %v1756_v37 = vpack.c.bf16 %v1740_v58, %v1740_v58  ;;  %v1675_v38 = vmul.f32 %v4916_v13, %v4875_v30  ;;  %v1676_v8 = vmul.f32 %v4916_v13, %v4894_v2 }
 0x30b   : > { %v1797_v39 = vunpack.c.l.b16 %v1755_v53  ;;  %v1696_v40 = vadd.f32 %v4936_v22, %v1674_v49  ;;  %vm1711_vm15 = vcmp.gt.f32.partialorder %v1695_v0, 0.0  ;;  %v1727_v41 = vmul.f32 0.2, %v1695_v0  ;;  %1080 = vmatpush.bf16.msra.mxu0 %v4199_v16  ;;  %v4212_v49 = vld [vmem:[%s5503_s3 + $0x38] sm:$0xff] }
 0x30c   : > { %v4983_v43 = vpack.c.b16 %v1812_v34, %v1811_v32  ;;  %v1798_v44 = vunpack.c.l.b16 %v1756_v37  ;;  %v1697_v45 = vadd.f32 %v4936_v22, %v1675_v38  ;;  %v1698_v30 = vadd.f32 %v4936_v22, %v1676_v8  ;;  %v4198_v22 = vld [vmem:[%s5499_s24 + $0x8] sm:$0xff]  ;;  %v1014_v11 = vld [vmem:[#allocation1] sm:$0xf]  ;;  %1160 = vmatpush.bf16.msra.mxu1 %v4212_v49 }
 0x30d   : > { %vm1712_vm0 = vcmp.gt.f32.partialorder %v1696_v40, 0.0  ;;  %v1728_v46 = vmul.f32 0.2, %v1696_v40  ;;  %v1743_v2 = vsel %vm1711_vm15, %v1695_v0, %v1727_v41  ;;  %1017 = vst [vmem:[#allocation1] ss:$9 sm:$0xff] %v991_v10  ;;  %v1020_v14 = vunpack.c.l.b16 %v1014_v11  ;;  %v2015_v10 = vld [vmem:[%s5447_s16 + $0x38] sm:$0xff] }
 0x30e   : > { %1844 = vrot.lane.b32.xlu1 %v4970_v57, %s4462_s7  ;;  %1817 = vrot.lane.b32.xlu0 %v4983_v43, %s4462_s7  ;;  %v1800_v13 = vpack.c.b16 %v1798_v44, %v1797_v39  ;;  %v1759_v47 = vpack.c.bf16 %v1743_v2, %v1743_v2  ;;  %vm1713_vm1 = vcmp.gt.f32.partialorder %v1697_v45, 0.0  ;;  %vm1714_vm2 = vcmp.gt.f32.partialorder %v1698_v30, 0.0  ;;  %v2014_v11 = vld [vmem:[%s5447_s16 + $0x30] sm:$0xff] }
 0x30f   : > { %v1744_v50 = vsel %vm1712_vm0, %v1696_v40, %v1728_v46  ;;  %v1729_v51 = vmul.f32 0.2, %v1697_v45  ;;  %v1730_v52 = vmul.f32 0.2, %v1698_v30  ;;  %1081 = vmatpush.bf16.msra.mxu0 %v4198_v22  ;;  %v1774_v29 = vshrl.u32 %v4970_v57, 16  ;;  %2054 = vmatpush.msra.mxu3 %v2015_v10 }
 0x310   : > { %1803 = vrot.lane.b32.xlu2 %v1800_v13, %s4461_s6  ;;  %v1760_v54 = vpack.c.bf16 %v1744_v50, %v1744_v50  ;;  %v1836_v55 = vunpack.c.l.b16 %v1759_v47  ;;  %v1777_v24 = vshll.u32 %v4970_v57, 16  ;;  %vm1825_vm3 = vcmask 523264   ;;  %v4379_v22 = vld [vmem:[%s5505_s2] ss:$0 sm:$0xff] }
 0x311   : > { %v1745_v56 = vsel %vm1713_vm1, %v1697_v45, %v1729_v51  ;;  %v1746_v59 = vsel %vm1714_vm2, %v1698_v30, %v1730_v52  ;;  %v1776_v36 = vrot.slane %v1774_v29, 7  ;;  %vm1910_vm4 = vcmask 785408   ;;  %2055 = vmatpush.msra.mxu3 %v2014_v11 }
 0x312   : > { %v1837_v60 = vunpack.c.l.b16 %v1760_v54  ;;  %v1761_v61 = vpack.c.bf16 %v1745_v56, %v1745_v56  ;;  %v1762_v62 = vpack.c.bf16 %v1746_v59, %v1746_v59  ;;  %vm2083_vm7 = vcmask 130048  }
 0x313   : > { %1082 = vmatpush.bf16.msra.mxu0 %v4197_v63  ;;  %v1779_v28 = vor.u32 %v1777_v24, %v1776_v36  ;;  %v2011_v24 = vld [vmem:[%s5447_s16 + $0x18] sm:$0xff] }
 0x314   : > { %v1839_v1 = vpack.c.b16 %v1837_v60, %v1836_v55  ;;  %v1769_v4 = vunpack.c.l.b16 %v1761_v61  ;;  %v1770_v5 = vunpack.c.l.b16 %v1762_v62  ;;  %v1018_v12 = vld [vmem:[#allocation1] sm:$0xf] }
 0x315   : > { %v1021_v15 = vunpack.c.l.b16 %v1018_v12  ;;  %v1789_v42 = vsel %vm4719_vm6, 0, %v1779_v28 }
 0x316   : > { %1842 = vrot.lane.b32.xlu1 %v1839_v1, %s4461_s6  ;;  %v1772_v6 = vpack.c.b16 %v1770_v5, %v1769_v4  ;;  %s5504_s6 = smov %s5503_s3  ;;  %v5077_v5 = vld [vmem:[%s5444_s13] ss:$0 sm:$0xff] }
 0x317   : > { %1921 = vmatpush.bf16.msrb.mxu0 %v4226_v9  ;;  %v1022_v21 = vrot.slane %v1021_v15, 7  ;;  %v4211_v34 = vld [vmem:[%s5504_s6 + $0x30] sm:$0xff]  ;;  %v4209_v39 = vld [vmem:[%s5504_s6 + $0x20] sm:$0xff]  ;;  %v4208_v45 = vld [vmem:[%s5504_s6 + $0x18] sm:$0xff] }
 0x318   : > { %1846 = vrot.lane.b32.xlu2 %v1772_v6, %s4462_s7  ;;  %v1781_v0 = vshrl.u32 %v1772_v6, 16  ;;  %1161 = vmatpush.bf16.msra.mxu1 %v4211_v34  ;;  %v1784_v38 = vshll.u32 %v1772_v6, 16  ;;  %v4207_v46 = vld [vmem:[%s5504_s6 + $0x10] sm:$0xff]  ;;  %v4206_v51 = vld [vmem:[%s5504_s6 + $0x8] sm:$0xff]  ;;  %v4205_v52 = vld [vmem:[%s5504_s6] sm:$0xff] }
 0x319   : > { %v1024_v19 = vsel %vm1023_vm11, %v1022_v21, %v1020_v14 }
 0x31a   : > { %v1025_v20 = vpack.c.b16 %v1024_v19, %v1024_v19  ;;  %v1783_v37 = vrot.slane %v1781_v0, 7  ;;  %v2009_v0 = vld [vmem:[%s5447_s16 + $0x8] sm:$0xff] }
 0x31b   : > { %1922 = vmatpush.bf16.msrb.mxu0 %v4225_v17  ;;  %v2013_v17 = vld [vmem:[%s5447_s16 + $0x28] sm:$0xff] }
 0x31c   : > { %1083 = vmatmul.bf16.vlgmr.msra.gmra.mxu0 %v1025_v20  ;;  %v1786_v8 = vor.u32 %v1784_v38, %v1783_v37  ;;  %v2012_v20 = vld [vmem:[%s5447_s16 + $0x20] sm:$0xff]  ;;  %2056 = vmatpush.msra.mxu3 %v2013_v17 }
 0x31d   : > { %v2008_v38 = vld [vmem:[%s5447_s16] sm:$0xff] }
 0x31e   : > { %v1790_v16 = vsel %vm4719_vm6, 0, %v1786_v8  ;;  %2057 = vmatpush.msra.mxu3 %v2012_v20 }
 0x31f   : > { %1923 = vmatpush.bf16.msrb.mxu0 %v4224_v18 }
 0x320   : > { %2058 = vmatpush.msra.mxu3 %v2011_v24 }
 0x323   : > { %1924 = vmatpush.bf16.msrb.mxu0 %v4223_v25 }
 0x327   : > { %1925 = vmatpush.bf16.msrb.mxu0 %v4222_v26 }
 0x32b   : > { %1926 = vmatpush.bf16.msrb.mxu0 %v4221_v27 }
 0x35d   : > { %v1816_v31 = vpop.permute.xlu2 %1815 }
 0x36a   : > { %v1804_v40 = vpop.permute.xlu2 %1803 }
 0x36b   : > { %v1824_v44 = vsel %vm1426_vm10, %v1790_v16, %v1804_v40 }
 0x372   : > { %v1847_v47 = vpop.permute.xlu2 %1846 }
 0x374   : > { %v1841_v33 = vpop.permute.xlu0 %1840 }
 0x375   : > { %v1850_v53 = vsel %vm1426_vm10, %v4949_v3, %v1841_v33  ;;  %v4210_v3 = vld [vmem:[%s5504_s6 + $0x28] sm:$0xff] }
 0x376   : > { %1162 = vmatpush.bf16.msra.mxu1 %v4210_v3 }
 0x378   : > { %v1802_v48 = vpop.permute.xlu1 %1801 }
 0x379   : > { %v1821_v23 = vsel %vm1426_vm10, %v1789_v42, %v1802_v48 }
 0x37a   : > { %v1827_v32 = vsel %vm1825_vm3, %v1821_v23, %v1816_v31  ;;  %1163 = vmatpush.bf16.msra.mxu1 %v4209_v39 }
 0x37b   : > { %3749 = vmatmul.msk.bf16.vlgmr.msrb.gmra.mxu0 %vm1910_vm4, %v1827_v32  ;;  %v2010_v32 = vld [vmem:[%s5447_s16 + $0x10] sm:$0xff] }
 0x37c   : > { %2059 = vmatpush.msra.mxu3 %v2010_v32 }
 0x37e   : > { %1164 = vmatpush.bf16.msra.mxu1 %v4208_v45  ;;  %2060 = vmatpush.msra.mxu3 %v2009_v0 }
 0x380   : > { %v1845_v58 = vpop.permute.xlu1 %1844  ;;  %v1818_v41 = vpop.permute.xlu0 %1817  ;;  %2061 = vmatpush.msra.mxu3 %v2008_v38 }
 0x381   : > { %v1855_v57 = vsel %vm1825_vm3, %v1850_v53, %v1845_v58  ;;  %v1829_v30 = vsel %vm1825_vm3, %v1824_v44, %v1818_v41 }
 0x382   : > { %1165 = vmatpush.bf16.msra.mxu1 %v4207_v46 }
 0x386   : > { %1166 = vmatpush.bf16.msra.mxu1 %v4206_v51 }
 0x388   : > { %v1843_v2 = vpop.permute.xlu1 %1842 }
 0x389   : > { %v1853_v13 = vsel %vm1426_vm10, %v4983_v43, %v1843_v2 }
 0x38a   : > { %v1857_v50 = vsel %vm1825_vm3, %v1853_v13, %v1847_v47  ;;  %1167 = vmatpush.bf16.msra.mxu1 %v4205_v52 }
 0x38b   : > { %3750 = vmatmul.msk.bf16.gmra.mxu0 %vm1910_vm4, %v1855_v57 }
 0x38e   : > { %2029 = vmatpush.msrb.mxu1 %v2015_v10 }
 0x390   : > { %2030 = vmatpush.msrb.mxu1 %v2014_v11 }
 0x392   : > { %2031 = vmatpush.msrb.mxu1 %v2013_v17 }
 0x394   : > { %2032 = vmatpush.msrb.mxu1 %v2012_v20 }
 0x396   : > { %2033 = vmatpush.msrb.mxu1 %v2011_v24 }
 0x398   : > { %2034 = vmatpush.msrb.mxu1 %v2010_v32  ;;  %v2082_v32 = vld [vmem:[%s5448_s17 + $0x8] sm:$0xff] }
 0x399   : > { %v1084_v43 = vpop.f32.mrf.mxu0  ;;  %2124 = vmatpush.msrb.mxu3 %v2082_v32 }
 0x39a   : > { %v1085_v54 = vadd.f32 %v4379_v22, %v1084_v43  ;;  %2035 = vmatpush.msrb.mxu1 %v2009_v0 }
 0x39b   : > { %3751 = vmatmul.msk.bf16.gmra.mxu0 %vm1910_vm4, %v1829_v30 }
 0x39c   : > { %v1089_v55 = vmul.f32 0.2, %v1085_v54  ;;  %vm1088_vm5 = vcmp.gt.f32.partialorder %v1085_v54, 0.0  ;;  %2036 = vmatpush.msrb.mxu1 %v2008_v38 }
 0x39e   : > { %v1090_v56 = vsel %vm1088_vm5, %v1085_v54, %v1089_v55 }
 0x39f   : > { %v1091_v59 = vpack.c.bf16 %v1090_v56, %v1090_v56 }
 0x3a1   : > { %1168 = vmatmul.bf16.vlgmr.msra.gmra.mxu1 %v1091_v59  ;;  %v1086_v60 = vpop.f32.mrf.mxu0 }
 0x3a2   : > { %2101 = vmatpush.msra.mxu1 %v2082_v32 }
 0x3ab   : > { %3752 = vmatmul.msk.bf16.gmra.mxu0 %vm1910_vm4, %v1857_v50 }
 0x3f8   : > { %v1928_v61 = vpop.f32.mrf.mxu0 }
 0x3f9   : > { %v5083_v7 = vadd.f32 %v5077_v5, %v1928_v61 }
 0x3fb   : > { %v1974_v21 = vmul.f32 %v5083_v7, %v5083_v7  ;;  %v1948_v25 = vsel %vm1825_vm3, %v5083_v7, 0.0 }
 0x3fd   : > { %v1982_v28 = vsel %vm1825_vm3, %v1974_v21, 0.0 }
 0x400   : > { %v1930_v62 = vpop.f32.mrf.mxu0 }
 0x401   : > { %v5080_v6 = vadd.f32 %v5077_v5, %v1930_v62 }
 0x403   : > { %v1975_v12 = vmul.f32 %v5080_v6, %v5080_v6  ;;  %v1949_v18 = vsel %vm1825_vm3, %v5080_v6, 0.0 }
 0x404   : > { %v1950_v36 = vadd.f32 %v1949_v18, %v1948_v25 }
 0x405   : > { %v1983_v26 = vsel %vm1825_vm3, %v1975_v12, 0.0 }
 0x406   : > { %v1984_v31 = vadd.f32 %v1983_v26, %v1982_v28 }
 0x408   : > { %v1933_v63 = vpop.f32.mrf.mxu0 }
 0x409   : > { %v5086_v9 = vadd.f32 %v5077_v5, %v1933_v63 }
 0x40b   : > { %v1976_v19 = vmul.f32 %v5086_v9, %v5086_v9  ;;  %v1951_v27 = vsel %vm1825_vm3, %v5086_v9, 0.0 }
 0x40c   : > { %v1952_v23 = vadd.f32 %v1951_v27, %v1950_v36 }
 0x40d   : > { %v1985_v42 = vsel %vm1825_vm3, %v1976_v19, 0.0 }
 0x40e   : > { %v1986_v53 = vadd.f32 %v1985_v42, %v1984_v31 }
 0x410   : > { %v1935_v1 = vpop.f32.mrf.mxu0 }
 0x411   : > { %v5097_v14 = vadd.f32 %v5077_v5, %v1935_v1 }
 0x413   : > { %v1977_v29 = vmul.f32 %v5097_v14, %v5097_v14  ;;  %v1953_v48 = vsel %vm1825_vm3, %v5097_v14, 0.0 }
 0x414   : > { %v1954_v57 = vadd.f32 %v1953_v48, %v1952_v23 }
 0x415   : > { %v1987_v33 = vsel %vm1825_vm3, %v1977_v29, 0.0 }
 0x416   : > { %v1988_v3 = vadd.f32 %v1987_v33, %v1986_v53  ;;  %v1955_v39 = vrot.slane %v1954_v57, 4  ;;  %v2081_v33 = vld [vmem:[%s5448_s17] sm:$0xff] }
 0x417   : > { %2102 = vmatpush.msra.mxu1 %v2081_v33  ;;  %2125 = vmatpush.msrb.mxu3 %v2081_v33 }
 0x418   : > { %v1938_v4 = vpop.f32.mrf.mxu0  ;;  %v1989_v44 = vrot.slane %v1988_v3, 4  ;;  %v1956_v2 = vadd.f32 %v1955_v39, %v1954_v57 }
 0x419   : > { %v5136_v34 = vadd.f32 %v5077_v5, %v1938_v4 }
 0x41a   : > { %v1990_v22 = vadd.f32 %v1989_v44, %v1988_v3  ;;  %v1957_v59 = vrot.slane %v1956_v2, 2 }
 0x41b   : > { %v1978_v40 = vmul.f32 %v5136_v34, %v5136_v34  ;;  %v1961_v45 = vsel %vm1825_vm3, %v5136_v34, 0.0 }
 0x41c   : > { %v1991_v63 = vrot.slane %v1990_v22, 2  ;;  %v1958_v11 = vadd.f32 %v1957_v59, %v1956_v2  ;;  %v4237_v2 = vld [vmem:[%s5449_s18 + $0x50] sm:$0xff] }
 0x41d   : > { %v1995_v50 = vsel %vm1825_vm3, %v1978_v40, 0.0 }
 0x41e   : > { %v1992_v12 = vadd.f32 %v1991_v63, %v1990_v22  ;;  %v1959_v18 = vrot.slane %v1958_v11, 1  ;;  %v5171_v31 = vpop.f32.mrf.mxu1 }
 0x420   : > { %v1940_v15 = vpop.f32.mrf.mxu0  ;;  %v1993_v26 = vrot.slane %v1992_v12, 1  ;;  %v1960_v27 = vadd.f32 %v1959_v18, %v1958_v11 }
 0x421   : > { %v5130_v58 = vadd.f32 %v5077_v5, %v1940_v15 }
 0x422   : > { %v1994_v28 = vadd.f32 %v1993_v26, %v1992_v12 }
 0x423   : > { %v1979_v8 = vmul.f32 %v5130_v58, %v5130_v58  ;;  %v1962_v41 = vsel %vm1825_vm3, %v5130_v58, 0.0 }
 0x424   : > { %v1963_v13 = vadd.f32 %v1962_v41, %v1961_v45 }
 0x425   : > { %v1996_v30 = vsel %vm1825_vm3, %v1979_v8, 0.0 }
 0x426   : > { %v1997_v43 = vadd.f32 %v1996_v30, %v1995_v50  ;;  %v1171_v23 = vpop.f32.mrf.mxu1  ;;  %v4382_v50 = vld [vmem:[%s5445_s14] ss:$0 sm:$0xff] }
 0x428   : > { %v1943_v49 = vpop.f32.mrf.mxu0 }
 0x429   : > { %v5139_v37 = vadd.f32 %v5077_v5, %v1943_v49 }
 0x42b   : > { %v1980_v16 = vmul.f32 %v5139_v37, %v5139_v37  ;;  %v1964_v46 = vsel %vm1825_vm3, %v5139_v37, 0.0 }
 0x42c   : > { %v1965_v54 = vadd.f32 %v1964_v46, %v1963_v13  ;;  %v4238_v46 = vld [vmem:[%s5449_s18 + $0x58] sm:$0xff]  ;;  %v4236_v13 = vld [vmem:[%s5449_s18 + $0x48] sm:$0xff] }
 0x42d   : > { %v1998_v51 = vsel %vm1825_vm3, %v1980_v16, 0.0 }
 0x42e   : > { %v1999_v60 = vadd.f32 %v1998_v51, %v1997_v43  ;;  %v4383_v43 = vld [vmem:[%s5446_s15] ss:$0 sm:$0xff] }
 0x430   : > { %v1945_v47 = vpop.f32.mrf.mxu0 }
 0x431   : > { %v5160_v52 = vadd.f32 %v5077_v5, %v1945_v47  ;;  %v4235_v47 = vld [vmem:[%s5449_s18 + $0x40] sm:$0xff] }
 0x433   : > { %v1966_v55 = vsel %vm1825_vm3, %v5160_v52, 0.0  ;;  %v1981_v56 = vmul.f32 %v5160_v52, %v5160_v52 }
 0x434   : > { %v1967_v61 = vadd.f32 %v1966_v55, %v1965_v54 }
 0x435   : > { %v2000_v62 = vsel %vm1825_vm3, %v1981_v56, 0.0 }
 0x436   : > { %v1968_v1 = vrot.slane %v1967_v61, 4  ;;  %v2001_v4 = vadd.f32 %v2000_v62, %v1999_v60  ;;  %v4234_v60 = vld [vmem:[%s5449_s18 + $0x38] sm:$0xff] }
 0x438   : > { %v1969_v10 = vadd.f32 %v1968_v1, %v1967_v61  ;;  %v2002_v5 = vrot.slane %v2001_v4, 4  ;;  %v4233_v1 = vld [vmem:[%s5449_s18 + $0x30] sm:$0xff] }
 0x43a   : > { %v1970_v15 = vrot.slane %v1969_v10, 2  ;;  %v2003_v17 = vadd.f32 %v2002_v5, %v2001_v4 }
 0x43c   : > { %v2004_v21 = vrot.slane %v2003_v17, 2  ;;  %v1971_v19 = vadd.f32 %v1970_v15, %v1969_v10 }
 0x43e   : > { %v2005_v20 = vadd.f32 %v2004_v21, %v2003_v17  ;;  %v1972_v25 = vrot.slane %v1971_v19, 1 }
 0x440   : > { %v1973_v29 = vadd.f32 %v1972_v25, %v1971_v19  ;;  %v2006_v36 = vrot.slane %v2005_v20, 1 }
 0x442   : > { %v2018_v24 = vsel %vm1023_vm11, %v1973_v29, %v1960_v27  ;;  %v2007_v42 = vadd.f32 %v2006_v36, %v2005_v20 }
 0x443   : > { %3753 = vmatmul.msk.f32.vlgmr.msrb.gmra.mxu1 %vm1825_vm3, %v2018_v24 }
 0x444   : > { %v2043_v48 = vsel %vm1023_vm11, %v2007_v42, %v1994_v28  ;;  %2355 = vmatpush.bf16.msrb.mxu1 %v4234_v60 }
 0x445   : > { %3754 = vmatmul.msk.f32.vlgmr.msra.gmra.mxu3 %vm1825_vm3, %v2043_v48  ;;  %v4231_v48 = vld [vmem:[%s5449_s18 + $0x20] sm:$0xff] }
 0x446   : > { %2378 = vmatpush.bf16.msra.mxu3 %v4238_v46 }
 0x448   : > { %2356 = vmatpush.bf16.msrb.mxu1 %v4233_v1 }
 0x44a   : > { %2379 = vmatpush.bf16.msra.mxu3 %v4237_v2 }
 0x44e   : > { %2380 = vmatpush.bf16.msra.mxu3 %v4236_v13 }
 0x452   : > { %2381 = vmatpush.bf16.msra.mxu3 %v4235_v47 }
 0x4c0   : > { %v2038_v53 = vpop.f32.mrf.mxu1 }
 0x4c1   : > { %v2066_v57 = vmul.f32 0.0078125, %v2038_v53 }
 0x4c3   : > { %3755 = vmatmul.msk.f32.vlgmr.msra.gmra.mxu1 %vm2083_vm7, %v2066_v57  ;;  %v2068_v0 = vmul.f32 %v2066_v57, %v2066_v57 }
 0x4c8   : > { %v2063_v49 = vpop.f32.mrf.mxu3 }
 0x4c9   : > { %v2067_v3 = vmul.f32 0.0078125, %v2063_v49 }
 0x4cb   : > { %v2069_v38 = vsub.f32 %v2067_v3, %v2068_v0 }
 0x4cd   : > { %v2070_v8 = vadd.f32 1e-05, %v2069_v38 }
 0x4cf   : > { %4390 = vrsqrt.f32 %v2070_v8  ;;  %vm2077_vm9 = vweird.f32 %v2070_v8 }
 0x4d5   : > { %v4391_v39 = vpop.eup %4390 }
 0x4d6   : > { %v2072_v40 = vmul.f32 %v4391_v39, %v2070_v8  ;;  %vm2078_vm8 = vweird.f32 %v4391_v39 }
 0x4d7   : > { %vm2079_vm12 = vmor %vm2077_vm9, %vm2078_vm8 }
 0x4d8   : > { %v2073_v41 = vmul.f32 %v4391_v39, %v2072_v40 }
 0x4da   : > { %v2074_v16 = vmul.f32 0.5, %v2073_v41 }
 0x4dc   : > { %v2075_v44 = vsub.f32 1.5, %v2074_v16  ;;  %v4230_v16 = vld [vmem:[%s5449_s18 + $0x18] sm:$0xff] }
 0x4de   : > { %v2076_v45 = vmul.f32 %v4391_v39, %v2075_v44 }
 0x4e0   : > { %v2080_v30 = vsel %vm2079_vm12, %v4391_v39, %v2076_v45 }
 0x4e1   : > { %3756 = vmatmul.msk.f32.vlgmr.msrb.gmra.mxu3 %vm2083_vm7, %v2080_v30 }
 0x540   : > { %v2104_v54 = vpop.f32.mrf.mxu1 }
 0x564   : > { %v2127_v51 = vpop.f32.mrf.mxu3 }
 0x565   : > { %v2134_v22 = vmul.f32 %v4382_v50, %v2127_v51  ;;  %v4229_v50 = vld [vmem:[%s5449_s18 + $0x10] sm:$0xff] }
 0x567   : > { %v2136_v55 = vmul.f32 %v2134_v22, %v2104_v54  ;;  %v2142_v56 = vrot.slane %v2134_v22, 1  ;;  %v2143_v59 = vperm.slane %v2134_v22, 0 }
 0x569   : > { %v2140_v61 = vsub.f32 %v4383_v43, %v2136_v55  ;;  %v2144_v62 = vperm.slane %v2142_v56, 0  ;;  %v2147_v63 = vmul.f32 %v2143_v59, %v5083_v7  ;;  %v2149_v4 = vmul.f32 %v2143_v59, %v5086_v9  ;;  %v4232_v9 = vld [vmem:[%s5449_s18 + $0x28] sm:$0xff] }
 0x56a   : > { %v2150_v10 = vmul.f32 %v2143_v59, %v5097_v14  ;;  %v2148_v12 = vmul.f32 %v2143_v59, %v5080_v6  ;;  %2357 = vmatpush.bf16.msrb.mxu1 %v4232_v9  ;;  %v4228_v56 = vld [vmem:[%s5449_s18 + $0x8] sm:$0xff] }
 0x56b   : > { %v2156_v5 = vrot.slane %v2140_v61, 1  ;;  %v2157_v11 = vperm.slane %v2140_v61, 0  ;;  %v2151_v15 = vmul.f32 %v2144_v62, %v5136_v34  ;;  %v2152_v20 = vmul.f32 %v2144_v62, %v5130_v58  ;;  %v4227_v61 = vld [vmem:[%s5449_s18] sm:$0xff] }
 0x56c   : > { %v2153_v25 = vmul.f32 %v2144_v62, %v5139_v37  ;;  %v2154_v26 = vmul.f32 %v2144_v62, %v5160_v52 }
 0x56d   : > { %v2158_v17 = vperm.slane %v2156_v5, 0  ;;  %v2163_v21 = vadd.f32 %v2157_v11, %v2149_v4  ;;  %v2164_v18 = vadd.f32 %v2157_v11, %v2150_v10  ;;  %v2161_v19 = vadd.f32 %v2157_v11, %v2147_v63 }
 0x56e   : > { %v2162_v7 = vadd.f32 %v2157_v11, %v2148_v12  ;;  %2358 = vmatpush.bf16.msrb.mxu1 %v4231_v48  ;;  %v2428_v48 = vld [vmem:[%s5453_s22 + $0x18] sm:$0xff] }
 0x56f   : > { %vm2171_vm13 = vcmp.gt.f32.partialorder %v2163_v21, 0.0  ;;  %vm2172_vm14 = vcmp.gt.f32.partialorder %v2164_v18, 0.0  ;;  %v2179_v6 = vmul.f32 0.2, %v2163_v21  ;;  %v2180_v14 = vmul.f32 0.2, %v2164_v18 }
 0x570   : > { %vm2169_vm15 = vcmp.gt.f32.partialorder %v2161_v19, 0.0  ;;  %vm2170_vm0 = vcmp.gt.f32.partialorder %v2162_v7, 0.0  ;;  %v2177_v34 = vmul.f32 0.2, %v2161_v19  ;;  %v2178_v27 = vmul.f32 0.2, %v2162_v7 }
 0x571   : > { %v2187_v29 = vsel %vm2171_vm13, %v2163_v21, %v2179_v6  ;;  %v2188_v36 = vsel %vm2172_vm14, %v2164_v18, %v2180_v14  ;;  %v2165_v58 = vadd.f32 %v2158_v17, %v2151_v15  ;;  %v2166_v24 = vadd.f32 %v2158_v17, %v2152_v20  ;;  %v2440_v21 = vld [vmem:[%s5453_s22 + $0x78] sm:$0xff]  ;;  %v2439_v18 = vld [vmem:[%s5453_s22 + $0x70] sm:$0xff]  ;;  %v2437_v6 = vld [vmem:[%s5453_s22 + $0x60] sm:$0xff] }
 0x572   : > { %v2195_v37 = vpack.c.bf16 %v2187_v29, %v2187_v29  ;;  %v2196_v28 = vpack.c.bf16 %v2188_v36, %v2188_v36  ;;  %v2185_v52 = vsel %vm2169_vm15, %v2161_v19, %v2177_v34  ;;  %v2186_v42 = vsel %vm2170_vm0, %v2162_v7, %v2178_v27  ;;  %2359 = vmatpush.bf16.msrb.mxu1 %v4230_v16  ;;  %v2438_v7 = vld [vmem:[%s5453_s22 + $0x68] sm:$0xff]  ;;  %v2436_v14 = vld [vmem:[%s5453_s22 + $0x58] sm:$0xff]  ;;  %v2433_v27 = vld [vmem:[%s5453_s22 + $0x40] sm:$0xff] }
 0x573   : > { %v2193_v23 = vpack.c.bf16 %v2185_v52, %v2185_v52  ;;  %v2194_v32 = vpack.c.bf16 %v2186_v42, %v2186_v42  ;;  %vm2173_vm1 = vcmp.gt.f32.partialorder %v2165_v58, 0.0  ;;  %vm2174_vm2 = vcmp.gt.f32.partialorder %v2166_v24, 0.0  ;;  %2469 = vmatpush.msra.mxu0 %v2440_v21  ;;  %2445 = vmatpush.msrb.mxu3 %v2440_v21  ;;  %v2434_v34 = vld [vmem:[%s5453_s22 + $0x48] sm:$0xff]  ;;  %v2432_v29 = vld [vmem:[%s5453_s22 + $0x38] sm:$0xff]  ;;  %v2429_v52 = vld [vmem:[%s5453_s22 + $0x20] sm:$0xff] }
 0x574   : > { %v2205_v33 = vunpack.c.l.b16 %v2195_v37  ;;  %v2206_v53 = vunpack.c.l.b16 %v2196_v28  ;;  %v2181_v57 = vmul.f32 0.2, %v2165_v58  ;;  %v2182_v49 = vmul.f32 0.2, %v2166_v24  ;;  %v2430_v37 = vld [vmem:[%s5453_s22 + $0x28] sm:$0xff] }
 0x575   : > { %v2233_v0 = vunpack.c.l.b16 %v2193_v23  ;;  %v2234_v3 = vunpack.c.l.b16 %v2194_v32  ;;  %v2167_v38 = vadd.f32 %v2158_v17, %v2153_v25  ;;  %v2168_v8 = vadd.f32 %v2158_v17, %v2154_v26  ;;  %2470 = vmatpush.msra.mxu0 %v2439_v18  ;;  %2446 = vmatpush.msrb.mxu3 %v2439_v18  ;;  %v4384_v28 = vld [vmem:[%s5450_s19] ss:$0 sm:$0xff] }
 0x576   : > { %v2209_v39 = vpack.c.b16 %v2206_v53, %v2205_v33  ;;  %v2189_v40 = vsel %vm2173_vm1, %v2165_v58, %v2181_v57  ;;  %v2190_v41 = vsel %vm2174_vm2, %v2166_v24, %v2182_v49  ;;  %2360 = vmatpush.bf16.msrb.mxu1 %v4229_v50  ;;  %v2431_v24 = vld [vmem:[%s5453_s22 + $0x30] sm:$0xff]  ;;  %v2426_v49 = vld [vmem:[%s5453_s22 + $0x8] sm:$0xff] }
 0x577   : > { %v2237_v44 = vpack.c.b16 %v2234_v3, %v2233_v0  ;;  %v2197_v45 = vpack.c.bf16 %v2189_v40, %v2189_v40  ;;  %v2198_v30 = vpack.c.bf16 %v2190_v41, %v2190_v41  ;;  %vm2175_vm4 = vcmp.gt.f32.partialorder %v2167_v38, 0.0  ;;  %2471 = vmatpush.msra.mxu0 %v2438_v7  ;;  %2447 = vmatpush.msrb.mxu3 %v2438_v7  ;;  %v2427_v53 = vld [vmem:[%s5453_s22 + $0x10] sm:$0xff]  ;;  %v2425_v3 = vld [vmem:[%s5453_s22] sm:$0xff] }
 0x578   : > { %3805 = vmatmul.msk.bf16.vlgmr.msra.gmra.mxu3 %vm1825_vm3, %v2209_v39  ;;  %vm2176_vm5 = vcmp.gt.f32.partialorder %v2168_v8, 0.0  ;;  %v2183_v46 = vmul.f32 0.2, %v2167_v38  ;;  %v2184_v2 = vmul.f32 0.2, %v2168_v8  ;;  %v2212_v63 = vshrl.u32 %v2209_v39, 16 }
 0x579   : > { %2239 = vrot.lane.b32.xlu0 %v2237_v44, %s4462_s7  ;;  %v2235_v13 = vunpack.c.l.b16 %v2197_v45  ;;  %v2236_v47 = vunpack.c.l.b16 %v2198_v30  ;;  %v2215_v4 = vshll.u32 %v2209_v39, 16  ;;  %2472 = vmatpush.msra.mxu0 %v2437_v6 }
 0x57a   : > { %v2191_v22 = vsel %vm2175_vm4, %v2167_v38, %v2183_v46  ;;  %v2192_v43 = vsel %vm2176_vm5, %v2168_v8, %v2184_v2  ;;  %2361 = vmatpush.bf16.msrb.mxu1 %v4228_v56  ;;  %v2214_v1 = vrot.slane %v2212_v63, 7  ;;  %2448 = vmatpush.msrb.mxu3 %v2437_v6  ;;  %v2507_v38 = vld [vmem:[%s5454_s23 + $0x18] sm:$0xff]  ;;  %vm3511_vm4 = vcmask 0  }
 0x57b   : > { %v2238_v51 = vpack.c.b16 %v2236_v47, %v2235_v13  ;;  %v2199_v54 = vpack.c.bf16 %v2191_v22, %v2191_v22  ;;  %v2200_v55 = vpack.c.bf16 %v2192_v43, %v2192_v43  ;;  %2473 = vmatpush.msra.mxu0 %v2436_v14 }
 0x57c   : > { %v2217_v10 = vor.u32 %v2215_v4, %v2214_v1  ;;  %2449 = vmatpush.msrb.mxu3 %v2436_v14 }
 0x57d   : > { %2241 = vrot.lane.b32.xlu1 %v2238_v51, %s4462_s7  ;;  %v2207_v59 = vunpack.c.l.b16 %v2199_v54  ;;  %v2208_v60 = vunpack.c.l.b16 %v2200_v55  ;;  %2474 = vmatpush.msra.mxu0 %v2435_v35  ;;  %s5506_s7 = sld [smem:[#allocation14_spill]] }
 0x57e   : > { %2362 = vmatpush.bf16.msrb.mxu1 %v4227_v61  ;;  %v2227_v5 = vsel %vm4719_vm6, 0, %v2217_v10  ;;  %2450 = vmatpush.msrb.mxu3 %v2435_v35  ;;  %v2506_v35 = vld [vmem:[%s5454_s23 + $0x10] sm:$0xff] }
 0x57f   : > { %v2210_v62 = vpack.c.b16 %v2208_v60, %v2207_v59  ;;  %2475 = vmatpush.msra.mxu0 %v2434_v34 }
 0x580   : > { %2451 = vmatpush.msrb.mxu3 %v2434_v34  ;;  %v2505_v34 = vld [vmem:[%s5454_s23 + $0x8] sm:$0xff] }
 0x581   : > { %v2219_v15 = vshrl.u32 %v2210_v62, 16  ;;  %v2222_v19 = vshll.u32 %v2210_v62, 16  ;;  %2476 = vmatpush.msra.mxu0 %v2433_v27 }
 0x582   : > { %2452 = vmatpush.msrb.mxu3 %v2433_v27  ;;  %2546 = vmatpush.msra.mxu1 %v2507_v38  ;;  %v2504_v27 = vld [vmem:[%s5454_s23] sm:$0xff] }
 0x583   : > { %v2221_v17 = vrot.slane %v2219_v15, 7  ;;  %2477 = vmatpush.msra.mxu0 %v2432_v29 }
 0x584   : > { %2453 = vmatpush.msrb.mxu3 %v2432_v29  ;;  %2547 = vmatpush.msra.mxu1 %v2506_v35  ;;  %v3867_v29 = vld [vmem:[#allocation4 + $0x70] sm:$0xf] }
 0x585   : > { %v2224_v20 = vor.u32 %v2222_v19, %v2221_v17  ;;  %2478 = vmatpush.msra.mxu0 %v2431_v24 }
 0x586   : > { %2454 = vmatpush.msrb.mxu3 %v2431_v24  ;;  %2548 = vmatpush.msra.mxu1 %v2505_v34 }
 0x587   : > { %v2228_v26 = vsel %vm4719_vm6, 0, %v2224_v20  ;;  %2479 = vmatpush.msra.mxu0 %v2430_v37 }
 0x588   : > { %3806 = vmatmul.msk.bf16.gmra.mxu3 %vm1825_vm3, %v2210_v62  ;;  %2549 = vmatpush.msra.mxu1 %v2504_v27 }
 0x589   : > { %2455 = vmatpush.msrb.mxu3 %v2430_v37  ;;  %2480 = vmatpush.msra.mxu0 %v2429_v52  ;;  %v4252_v37 = vld [vmem:[#allocation4 + $0x64] sm:$0xf0] }
 0x58b   : > { %2456 = vmatpush.msrb.mxu3 %v2429_v52  ;;  %2481 = vmatpush.msra.mxu0 %v2428_v48  ;;  %v3851_v52 = vld [vmem:[#allocation4 + $0x50] sm:$0xf] }
 0x58d   : > { %2457 = vmatpush.msrb.mxu3 %v2428_v48  ;;  %2482 = vmatpush.msra.mxu0 %v2427_v53 }
 0x58f   : > { %2458 = vmatpush.msrb.mxu3 %v2427_v53  ;;  %2483 = vmatpush.msra.mxu0 %v2426_v49 }
 0x591   : > { %2459 = vmatpush.msrb.mxu3 %v2426_v49  ;;  %2484 = vmatpush.msra.mxu0 %v2425_v3 }
 0x593   : > { %2460 = vmatpush.msrb.mxu3 %v2425_v3  ;;  %v3843_v3 = vld [vmem:[#allocation4 + $0x40] sm:$0xf] }
 0x595   : > { %2523 = vmatpush.msra.mxu3 %v2507_v38  ;;  %v4248_v38 = vld [vmem:[#allocation4 + $0x44] sm:$0xf0] }
 0x597   : > { %2524 = vmatpush.msra.mxu3 %v2506_v35 }
 0x599   : > { %2525 = vmatpush.msra.mxu3 %v2505_v34  ;;  %v4300_v34 = vld [vmem:[#allocation4 + $0x1e4] sm:$0xf0] }
 0x59b   : > { %2526 = vmatpush.msra.mxu3 %v2504_v27 }
 0x5eb   : > { %v2240_v11 = vpop.permute.xlu0 %2239 }
 0x5ec   : > { %v2245_v12 = vsel %vm1825_vm3, %v2227_v5, %v2240_v11 }
 0x5ed   : > { %2363 = vmatmul.bf16.vlgmr.msrb.gmra.mxu1 %v2245_v12 }
 0x5ef   : > { %v2242_v25 = vpop.permute.xlu1 %2241 }
 0x5f0   : > { %v2249_v9 = vsel %vm1825_vm3, %v2228_v26, %v2242_v25 }
 0x5fb   : > { %v2383_v36 = vpop.f32.mrf.mxu3 }
 0x5fd   : > { %2368 = vmatmul.bf16.gmra.mxu1 %v2249_v9 }
 0x603   : > { %v2385_v42 = vpop.f32.mrf.mxu3 }
 0x60b   : > { %v2388_v39 = vpop.f32.mrf.mxu3 }
 0x613   : > { %v2390_v51 = vpop.f32.mrf.mxu3 }
 0x66a   : > { %v2364_v58 = vpop.f32.mrf.mxu1 }
 0x66b   : > { %v2365_v32 = vadd.f32 %v4384_v28, %v2364_v58  ;;  %v3859_v58 = vld [vmem:[#allocation4 + $0x60] sm:$0xf] }
 0x66d   : > { %v5291_v0 = vadd.f32 %v2383_v36, %v2365_v32  ;;  %v4254_v36 = vld [vmem:[#allocation4 + $0x74] sm:$0xf0] }
 0x66e   : > { %v3868_v24 = vor.u32 %v4254_v36, %v3867_v29  ;;  %v3891_v29 = vld [vmem:[#allocation4 + $0xa0] sm:$0xf]  ;;  %v4260_v36 = vld [vmem:[#allocation4 + $0xa4] sm:$0xf0] }
 0x66f   : > { %v2407_v41 = vmul.f32 %v5291_v0, %v5291_v0 }
 0x670   : > { %3193 = vmatpush.bf16.msrb.mxu2 %v3868_v24  ;;  %v3979_v24 = vld [vmem:[#allocation4 + $0x150] sm:$0xf] }
 0x672   : > { %v2366_v23 = vpop.f32.mrf.mxu1 }
 0x673   : > { %v2367_v33 = vadd.f32 %v4384_v28, %v2366_v23 }
 0x675   : > { %v5286_v57 = vadd.f32 %v2385_v42, %v2367_v33  ;;  %v4250_v42 = vld [vmem:[#allocation4 + $0x54] sm:$0xf0] }
 0x676   : > { %v3852_v33 = vor.u32 %v4250_v42, %v3851_v52  ;;  %v4298_v42 = vld [vmem:[#allocation4 + $0x1d4] sm:$0xf0] }
 0x677   : > { %v2408_v8 = vmul.f32 %v5286_v57, %v5286_v57  ;;  %v2393_v16 = vadd.f32 %v5286_v57, %v5291_v0 }
 0x679   : > { %v2411_v44 = vadd.f32 %v2408_v8, %v2407_v41  ;;  %v2394_v45 = vrot.slane %v2393_v16, 4  ;;  %v3835_v41 = vld [vmem:[#allocation4 + $0x30] sm:$0xf] }
 0x67a   : > { %v2369_v40 = vpop.f32.mrf.mxu1 }
 0x67b   : > { %v2370_v30 = vadd.f32 %v4384_v28, %v2369_v40  ;;  %v2412_v46 = vrot.slane %v2411_v44, 4  ;;  %v2395_v13 = vadd.f32 %v2394_v45, %v2393_v16  ;;  %v4246_v16 = vld [vmem:[#allocation4 + $0x34] sm:$0xf0] }
 0x67d   : > { %v5305_v47 = vadd.f32 %v2388_v39, %v2370_v30  ;;  %v2413_v22 = vadd.f32 %v2412_v46, %v2411_v44  ;;  %v2396_v54 = vrot.slane %v2395_v13, 2  ;;  %v3844_v39 = vor.u32 %v4248_v38, %v3843_v3  ;;  %v3971_v3 = vld [vmem:[#allocation4 + $0x140] sm:$0xf]  ;;  %v4280_v38 = vld [vmem:[#allocation4 + $0x144] sm:$0xf0] }
 0x67e   : > { %v3836_v44 = vor.u32 %v4246_v16, %v3835_v41  ;;  %v4296_v41 = vld [vmem:[#allocation4 + $0x1c4] sm:$0xf0] }
 0x67f   : > { %v2409_v55 = vmul.f32 %v5305_v47, %v5305_v47  ;;  %v2414_v62 = vrot.slane %v2413_v22, 2  ;;  %v2397_v4 = vadd.f32 %v2396_v54, %v2395_v13  ;;  %v4270_v54 = vld [vmem:[#allocation4 + $0xf4] sm:$0xf0] }
 0x681   : > { %v2415_v11 = vadd.f32 %v2414_v62, %v2413_v22  ;;  %v2398_v12 = vrot.slane %v2397_v4, 1  ;;  %v3931_v22 = vld [vmem:[#allocation4 + $0xf0] sm:$0xf] }
 0x682   : > { %v2371_v2 = vpop.f32.mrf.mxu1 }
 0x683   : > { %v2372_v50 = vadd.f32 %v4384_v28, %v2371_v2  ;;  %v2416_v18 = vrot.slane %v2415_v11, 1  ;;  %v2399_v7 = vadd.f32 %v2398_v12, %v2397_v4  ;;  %v3860_v28 = vor.u32 %v4252_v37, %v3859_v58  ;;  %v3995_v4 = vld [vmem:[#allocation4 + $0x170] sm:$0xf]  ;;  %v4282_v37 = vld [vmem:[#allocation4 + $0x154] sm:$0xf0] }
 0x684   : > { %v4059_v12 = vld [vmem:[#allocation4 + $0x1f0] sm:$0xf]  ;;  %v3892_v58 = vor.u32 %v4260_v36, %v3891_v29  ;;  %v3980_v52 = vor.u32 %v4282_v37, %v3979_v24  ;;  %v4314_v36 = vld [vmem:[#allocation4 + $0x254] sm:$0xf0] }
 0x685   : > { %v5307_v43 = vadd.f32 %v2390_v51, %v2372_v50  ;;  %v2417_v9 = vadd.f32 %v2416_v18, %v2415_v11  ;;  %3194 = vmatpush.bf16.msrb.mxu2 %v3860_v28  ;;  %v3907_v18 = vld [vmem:[#allocation4 + $0xc0] sm:$0xf]  ;;  %v4043_v28 = vld [vmem:[#allocation4 + $0x1d0] sm:$0xf] }
 0x686   : > { %v4107_v29 = vld [vmem:[#allocation4 + $0x250] sm:$0xf] }
 0x687   : > { %v2400_v56 = vadd.f32 %v5307_v43, %v5305_v47  ;;  %v2410_v59 = vmul.f32 %v5307_v43, %v5307_v43 }
 0x689   : > { %v2401_v60 = vrot.slane %v2400_v56, 4  ;;  %v2418_v61 = vadd.f32 %v2410_v59, %v2409_v55  ;;  %3195 = vmatpush.bf16.msrb.mxu2 %v3852_v33  ;;  %v3923_v55 = vld [vmem:[#allocation4 + $0xe0] sm:$0xf]  ;;  %v4268_v59 = vld [vmem:[#allocation4 + $0xe4] sm:$0xf0] }
 0x68a   : > { %v3924_v62 = vor.u32 %v4268_v59, %v3923_v55  ;;  %v3883_v33 = vld [vmem:[#allocation4 + $0x90] sm:$0xf]  ;;  %v4294_v55 = vld [vmem:[#allocation4 + $0x1b4] sm:$0xf0]  ;;  %v4385_v59 = vld [vmem:[%s5451_s20] ss:$0 sm:$0xff] }
 0x68b   : > { %v2402_v63 = vadd.f32 %v2401_v60, %v2400_v56  ;;  %v2419_v1 = vrot.slane %v2418_v61, 4  ;;  %v3932_v56 = vor.u32 %v4270_v54, %v3931_v22  ;;  %v3827_v60 = vld [vmem:[#allocation4 + $0x20] sm:$0xf]  ;;  %v4027_v54 = vld [vmem:[#allocation4 + $0x1b0] sm:$0xf] }
 0x68d   : > { %v2403_v10 = vrot.slane %v2402_v63, 2  ;;  %v2420_v5 = vadd.f32 %v2419_v1, %v2418_v61  ;;  %3196 = vmatpush.bf16.msrb.mxu2 %v3844_v39  ;;  %v4244_v61 = vld [vmem:[#allocation4 + $0x24] sm:$0xf0]  ;;  %v3972_v39 = vor.u32 %v4280_v38, %v3971_v3 }
 0x68e   : > { %v3828_v1 = vor.u32 %v4244_v61, %v3827_v60  ;;  %v4028_v60 = vor.u32 %v4294_v55, %v4027_v54  ;;  %v4318_v61 = vld [vmem:[#allocation4 + $0x274] sm:$0xf0] }
 0x68f   : > { %v2404_v15 = vadd.f32 %v2403_v10, %v2402_v63  ;;  %v2421_v17 = vrot.slane %v2420_v5, 2  ;;  %v3915_v63 = vld [vmem:[#allocation4 + $0xd0] sm:$0xf]  ;;  %v4286_v10 = vld [vmem:[#allocation4 + $0x174] sm:$0xf0] }
 0x690   : > { %v3996_v11 = vor.u32 %v4286_v10, %v3995_v4  ;;  %v3955_v10 = vld [vmem:[#allocation4 + $0x120] sm:$0xf] }
 0x691   : > { %v2405_v21 = vrot.slane %v2404_v15, 1  ;;  %v2422_v19 = vadd.f32 %v2421_v17, %v2420_v5  ;;  %3197 = vmatpush.bf16.msrb.mxu2 %v3836_v44  ;;  %v4266_v5 = vld [vmem:[#allocation4 + $0xd4] sm:$0xf0]  ;;  %v3811_v44 = vld [vmem:[#allocation4] sm:$0xf] }
 0x692   : > { %3219 = vmatpush.bf16.msrb.mxu0 %v3996_v11  ;;  %v4019_v11 = vld [vmem:[#allocation4 + $0x1a0] sm:$0xf] }
 0x693   : > { %v2406_v20 = vadd.f32 %v2405_v21, %v2404_v15  ;;  %v2423_v25 = vrot.slane %v2422_v19, 1  ;;  %v4302_v15 = vld [vmem:[#allocation4 + $0x1f4] sm:$0xf0]  ;;  %v3916_v21 = vor.u32 %v4266_v5, %v3915_v63  ;;  %v3869_v63 = vld [vmem:[#allocation4 + $0x78] sm:$0xf0] }
 0x694   : > { %v4060_v17 = vor.u32 %v4302_v15, %v4059_v12  ;;  %v4276_v5 = vld [vmem:[#allocation4 + $0x124] sm:$0xf0] }
 0x695   : > { %v2443_v26 = vsel %vm1023_vm11, %v2406_v20, %v2399_v7  ;;  %v2424_v6 = vadd.f32 %v2423_v25, %v2422_v19  ;;  %3198 = vmatpush.bf16.msrb.mxu2 %v3828_v1  ;;  %v4264_v19 = vld [vmem:[#allocation4 + $0xc4] sm:$0xf0]  ;;  %v3899_v20 = vld [vmem:[#allocation4 + $0xb0] sm:$0xf]  ;;  %v4262_v25 = vld [vmem:[#allocation4 + $0xb4] sm:$0xf0]  ;;  %v3956_v12 = vor.u32 %v4276_v5, %v3955_v10 }
 0x696   : > { %2461 = vmatmul.f32.vlgmr.msrb.gmra.mxu3 %v2443_v26  ;;  %3232 = vmatpush.bf16.msrb.mxu1 %v4060_v17  ;;  %v3908_v7 = vor.u32 %v4264_v19, %v3907_v18  ;;  %v3900_v26 = vor.u32 %v4262_v25, %v3899_v20  ;;  %v4292_v15 = vld [vmem:[#allocation4 + $0x1a4] sm:$0xf0]  ;;  %v4115_v17 = vld [vmem:[#allocation4 + $0x260] sm:$0xf]  ;;  %v3861_v20 = vld [vmem:[#allocation4 + $0x68] sm:$0xf0] }
 0x697   : > { %v2467_v14 = vsel %vm1023_vm11, %v2424_v6, %v2417_v9  ;;  %3206 = vmatpush.bf16.msrb.mxu3 %v3932_v56  ;;  %v3987_v9 = vld [vmem:[#allocation4 + $0x160] sm:$0xf]  ;;  %v4284_v6 = vld [vmem:[#allocation4 + $0x164] sm:$0xf0]  ;;  %v4123_v56 = vld [vmem:[#allocation4 + $0x270] sm:$0xf]  ;;  %v4020_v18 = vor.u32 %v4292_v15, %v4019_v11 }
 0x698   : > { %2485 = vmatmul.f32.vlgmr.msra.gmra.mxu0 %v2467_v14  ;;  %v4051_v14 = vld [vmem:[#allocation4 + $0x1e0] sm:$0xf]  ;;  %v3988_v35 = vor.u32 %v4284_v6, %v3987_v9  ;;  %v4124_v1 = vor.u32 %v4318_v61, %v4123_v56  ;;  %v3947_v25 = vld [vmem:[#allocation4 + $0x110] sm:$0xf]  ;;  %v4274_v6 = vld [vmem:[#allocation4 + $0x114] sm:$0xf0] }
 0x699   : > { %v4052_v27 = vor.u32 %v4300_v34, %v4051_v14  ;;  %v4011_v14 = vld [vmem:[#allocation4 + $0x190] sm:$0xf]  ;;  %v4267_v10 = vld [vmem:[#allocation4 + $0xe4] sm:$0xf] }
 0x69a   : > { %3220 = vmatpush.bf16.msrb.mxu0 %v3988_v35  ;;  %v4290_v35 = vld [vmem:[#allocation4 + $0x194] sm:$0xf0]  ;;  %v4091_v56 = vld [vmem:[#allocation4 + $0x230] sm:$0xf]  ;;  %v4283_v15 = vld [vmem:[#allocation4 + $0x164] sm:$0xf] }
 0x69b   : > { %3207 = vmatpush.bf16.msrb.mxu3 %v3924_v62  ;;  %3233 = vmatpush.bf16.msrb.mxu1 %v4052_v27  ;;  %v4253_v62 = vld [vmem:[#allocation4 + $0x74] sm:$0xf]  ;;  %v3948_v27 = vor.u32 %v4274_v6, %v3947_v25  ;;  %v4012_v37 = vor.u32 %v4290_v35, %v4011_v14 }
 0x69c   : > { %v3872_v4 = vor.u32 %v4253_v62, %v3869_v63  ;;  %v4265_v6 = vld [vmem:[#allocation4 + $0xd4] sm:$0xf] }
 0x69e   : > { %3221 = vmatpush.bf16.msrb.mxu0 %v3980_v52  ;;  %v3939_v52 = vld [vmem:[#allocation4 + $0x100] sm:$0xf] }
 0x69f   : > { %3208 = vmatpush.bf16.msrb.mxu3 %v3916_v21  ;;  %v4316_v21 = vld [vmem:[#allocation4 + $0x264] sm:$0xf0] }
 0x6a0   : > { %v4116_v19 = vor.u32 %v4316_v21, %v4115_v17  ;;  %v3989_v17 = vld [vmem:[#allocation4 + $0x168] sm:$0xf0] }
 0x6a2   : > { %3222 = vmatpush.bf16.msrb.mxu0 %v3972_v39  ;;  %v4312_v39 = vld [vmem:[#allocation4 + $0x244] sm:$0xf0] }
 0x6a3   : > { %3209 = vmatpush.bf16.msrb.mxu3 %v3908_v7  ;;  %v4251_v7 = vld [vmem:[#allocation4 + $0x64] sm:$0xf] }
 0x6a4   : > { %v3864_v9 = vor.u32 %v4251_v7, %v3861_v20  ;;  %v4083_v7 = vld [vmem:[#allocation4 + $0x220] sm:$0xf]  ;;  %v4308_v20 = vld [vmem:[#allocation4 + $0x224] sm:$0xf0] }
 0x6a7   : > { %3210 = vmatpush.bf16.msrb.mxu3 %v3900_v26  ;;  %v4386_v26 = vld [vmem:[%s5452_s21] ss:$0 sm:$0xff] }
 0x6ab   : > { %3211 = vmatpush.bf16.msrb.mxu3 %v3892_v58  ;;  %v4249_v58 = vld [vmem:[#allocation4 + $0x54] sm:$0xf] }
 0x715   : > { %v2486_v48 = vpop.f32.mrf.mxu0 }
 0x716   : > { %v2490_v53 = vmul.f32 0.015625, %v2486_v48  ;;  %v4044_v48 = vor.u32 %v4298_v42, %v4043_v28  ;;  %v3853_v28 = vld [vmem:[#allocation4 + $0x58] sm:$0xf0]  ;;  %v4272_v42 = vld [vmem:[#allocation4 + $0x104] sm:$0xf0] }
 0x718   : > { %3234 = vmatpush.bf16.msrb.mxu1 %v4044_v48 }
 0x719   : > { %v2462_v23 = vpop.f32.mrf.mxu3 }
 0x71a   : > { %v2489_v32 = vmul.f32 0.015625, %v2462_v23  ;;  %v3819_v23 = vld [vmem:[#allocation4 + $0x10] sm:$0xf] }
 0x71c   : > { %v2491_v49 = vmul.f32 %v2489_v32, %v2489_v32  ;;  %3807 = vmatmul.msk.f32.vlgmr.msra.gmra.mxu3 %vm1426_vm10, %v2489_v32  ;;  %v4242_v32 = vld [vmem:[#allocation4 + $0x14] sm:$0xf0] }
 0x71e   : > { %v2492_v8 = vsub.f32 %v2490_v53, %v2491_v49  ;;  %v3820_v53 = vor.u32 %v4242_v32, %v3819_v23  ;;  %v4258_v49 = vld [vmem:[#allocation4 + $0x94] sm:$0xf0]  ;;  %v4108_v23 = vor.u32 %v4314_v36, %v4107_v29  ;;  %v3856_v32 = vor.u32 %v4249_v58, %v3853_v28 }
 0x720   : > { %v2493_v40 = vadd.f32 1e-05, %v2492_v8  ;;  %v3884_v8 = vor.u32 %v4258_v49, %v3883_v33  ;;  %3199 = vmatpush.bf16.msrb.mxu2 %v3820_v53  ;;  %v4003_v33 = vld [vmem:[#allocation4 + $0x180] sm:$0xf]  ;;  %v4288_v53 = vld [vmem:[#allocation4 + $0x184] sm:$0xf0] }
 0x721   : > { %v4099_v49 = vld [vmem:[#allocation4 + $0x240] sm:$0xf] }
 0x722   : > { %4392 = vrsqrt.f32 %v2493_v40  ;;  %vm2500_vm3 = vweird.f32 %v2493_v40  ;;  %3212 = vmatpush.bf16.msrb.mxu3 %v3884_v8 }
 0x728   : > { %v4393_v45 = vpop.eup %4392 }
 0x729   : > { %v2495_v30 = vmul.f32 %v4393_v45, %v2493_v40  ;;  %vm2501_vm6 = vweird.f32 %v4393_v45  ;;  %v4035_v40 = vld [vmem:[#allocation4 + $0x1c0] sm:$0xf] }
 0x72a   : > { %vm2502_vm7 = vmor %vm2500_vm3, %vm2501_vm6  ;;  %v4036_v16 = vor.u32 %v4296_v41, %v4035_v40  ;;  %v4247_v40 = vld [vmem:[#allocation4 + $0x44] sm:$0xf]  ;;  %v3940_v41 = vor.u32 %v4272_v42, %v3939_v52 }
 0x72b   : > { %v2496_v46 = vmul.f32 %v4393_v45, %v2495_v30  ;;  %v3875_v30 = vld [vmem:[#allocation4 + $0x80] sm:$0xf] }
 0x72c   : > { %3235 = vmatpush.bf16.msrb.mxu1 %v4036_v16  ;;  %v3845_v16 = vld [vmem:[#allocation4 + $0x48] sm:$0xf0] }
 0x72d   : > { %v2497_v2 = vmul.f32 0.5, %v2496_v46  ;;  %v3848_v54 = vor.u32 %v4247_v40, %v3845_v16 }
 0x72f   : > { %v2498_v13 = vsub.f32 1.5, %v2497_v2  ;;  %v4256_v2 = vld [vmem:[#allocation4 + $0x84] sm:$0xf0] }
 0x730   : > { %3236 = vmatpush.bf16.msrb.mxu1 %v4028_v60  ;;  %v4245_v60 = vld [vmem:[#allocation4 + $0x34] sm:$0xf] }
 0x731   : > { %v2499_v50 = vmul.f32 %v4393_v45, %v2498_v13  ;;  %v3963_v13 = vld [vmem:[#allocation4 + $0x130] sm:$0xf] }
 0x733   : > { %v2503_v51 = vsel %vm2502_vm7, %v4393_v45, %v2499_v50  ;;  %v4240_v45 = vld [vmem:[#allocation4 + $0x4] sm:$0xf0]  ;;  %v4278_v50 = vld [vmem:[#allocation4 + $0x134] sm:$0xf0] }
 0x734   : > { %3808 = vmatmul.msk.f32.vlgmr.msra.gmra.mxu1 %vm1426_vm10, %v2503_v51  ;;  %v3812_v46 = vor.u32 %v4240_v45, %v3811_v44  ;;  %v3876_v51 = vor.u32 %v4256_v2, %v3875_v30  ;;  %v3964_v22 = vor.u32 %v4278_v50, %v3963_v13  ;;  %vm2597_vm10 = vcmask 1043456   ;;  %v4269_v44 = vld [vmem:[#allocation4 + $0xf4] sm:$0xf]  ;;  %v3933_v45 = vld [vmem:[#allocation4 + $0xf8] sm:$0xf0] }
 0x735   : > { %3237 = vmatpush.bf16.msrb.mxu1 %v4020_v18  ;;  %v4004_v2 = vor.u32 %v4288_v53, %v4003_v33  ;;  %v4100_v13 = vor.u32 %v4312_v39, %v4099_v49  ;;  %v4285_v50 = vld [vmem:[#allocation4 + $0x174] sm:$0xf]  ;;  %v3936_v55 = vor.u32 %v4269_v44, %v3933_v45  ;;  %v3821_v39 = vld [vmem:[#allocation4 + $0x18] sm:$0xf0]  ;;  %v4263_v45 = vld [vmem:[#allocation4 + $0xc4] sm:$0xf] }
 0x736   : > { %3200 = vmatpush.bf16.msrb.mxu2 %v3812_v46  ;;  %3213 = vmatpush.bf16.msrb.mxu3 %v3876_v51  ;;  %v3997_v51 = vld [vmem:[#allocation4 + $0x178] sm:$0xf0] }
 0x737   : > { %3223 = vmatpush.bf16.msrb.mxu0 %v3964_v22 }
 0x739   : > { %3238 = vmatpush.bf16.msrb.mxu1 %v4012_v37  ;;  %v3981_v37 = vld [vmem:[#allocation4 + $0x158] sm:$0xf0] }
 0x73a   : > { %3245 = vmatpush.bf16.msra.mxu2 %v4124_v1  ;;  %3258 = vmatpush.bf16.msra.mxu3 %v3872_v4  ;;  %v4000_v1 = vor.u32 %v4285_v50, %v3997_v51  ;;  %v3837_v4 = vld [vmem:[#allocation4 + $0x38] sm:$0xf0]  ;;  %v4279_v51 = vld [vmem:[#allocation4 + $0x144] sm:$0xf] }
 0x73b   : > { %3224 = vmatpush.bf16.msrb.mxu0 %v3956_v12  ;;  %v3925_v12 = vld [vmem:[#allocation4 + $0xe8] sm:$0xf0]  ;;  %v3840_v25 = vor.u32 %v4245_v60, %v3837_v4 }
 0x73d   : > { %3239 = vmatpush.bf16.msrb.mxu1 %v4004_v2 }
 0x73e   : > { %3246 = vmatpush.bf16.msra.mxu2 %v4116_v19  ;;  %3259 = vmatpush.bf16.msra.mxu3 %v3864_v9  ;;  %v4243_v9 = vld [vmem:[#allocation4 + $0x24] sm:$0xf] }
 0x73f   : > { %3225 = vmatpush.bf16.msrb.mxu0 %v3948_v27  ;;  %v4281_v27 = vld [vmem:[#allocation4 + $0x154] sm:$0xf] }
 0x741   : > { %3284 = vmatpush.bf16.msra.mxu1 %v4000_v1 }
 0x742   : > { %3247 = vmatpush.bf16.msra.mxu2 %v4108_v23  ;;  %3260 = vmatpush.bf16.msra.mxu3 %v3856_v32  ;;  %v3984_v23 = vor.u32 %v4281_v27, %v3981_v37 }
 0x743   : > { %3226 = vmatpush.bf16.msrb.mxu0 %v3940_v41 }
 0x746   : > { %3248 = vmatpush.bf16.msra.mxu2 %v4100_v13  ;;  %3261 = vmatpush.bf16.msra.mxu3 %v3848_v54 }
 0x747   : > { %3271 = vmatpush.bf16.msra.mxu0 %v3936_v55 }
 0x74a   : > { %3262 = vmatpush.bf16.msra.mxu3 %v3840_v25 }
 0x79f   : > { %v2528_v48 = vpop.f32.mrf.mxu3 }
 0x7b1   : > { %v2551_v34 = vpop.f32.mrf.mxu1 }
 0x7b2   : > { %v2558_v24 = vmul.f32 %v4385_v59, %v2551_v34  ;;  %v4310_v59 = vld [vmem:[#allocation4 + $0x234] sm:$0xf0]  ;;  %v3917_v34 = vld [vmem:[#allocation4 + $0xd8] sm:$0xf0] }
 0x7b4   : > { %v2560_v3 = vmul.f32 %v2558_v24, %v2528_v48  ;;  %v2566_v38 = vrot.slane %v2558_v24, 1  ;;  %v2567_v8 = vperm.slane %v2558_v24, 0  ;;  %v3920_v24 = vor.u32 %v4265_v6, %v3917_v34 }
 0x7b6   : > { %v2564_v30 = vsub.f32 %v4386_v26, %v2560_v3  ;;  %v2568_v46 = vperm.slane %v2566_v38, 0  ;;  %v2571_v22 = vmul.f32 %v2567_v8, %v5291_v0  ;;  %v2572_v61 = vmul.f32 %v2567_v8, %v5286_v57  ;;  %v4075_v3 = vld [vmem:[#allocation4 + $0x210] sm:$0xf]  ;;  %v4306_v38 = vld [vmem:[#allocation4 + $0x214] sm:$0xf0] }
 0x7b7   : > { %v4092_v0 = vor.u32 %v4310_v59, %v4091_v56  ;;  %v3928_v57 = vor.u32 %v4267_v10, %v3925_v12  ;;  %v3992_v26 = vor.u32 %v4283_v15, %v3989_v17  ;;  %v4241_v8 = vld [vmem:[#allocation4 + $0x14] sm:$0xf]  ;;  %v3973_v59 = vld [vmem:[#allocation4 + $0x148] sm:$0xf0]  ;;  %v4076_v10 = vor.u32 %v4306_v38, %v4075_v3  ;;  %v4239_v3 = vld [vmem:[#allocation4 + $0x4] sm:$0xf] }
 0x7b8   : > { %v2576_v62 = vrot.slane %v2564_v30, 1  ;;  %v2577_v63 = vperm.slane %v2564_v30, 0  ;;  %v2573_v5 = vmul.f32 %v2568_v46, %v5305_v47  ;;  %v2574_v11 = vmul.f32 %v2568_v46, %v5307_v43  ;;  %v3829_v43 = vld [vmem:[#allocation4 + $0x28] sm:$0xf0] }
 0x7b9   : > { %v4084_v47 = vor.u32 %v4308_v20, %v4083_v7  ;;  %v3832_v58 = vor.u32 %v4243_v9, %v3829_v43  ;;  %3272 = vmatpush.bf16.msra.mxu0 %v3928_v57  ;;  %3249 = vmatpush.bf16.msra.mxu2 %v4092_v0  ;;  %v3909_v30 = vld [vmem:[#allocation4 + $0xc8] sm:$0xf0]  ;;  %v3976_v15 = vor.u32 %v4279_v51, %v3973_v59 }
 0x7ba   : > { %v2578_v21 = vperm.slane %v2576_v62, 0  ;;  %v2581_v18 = vadd.f32 %v2577_v63, %v2571_v22  ;;  %v2582_v19 = vadd.f32 %v2577_v63, %v2572_v61  ;;  %3285 = vmatpush.bf16.msra.mxu1 %v3992_v26  ;;  %v3912_v12 = vor.u32 %v4263_v45, %v3909_v30  ;;  %v3813_v38 = vld [vmem:[#allocation4 + $0x8] sm:$0xf0] }
 0x7bb   : > { %3263 = vmatpush.bf16.msra.mxu3 %v3832_v58 }
 0x7bc   : > { %v2583_v14 = vadd.f32 %v2578_v21, %v2573_v5  ;;  %v2584_v35 = vadd.f32 %v2578_v21, %v2574_v11  ;;  %vm2585_vm8 = vcmp.gt.f32.partialorder %v2581_v18, 0.0  ;;  %vm2586_vm9 = vcmp.gt.f32.partialorder %v2582_v19, 0.0 }
 0x7bd   : > { %v2589_v29 = vmul.f32 0.2, %v2581_v18  ;;  %v2590_v36 = vmul.f32 0.2, %v2582_v19  ;;  %3273 = vmatpush.bf16.msra.mxu0 %v3920_v24  ;;  %3250 = vmatpush.bf16.msra.mxu2 %v4084_v47  ;;  %v3824_v5 = vor.u32 %v4241_v8, %v3821_v39 }
 0x7be   : > { %vm2587_vm12 = vcmp.gt.f32.partialorder %v2583_v14, 0.0  ;;  %vm2588_vm13 = vcmp.gt.f32.partialorder %v2584_v35, 0.0  ;;  %v2591_v28 = vmul.f32 0.2, %v2583_v14  ;;  %v2592_v52 = vmul.f32 0.2, %v2584_v35  ;;  %3286 = vmatpush.bf16.msra.mxu1 %v3984_v23 }
 0x7bf   : > { %v2593_v42 = vsel %vm2585_vm8, %v2581_v18, %v2589_v29  ;;  %v2594_v48 = vsel %vm2586_vm9, %v2582_v19, %v2590_v36  ;;  %3264 = vmatpush.bf16.msra.mxu3 %v3824_v5  ;;  %v4304_v23 = vld [vmem:[#allocation4 + $0x204] sm:$0xf0] }
 0x7c0   : > { %v2595_v32 = vsel %vm2587_vm12, %v2583_v14, %v2591_v28  ;;  %v2596_v33 = vsel %vm2588_vm13, %v2584_v35, %v2592_v52  ;;  %v2598_v53 = vsel %vm2597_vm10, %v2593_v42, 0.0  ;;  %v2616_v49 = vrot.slane %v2593_v42, 4 }
 0x7c1   : > { %v2599_v40 = vrot.slane %v2598_v53, 4  ;;  %v2605_v41 = vsel %vm2597_vm10, %v2595_v32, 0.0  ;;  %v2617_v16 = vrot.slane %v2595_v32, 4  ;;  %v2636_v44 = vsel %vm2597_vm10, %v2594_v48, 0.0  ;;  %3251 = vmatpush.bf16.msra.mxu2 %v4076_v10  ;;  %3274 = vmatpush.bf16.msra.mxu0 %v3912_v12 }
 0x7c2   : > { %v2606_v46 = vrot.slane %v2605_v41, 4  ;;  %v2620_v2 = vsel %vm2597_vm10, %v2616_v49, 0.0  ;;  %v2637_v13 = vrot.slane %v2636_v44, 4  ;;  %v2643_v50 = vsel %vm2597_vm10, %v2596_v33, 0.0  ;;  %3287 = vmatpush.bf16.msra.mxu1 %v3976_v15 }
 0x7c3   : > { %v2600_v22 = vadd.f32 %v2599_v40, %v2598_v53  ;;  %v2621_v54 = vrot.slane %v2620_v2, 4  ;;  %v2627_v55 = vsel %vm2597_vm10, %v2617_v16, 0.0  ;;  %v2644_v56 = vrot.slane %v2643_v50, 4  ;;  %v3901_v16 = vld [vmem:[#allocation4 + $0xb8] sm:$0xf0] }
 0x7c4   : > { %v2607_v60 = vadd.f32 %v2606_v46, %v2605_v41  ;;  %v2628_v61 = vrot.slane %v2627_v55, 4  ;;  %v2638_v62 = vadd.f32 %v2637_v13, %v2636_v44  ;;  %v2654_v63 = vrot.slane %v2594_v48, 4  ;;  %v4067_v48 = vld [vmem:[#allocation4 + $0x200] sm:$0xf]  ;;  %v4261_v41 = vld [vmem:[#allocation4 + $0xb4] sm:$0xf] }
 0x7c5   : > { %v2645_v1 = vadd.f32 %v2644_v56, %v2643_v50  ;;  %v2655_v4 = vrot.slane %v2596_v33, 4  ;;  %v2601_v19 = vrot.slane %v2600_v22, 2  ;;  %v2622_v25 = vadd.f32 %v2621_v54, %v2620_v2  ;;  %v4277_v2 = vld [vmem:[#allocation4 + $0x134] sm:$0xf]  ;;  %v3965_v13 = vld [vmem:[#allocation4 + $0x138] sm:$0xf0] }
 0x7c6   : > { %v2639_v11 = vrot.slane %v2638_v62, 2  ;;  %v2658_v0 = vsel %vm2597_vm10, %v2654_v63, 0.0  ;;  %v2608_v20 = vrot.slane %v2607_v60, 2  ;;  %v2629_v9 = vadd.f32 %v2628_v61, %v2627_v55  ;;  %v4259_v55 = vld [vmem:[#allocation4 + $0xa4] sm:$0xf] }
 0x7c7   : > { %v2646_v17 = vrot.slane %v2645_v1, 2  ;;  %v2659_v21 = vrot.slane %v2658_v0, 4  ;;  %v2665_v18 = vsel %vm2597_vm10, %v2655_v4, 0.0  ;;  %v2602_v47 = vadd.f32 %v2601_v19, %v2600_v22  ;;  %v3893_v56 = vld [vmem:[#allocation4 + $0xa8] sm:$0xf0] }
 0x7c8   : > { %v2640_v57 = vadd.f32 %v2639_v11, %v2638_v62  ;;  %v2666_v7 = vrot.slane %v2665_v18, 4  ;;  %v2609_v14 = vadd.f32 %v2608_v20, %v2607_v60  ;;  %v2623_v35 = vrot.slane %v2622_v25, 2  ;;  %v4275_v62 = vld [vmem:[#allocation4 + $0x124] sm:$0xf]  ;;  %v3957_v63 = vld [vmem:[#allocation4 + $0x128] sm:$0xf0] }
 0x7c9   : > { %v2660_v26 = vadd.f32 %v2659_v21, %v2658_v0  ;;  %v2647_v43 = vadd.f32 %v2646_v17, %v2645_v1  ;;  %v2603_v27 = vrot.slane %v2602_v47, 1  ;;  %v2630_v29 = vrot.slane %v2629_v9, 2  ;;  %v4301_v20 = vld [vmem:[#allocation4 + $0x1f4] sm:$0xf] }
 0x7ca   : > { %v2667_v6 = vadd.f32 %v2666_v7, %v2665_v18  ;;  %v2610_v58 = vrot.slane %v2609_v14, 1  ;;  %v2624_v24 = vadd.f32 %v2623_v35, %v2622_v25  ;;  %v2641_v37 = vrot.slane %v2640_v57, 1  ;;  %v4061_v25 = vld [vmem:[#allocation4 + $0x1f8] sm:$0xf0] }
 0x7cb   : > { %v2661_v34 = vrot.slane %v2660_v26, 2  ;;  %v2648_v36 = vrot.slane %v2647_v43, 1  ;;  %v2631_v52 = vadd.f32 %v2630_v29, %v2629_v9  ;;  %v2604_v8 = vadd.f32 %v2603_v27, %v2602_v47  ;;  %v4317_v47 = vld [vmem:[#allocation4 + $0x274] sm:$0xf]  ;;  %v4125_v9 = vld [vmem:[#allocation4 + $0x278] sm:$0xf0] }
 0x7cc   : > { %v2668_v28 = vrot.slane %v2667_v6, 2  ;;  %v2611_v32 = vadd.f32 %v2610_v58, %v2609_v14  ;;  %v2625_v33 = vrot.slane %v2624_v24, 1  ;;  %v2642_v45 = vadd.f32 %v2641_v37, %v2640_v57  ;;  %v3885_v35 = vld [vmem:[#allocation4 + $0x98] sm:$0xf0]  ;;  %v4381_v58 = vld [vmem:[%s5506_s7] ss:$0 sm:$0xff] }
 0x7cd   : > { %v2662_v42 = vadd.f32 %v2661_v34, %v2660_v26  ;;  %v2649_v53 = vadd.f32 %v2648_v36, %v2647_v43  ;;  %v2632_v39 = vrot.slane %v2631_v52, 1  ;;  %v4068_v46 = vor.u32 %v4304_v23, %v4067_v48  ;;  %v4257_v43 = vld [vmem:[#allocation4 + $0x94] sm:$0xf]  ;;  %v3949_v27 = vld [vmem:[#allocation4 + $0x118] sm:$0xf0] }
 0x7ce   : > { %v2669_v49 = vadd.f32 %v2668_v28, %v2667_v6  ;;  %v2626_v44 = vadd.f32 %v2625_v33, %v2624_v24  ;;  %v2613_v50 = vmul.f32 0.25, %v2611_v32  ;;  %v3816_v54 = vor.u32 %v4239_v3, %v3813_v38  ;;  %v4273_v34 = vld [vmem:[#allocation4 + $0x114] sm:$0xf]  ;;  %v4053_v48 = vld [vmem:[#allocation4 + $0x1e8] sm:$0xf0] }
 0x7cf   : > { %v2663_v40 = vrot.slane %v2662_v42, 1  ;;  %v2633_v51 = vadd.f32 %v2632_v39, %v2631_v52  ;;  %v2651_v59 = vmul.f32 0.25, %v2649_v53  ;;  %3252 = vmatpush.bf16.msra.mxu2 %v4068_v46  ;;  %v3904_v61 = vor.u32 %v4261_v41, %v3901_v16  ;;  %v4315_v33 = vld [vmem:[#allocation4 + $0x264] sm:$0xf]  ;;  %v4117_v53 = vld [vmem:[#allocation4 + $0x268] sm:$0xf0] }
 0x7d0   : > { %v2670_v30 = vrot.slane %v2669_v49, 1  ;;  %v2612_v1 = vmul.f32 0.25, %v2604_v8  ;;  %v2634_v4 = vmul.f32 0.25, %v2626_v44  ;;  %3265 = vmatpush.bf16.msra.mxu3 %v3816_v54  ;;  %v3968_v5 = vor.u32 %v4277_v2, %v3965_v13  ;;  %v4255_v38 = vld [vmem:[#allocation4 + $0x84] sm:$0xf] }
 0x7d1   : > { %v2664_v22 = vadd.f32 %v2663_v40, %v2662_v42  ;;  %v2635_v10 = vmul.f32 0.25, %v2633_v51  ;;  %v2650_v11 = vmul.f32 0.25, %v2642_v45  ;;  %3275 = vmatpush.bf16.msra.mxu0 %v3904_v61  ;;  %v3896_v15 = vor.u32 %v4259_v55, %v3893_v56  ;;  %v4299_v42 = vld [vmem:[#allocation4 + $0x1e4] sm:$0xf]  ;;  %v3877_v8 = vld [vmem:[#allocation4 + $0x88] sm:$0xf0] }
 0x7d2   : > { %v2671_v60 = vadd.f32 %v2670_v30, %v2669_v49  ;;  %v2676_v17 = vsel %vm1023_vm11, %v2613_v50, %v2612_v1  ;;  %3288 = vmatpush.bf16.msra.mxu1 %v3968_v5  ;;  %v3960_v18 = vor.u32 %v4275_v62, %v3957_v63  ;;  %v4064_v28 = vor.u32 %v4301_v20, %v4061_v25  ;;  %v4271_v39 = vld [vmem:[#allocation4 + $0x104] sm:$0xf]  ;;  %v3941_v40 = vld [vmem:[#allocation4 + $0x108] sm:$0xf0]  ;;  %v4297_v45 = vld [vmem:[#allocation4 + $0x1d4] sm:$0xf] }
 0x7d3   : > { %v2672_v0 = vmul.f32 0.25, %v2664_v22  ;;  %v2680_v21 = vsel %vm1023_vm11, %v2635_v10, %v2634_v4  ;;  %v2684_v57 = vsel %vm1023_vm11, %v2651_v59, %v2650_v11  ;;  %v4128_v52 = vor.u32 %v4317_v47, %v4125_v9  ;;  %v4045_v30 = vld [vmem:[#allocation4 + $0x1d8] sm:$0xf0]  ;;  %v4313_v46 = vld [vmem:[#allocation4 + $0x254] sm:$0xf] }
 0x7d4   : > { %v2673_v12 = vmul.f32 0.25, %v2671_v60  ;;  %v2690_v19 = vpack.c.bf16 %v2680_v21, %v2676_v17  ;;  %v3888_v49 = vor.u32 %v4257_v43, %v3885_v35  ;;  %v3952_v3 = vor.u32 %v4273_v34, %v3949_v27  ;;  %v4109_v2 = vld [vmem:[#allocation4 + $0x258] sm:$0xf0]  ;;  %v4326_v51 = vld [vmem:[%s5457_s26 + $0x38] sm:$0xff]  ;;  %v4295_v55 = vld [vmem:[#allocation4 + $0x1c4] sm:$0xf] }
 0x7d5   : > { %3276 = vmatpush.bf16.msra.mxu0 %v3896_v15  ;;  %v1170_v41 = vadd.f32 %v4381_v58, %v5171_v31  ;;  %v4056_v16 = vor.u32 %v4299_v42, %v4053_v48  ;;  %v4120_v44 = vor.u32 %v4315_v33, %v4117_v53  ;;  %v3880_v13 = vor.u32 %v4255_v38, %v3877_v8  ;;  %v4037_v56 = vld [vmem:[#allocation4 + $0x1c8] sm:$0xf0]  ;;  %v4311_v59 = vld [vmem:[#allocation4 + $0x244] sm:$0xf]  ;;  %v4293_v63 = vld [vmem:[#allocation4 + $0x1b4] sm:$0xf] }
 0x7d6   : > { %v2688_v7 = vsel %vm1023_vm11, %v2673_v12, %v2672_v0  ;;  %v2695_v6 = vunpack.c.l.b16 %v2690_v19  ;;  %v2696_v14 = vunpack.c.h.b16 %v2690_v19  ;;  %3289 = vmatpush.bf16.msra.mxu1 %v3960_v18  ;;  %v3944_v50 = vor.u32 %v4271_v39, %v3941_v40  ;;  %v4101_v60 = vld [vmem:[#allocation4 + $0x248] sm:$0xf0]  ;;  %v4029_v4 = vld [vmem:[#allocation4 + $0x1b8] sm:$0xf0]  ;;  %v4309_v10 = vld [vmem:[#allocation4 + $0x234] sm:$0xf] }
 0x7d7   : > { %v2691_v26 = vpack.c.bf16 %v2688_v7, %v2684_v57  ;;  %v1174_v22 = vmul.f32 0.2, %v1170_v41  ;;  %v4048_v31 = vor.u32 %v4297_v45, %v4045_v30  ;;  %v4112_v54 = vor.u32 %v4313_v46, %v4109_v2  ;;  %v4093_v5 = vld [vmem:[#allocation4 + $0x238] sm:$0xf0]  ;;  %v4291_v15 = vld [vmem:[#allocation4 + $0x1a4] sm:$0xf] }
 0x7d8   : > { %v5353_v24 = vpack.c.b16 %v2695_v6, %v2695_v6  ;;  %v5355_v37 = vpack.c.b16 %v2696_v14, %v2696_v14  ;;  %vm1173_vm11 = vcmp.gt.f32.partialorder %v1170_v41, 0.0  ;;  %v4040_v61 = vor.u32 %v4295_v55, %v4037_v56  ;;  %v4021_v17 = vld [vmem:[#allocation4 + $0x1a8] sm:$0xf0]  ;;  %v4307_v21 = vld [vmem:[#allocation4 + $0x224] sm:$0xf]  ;;  %v4323_v58 = vld [vmem:[%s5457_s26 + $0x20] sm:$0xff] }
 0x7d9   : > { %v2697_v29 = vunpack.c.l.b16 %v2691_v26  ;;  %v2698_v36 = vunpack.c.h.b16 %v2691_v26  ;;  %3277 = vmatpush.bf16.msra.mxu0 %v3888_v49  ;;  %v4104_v62 = vor.u32 %v4311_v59, %v4101_v60  ;;  %v1175_v1 = vsel %vm1173_vm11, %v1170_v41, %v1174_v22  ;;  %v4085_v18 = vld [vmem:[#allocation4 + $0x228] sm:$0xf0]  ;;  %v4289_v7 = vld [vmem:[#allocation4 + $0x194] sm:$0xf]  ;;  %v4013_v20 = vld [vmem:[#allocation4 + $0x198] sm:$0xf0] }
 0x7da   : > { %3201 = vmatmul.bf16.vlgmr.msrb.gmra.mxu2 %v5353_v24  ;;  %3214 = vmatmul.bf16.vlgmr.msrb.gmra.mxu3 %v5355_v37  ;;  %v2692_v11 = vpack.c.bf16 %v1175_v1, %v1175_v1  ;;  %v4032_v0 = vor.u32 %v4293_v63, %v4029_v4  ;;  %v4096_v12 = vor.u32 %v4309_v10, %v4093_v5  ;;  %v4305_v25 = vld [vmem:[#allocation4 + $0x214] sm:$0xf]  ;;  %v4077_v26 = vld [vmem:[#allocation4 + $0x218] sm:$0xf0]  ;;  %v4287_v43 = vld [vmem:[#allocation4 + $0x184] sm:$0xf] }
 0x7db   : > { %v2701_v23 = vpack.c.b16 %v2697_v29, %v2697_v29  ;;  %v5357_v32 = vpack.c.b16 %v2698_v36, %v2698_v36  ;;  %3297 = vmatpush.bf16.msrb.mxu2 %v4064_v28  ;;  %3310 = vmatpush.bf16.msrb.mxu3 %v4128_v52  ;;  %v4024_v19 = vor.u32 %v4291_v15, %v4021_v17  ;;  %v4005_v6 = vld [vmem:[#allocation4 + $0x188] sm:$0xf0]  ;;  %v4303_v14 = vld [vmem:[#allocation4 + $0x204] sm:$0xf]  ;;  %v2787_v49 = vld [vmem:[%s5456_s25] sm:$0x3] }
 0x7dc   : > { %3290 = vmatpush.bf16.msra.mxu1 %v3952_v3  ;;  %v4088_v57 = vor.u32 %v4307_v21, %v4085_v18  ;;  %v4016_v47 = vor.u32 %v4289_v7, %v4013_v20  ;;  %v4080_v9 = vor.u32 %v4305_v25, %v4077_v26  ;;  %v4069_v35 = vld [vmem:[#allocation4 + $0x208] sm:$0xf0]  ;;  %v4008_v34 = vor.u32 %v4287_v43, %v4005_v6  ;;  %v4324_v36 = vld [vmem:[%s5457_s26 + $0x28] sm:$0xff]  ;;  %v4327_v22 = vld [vmem:[%s5457_s26 + $0x40] sm:$0xff] }
 0x7dd   : > { %3227 = vmatmul.bf16.vlgmr.msrb.gmra.mxu0 %v2701_v23  ;;  %3240 = vmatmul.bf16.vlgmr.msrb.gmra.mxu1 %v5357_v32  ;;  %v4072_v27 = vor.u32 %v4303_v14, %v4069_v35  ;;  %v4325_v29 = vld [vmem:[%s5457_s26 + $0x30] sm:$0xff]  ;;  %v4320_v42 = vld [vmem:[%s5457_s26 + $0x8] sm:$0xff]  ;;  %v4330_v3 = vld [vmem:[%s5457_s26 + $0x58] sm:$0xff]  ;;  %v2789_v38 = vperm.slane %v2787_v49, 0 }
 0x7de   : > { %3278 = vmatpush.bf16.msra.mxu0 %v3880_v13  ;;  %v4333_v28 = vld [vmem:[%s5457_s26 + $0x70] sm:$0xff]  ;;  %v4332_v48 = vld [vmem:[%s5457_s26 + $0x68] sm:$0xff] }
 0x7df   : > { %3298 = vmatpush.bf16.msrb.mxu2 %v4056_v16  ;;  %3311 = vmatpush.bf16.msrb.mxu3 %v4120_v44  ;;  %v4321_v52 = vld [vmem:[%s5457_s26 + $0x10] sm:$0xff]  ;;  %v4328_v2 = vld [vmem:[%s5457_s26 + $0x48] sm:$0xff] }
 0x7e0   : > { %3291 = vmatpush.bf16.msra.mxu1 %v3944_v50  ;;  %v4329_v40 = vld [vmem:[%s5457_s26 + $0x50] sm:$0xff] }
 0x7e2   : > { %3463 = vmatpush.bf16.msrb.mxu0 %v4326_v51 }
 0x7e3   : > { %3299 = vmatpush.bf16.msrb.mxu2 %v4048_v31  ;;  %3312 = vmatpush.bf16.msrb.mxu3 %v4112_v54 }
 0x7e6   : > { %3464 = vmatpush.bf16.msrb.mxu0 %v4325_v29 }
 0x7e7   : > { %3300 = vmatpush.bf16.msrb.mxu2 %v4040_v61  ;;  %3313 = vmatpush.bf16.msrb.mxu3 %v4104_v62  ;;  %v2790_v62 = vperm.slane %v2787_v49, 1 }
 0x7ea   : > { %3253 = vmatmul.bf16.vlgmr.msra.gmra.mxu2 %v2692_v11  ;;  %3266 = vmatmul.bf16.vlgmr.msra.gmra.mxu3 %v5353_v24  ;;  %v4322_v24 = vld [vmem:[%s5457_s26 + $0x18] sm:$0xff] }
 0x7eb   : > { %3301 = vmatpush.bf16.msrb.mxu2 %v4032_v0  ;;  %3314 = vmatpush.bf16.msrb.mxu3 %v4096_v12 }
 0x7ec   : > { %3465 = vmatpush.bf16.msrb.mxu0 %v4324_v36 }
 0x7ed   : > { %3279 = vmatmul.bf16.vlgmr.msra.gmra.mxu0 %v5355_v37  ;;  %3292 = vmatmul.bf16.vlgmr.msra.gmra.mxu1 %v2701_v23  ;;  %v4334_v37 = vld [vmem:[%s5457_s26 + $0x78] sm:$0xff]  ;;  %v4319_v23 = vld [vmem:[%s5457_s26] sm:$0xff] }
 0x7ee   : > { %3476 = vmatpush.bf16.msrb.mxu1 %v4334_v37 }
 0x7ef   : > { %3302 = vmatpush.bf16.msrb.mxu2 %v4024_v19  ;;  %3315 = vmatpush.bf16.msrb.mxu3 %v4088_v57 }
 0x7f0   : > { %3466 = vmatpush.bf16.msrb.mxu0 %v4323_v58 }
 0x7f2   : > { %3477 = vmatpush.bf16.msrb.mxu1 %v4333_v28 }
 0x7f3   : > { %3303 = vmatpush.bf16.msrb.mxu2 %v4016_v47  ;;  %3316 = vmatpush.bf16.msrb.mxu3 %v4080_v9  ;;  %v4387_v47 = vld [vmem:[#allocation2] ss:$0 sm:$0xff] }
 0x7f4   : > { %3467 = vmatpush.bf16.msrb.mxu0 %v4322_v24 }
 0x7f6   : > { %3478 = vmatpush.bf16.msrb.mxu1 %v4332_v48 }
 0x7f7   : > { %3304 = vmatpush.bf16.msrb.mxu2 %v4008_v34  ;;  %3317 = vmatpush.bf16.msrb.mxu3 %v4072_v27 }
 0x7f8   : > { %3468 = vmatpush.bf16.msrb.mxu0 %v4321_v52 }
 0x7fa   : > { %3305 = vmatmul.bf16.vlgmr.msrb.gmra.mxu2 %v5357_v32  ;;  %3318 = vmatmul.bf16.vlgmr.msrb.gmra.mxu3 %v2692_v11  ;;  %v4331_v32 = vld [vmem:[%s5457_s26 + $0x60] sm:$0xff] }
 0x7fb   : > { %3479 = vmatpush.bf16.msrb.mxu1 %v4331_v32 }
 0x7fc   : > { %3469 = vmatpush.bf16.msrb.mxu0 %v4320_v42 }
 0x7ff   : > { %3480 = vmatpush.bf16.msrb.mxu1 %v4330_v3 }
 0x800   : > { %3470 = vmatpush.bf16.msrb.mxu0 %v4319_v23 }
 0x803   : > { %3481 = vmatpush.bf16.msrb.mxu1 %v4329_v40 }
 0x807   : > { %3482 = vmatpush.bf16.msrb.mxu1 %v4328_v2 }
 0x80b   : > { %3483 = vmatpush.bf16.msrb.mxu1 %v4327_v22 }
 0x85a   : > { %v3228_v33 = vpop.f32.mrf.mxu0  ;;  %v3241_v53 = vpop.f32.mrf.mxu1 }
 0x85d   : > { %v3202_v8 = vpop.f32.mrf.mxu2  ;;  %v3215_v39 = vpop.f32.mrf.mxu3 }
 0x85e   : > { %v3203_v41 = vadd.f32 %v3202_v8, %v2789_v38 }
 0x860   : > { %v3216_v45 = vadd.f32 %v3215_v39, %v3203_v41 }
 0x862   : > { %v3230_v16 = vpop.f32.mrf.mxu0  ;;  %v3243_v44 = vpop.f32.mrf.mxu1  ;;  %v3229_v13 = vadd.f32 %v3228_v33, %v3216_v45 }
 0x864   : > { %v3242_v31 = vadd.f32 %v3241_v53, %v3229_v13 }
 0x865   : > { %v3204_v30 = vpop.f32.mrf.mxu2  ;;  %v3217_v46 = vpop.f32.mrf.mxu3 }
 0x86a   : > { %v3280_v50 = vpop.f32.mrf.mxu0  ;;  %v3293_v51 = vpop.f32.mrf.mxu1 }
 0x86d   : > { %v3254_v54 = vpop.f32.mrf.mxu2  ;;  %v3267_v55 = vpop.f32.mrf.mxu3 }
 0x86e   : > { %v3255_v56 = vadd.f32 %v3254_v54, %v3242_v31  ;;  %v3268_v4 = vadd.f32 %v3267_v55, %v2790_v62 }
 0x870   : > { %vm3323_vm14 = vcmp.gt.f32.partialorder %v3255_v56, 0.0  ;;  %v3325_v59 = vmul.f32 0.2, %v3255_v56  ;;  %v3281_v11 = vadd.f32 %v3280_v50, %v3268_v4 }
 0x872   : > { %v3282_v60 = vpop.f32.mrf.mxu0  ;;  %v3295_v61 = vpop.f32.mrf.mxu1  ;;  %v3327_v63 = vsel %vm3323_vm14, %v3255_v56, %v3325_v59  ;;  %v3294_v0 = vadd.f32 %v3293_v51, %v3281_v11 }
 0x873   : > { %v3329_v1 = vpack.c.bf16 %v3327_v63, %v3327_v63 }
 0x875   : > { %v3256_v10 = vpop.f32.mrf.mxu2  ;;  %v3269_v5 = vpop.f32.mrf.mxu3  ;;  %3471 = vmatmul.bf16.vlgmr.msrb.gmra.mxu0 %v3329_v1 }
 0x87d   : > { %v3306_v12 = vpop.f32.mrf.mxu2  ;;  %v3319_v15 = vpop.f32.mrf.mxu3 }
 0x87e   : > { %v3307_v17 = vadd.f32 %v3306_v12, %v3294_v0 }
 0x880   : > { %v3320_v21 = vadd.f32 %v3319_v15, %v3307_v17 }
 0x882   : > { %vm3324_vm15 = vcmp.gt.f32.partialorder %v3320_v21, 0.0  ;;  %v3326_v18 = vmul.f32 0.2, %v3320_v21 }
 0x884   : > { %v3328_v19 = vsel %vm3324_vm15, %v3320_v21, %v3326_v18 }
 0x885   : > { %v3330_v57 = vpack.c.bf16 %v3328_v19, %v3328_v19  ;;  %v3308_v7 = vpop.f32.mrf.mxu2  ;;  %v3321_v20 = vpop.f32.mrf.mxu3 }
 0x887   : > { %3484 = vmatmul.bf16.vlgmr.msrb.gmra.mxu1 %v3330_v57 }
 0x8f2   : > { %v3472_v25 = vpop.f32.mrf.mxu0 }
 0x8f3   : > { %v3473_v9 = vadd.f32 %v4387_v47, %v3472_v25 }
 0x8fa   : > { %v3474_v26 = vpop.f32.mrf.mxu0 }
 0x904   : > { %v3485_v43 = vpop.f32.mrf.mxu1 }
 0x905   : > { %v3486_v6 = vadd.f32 %v3485_v43, %v3473_v9 }
 0x907   : > { %v3489_v14 = vsub.f32 0.0, %v3486_v6 }
 0x909   : > { %v3490_v35 = vmul.f32 1.442695, %v3489_v14 }
 0x90b   : > { %4394 = vpow2.f32 %v3490_v35 }
 0x90c   : > { %v3487_v34 = vpop.f32.mrf.mxu1 }
 0x911   : > { %v4395_v27 = vpop.eup %4394 }
 0x912   : > { %v3492_v29 = vadd.f32 1.0, %v4395_v27 }
 0x914   : > { %4396 = vrcp.f32 %v3492_v29  ;;  %v3504_v37 = vand.u32 2147483648, %v3492_v29  ;;  %v3502_v52 = vand.u32 2147483647, %v3492_v29  ;;  %vm3498_vm1 = vweird.f32 %v3492_v29 }
 0x916   : > { %v3505_v48 = vor.u32 1.1754944e-38, %v3504_v37  ;;  %vm3503_vm5 = vcmp.eq.f32.partialorder %v3502_v52, 8.507059e+37 }
 0x91a   : > { %v4397_v36 = vpop.eup %4396 }
 0x91b   : > { %v3494_v58 = vmul.f32 %v4397_v36, %v3492_v29  ;;  %vm3499_vm0 = vweird.f32 %v4397_v36 }
 0x91c   : > { %vm3500_vm2 = vmor %vm3498_vm1, %vm3499_vm0 }
 0x91d   : > { %v3495_v24 = vsub.f32 1.0, %v3494_v58 }
 0x91f   : > { %v3496_v28 = vmul.f32 %v4397_v36, %v3495_v24 }
 0x921   : > { %v3497_v42 = vadd.f32 %v4397_v36, %v3496_v28 }
 0x923   : > { %v3501_v23 = vsel %vm3500_vm2, %v4397_v36, %v3497_v42 }
 0x924   : > { %v3506_v32 = vsel %vm3503_vm5, %v3505_v48, %v3501_v23 }
 0x925   : > { %v3509_v33 = vrot.slane %v3506_v32, 1  ;;  %3512 = vst.msk [vmem:[%s987_s11] sm:$0x1] %vm3511_vm4, %v3506_v32 }
 0x927   : > { %3513 = vst.msk [vmem:[%s987_s11 + $0x1] sm:$0x1] %vm3511_vm4, %v3509_v33 }
 0x928 PF: > { %s5508_s3 = sld [smem:[#allocation7_spill]]  ;;  %s5510_s9 = smov %s4450_s30 }
 0x929   : > { %s5509_s28 = sld [smem:[#allocation8_spill]] }
 0x92e   : > { %p38_p12 = scmp.ge.s32.totalorder %s5508_s3, 4  }
 0x92f   : > { %s5511_s30 = smov %s5509_s28 }
 0x930   :  { %40 = sbr.rel (!%p38_p12) target bundleno = 18 (0x12), region = 219 }
 0x935   :  { %3534 = vsyncpa [#allocation5], 1 }
 0x936   :  { %3536 = vsyncpa [#allocation5 + $0x1], 1 }

</bundles_post_ra>
